<compile_context>
chip_gen: v7x
topology: tpu7x:2x2x1
jax: 0.10.0
libtpu: 0.0.40
codegen_flags: <defaults>
</compile_context>

<pallas_src>
import numpy as np
import jax
import jax.numpy as jnp
from jax.experimental import pallas as pl
from jax.experimental.pallas import tpu as pltpu


def _round_up(x, m):
    return (x + m - 1) // m * m


# ----------------------------- parameter packing ------------------------------

def _pack_params(params, hidden, output_size, num_layers):
    """Pack parameters into one bf16 weight slab + one f32 bias slab.

    Weight slab rows are padded to multiples of 8 so every in-kernel slice is
    sublane aligned; lane width is round_up(4H + O, 128) so the fused
    [lin_w @ W_x0_dec | lin_w] decoder-head matrix fits lane-dense.
    Returns (w_slab, w_off, b_slab, b_off, lanes); w_off[name] = (row, rows).
    """
    H, O, L = hidden, output_size, num_layers
    G = 4 * H
    lanes = _round_up(G + O, 128)
    # guard the silent-corruption case flagged in review (lanes must cover all
    # column counts used by the in-kernel views)
    assert lanes >= G and lanes >= G + O

    w_blocks, w_off = [], {}
    row = 0

    def add_w(name, a2d):
        nonlocal row
        a = np.asarray(a2d, np.float32)
        r, cc = a.shape
        assert cc <= lanes, (name, cc, lanes)
        rp = _round_up(r, 8)
        buf = np.zeros((rp, lanes), np.float32)
        buf[:r, :cc] = a
        w_blocks.append(buf)
        w_off[name] = (row, r)
        row += rp

    def wx(tag, l):   # [in_l, 4H] (transposed for x @ W)
        return np.asarray(params[tag][l]["wih"], np.float32).T

    def wh(tag, l):   # [H, 4H]
        return np.asarray(params[tag][l]["whh"], np.float32).T

    def bias(tag, l):  # [4H]  (PyTorch adds b_ih + b_hh)
        return (np.asarray(params[tag][l]["bih"], np.float32)
                + np.asarray(params[tag][l]["bhh"], np.float32))

    add_w("enc0_wx", wx("enc", 0))
    for l in range(L):
        add_w(f"enc{l}_wh", wh("enc", l))
        if l >= 1:
            add_w(f"enc{l}_wx", wx("enc", l))
    add_w("dec0_wx", wx("dec", 0))
    for l in range(L):
        add_w(f"dec{l}_wh", wh("dec", l))
        if l >= 1:
            add_w(f"dec{l}_wx", wx("dec", l))

    lin_w = np.asarray(params["lin_w"], np.float32).T          # [H, O]
    lin_b = np.asarray(params["lin_b"], np.float32)            # [O]
    wx0d = wx("dec", 0)                                        # [O, 4H]
    # fused decoder head: one matmul on h[last] gives [next-step layer-0 gate
    # x-contribution | linear output]; gate part first so both slices start at
    # lane-aligned offsets (0 and 4H=128).
    add_w("combo_w", np.concatenate([lin_w @ wx0d, lin_w], axis=1))   # [H, 4H+O]

    w_slab = jnp.asarray(np.concatenate(w_blocks, axis=0), jnp.bfloat16)

    # ---- f32 bias slab (one row per bias vector) ----
    b_rows, b_off = [], {}

    def add_b(name, vec):
        v = np.asarray(vec, np.float32).reshape(-1)
        assert v.shape[0] <= lanes, (name, v.shape, lanes)
        buf = np.zeros((lanes,), np.float32)
        buf[:v.shape[0]] = v
        b_off[name] = len(b_rows)
        b_rows.append(buf)

    for tag in ("enc", "dec"):
        for l in range(L):
            add_b(f"{tag}{l}_b", bias(tag, l))
    # combo bias: [lin_b @ W_x0_dec + b_dec0 | lin_b]
    add_b("combo_b", np.concatenate([lin_b @ wx0d + bias("dec", 0), lin_b]))

    nb = _round_up(len(b_rows), 8)
    b_buf = np.zeros((nb, lanes), np.float32)
    b_buf[:len(b_rows)] = np.stack(b_rows)
    b_slab = jnp.asarray(b_buf)

    return w_slab, w_off, b_slab, b_off, lanes


# ----------------------------- Pallas kernel ----------------------------------

def _make_kernel(w_off, b_off, lanes, num_layers, t_in, t_out, hidden, batch,
                 out_size):
    L, H, B, O = num_layers, hidden, batch, out_size
    G = 4 * H
    f32, bf16 = jnp.float32, jnp.bfloat16

    def kernel(x_ref, w_ref, b_ref, out_ref):
        # ---------- hoisted parameter views / bias broadcasts ----------
        def w_full(name):                        # bf16 [rows, lanes]
            off, rows = w_off[name]
            return w_ref[off:off + rows, :]

        def w_g(name):                           # bf16 [rows, 4H]
            return w_full(name)[:, :G]

        def b_bcast(name, width, reps):          # f32 [reps, width]
            i = b_off[name]
            return jnp.broadcast_to(b_ref[i:i + 1, :width], (reps, width))

        enc0_wx = w_g("enc0_wx")
        enc_wh = [w_g(f"enc{l}_wh") for l in range(L)]
        enc_wx = [None] + [w_g(f"enc{l}_wx") for l in range(1, L)]
        dec0_wx = w_g("dec0_wx")
        dec_wh = [w_g(f"dec{l}_wh") for l in range(L)]
        dec_wx = [None] + [w_g(f"dec{l}_wx") for l in range(1, L)]
        combo_w = w_full("combo_w")              # [H, lanes] (zero-padded cols)

        enc_b = [None] + [b_bcast(f"enc{l}_b", G, B) for l in range(1, L)]
        dec_b = [b_bcast(f"dec{l}_b", G, B) for l in range(L)]
        combo_b = b_bcast("combo_b", lanes, B)

        # lane mask selecting the `g` gate (tanh) columns, built once
        lane = jax.lax.broadcasted_iota(jnp.int32, (B, G), 1)
        is_g = (lane >= 2 * H) & (lane < 3 * H)

        def mm(a, w):                            # bf16 operands, f32 accumulate
            return jnp.dot(a.astype(bf16), w, preferred_element_type=f32)

        def activate(gates, c):
            # full-width: one tanh + one sigmoid over the whole [B, 4H] vreg,
            # slice i/f/g/o afterwards (2 EUP pushes instead of 4)
            act = jnp.where(is_g, jnp.tanh(gates), jax.nn.sigmoid(gates))
            i = act[:, 0 * H:1 * H]
            f = act[:, 1 * H:2 * H]
            g = act[:, 2 * H:3 * H]
            o = act[:, 3 * H:4 * H]
            c_new = f * c + i * g
            h_new = o * jnp.tanh(c_new)
            return h_new, c_new

        # hoisted encoder layer-0 input projection (+ f32 bias): one MXU call
        x_all = x_ref[...]                                        # [T_in*B, I]
        x_proj = mm(x_all, enc0_wx) + b_bcast("enc0_b", G, t_in * B)

        zeros = jnp.zeros((B, H), f32)
        h = [zeros] * L
        c = [zeros] * L

        # -------------------------- encoder ----------------------------
        # T_in is small; Python-unrolled so the hoisted x_proj slices are static
        for t in range(t_in):
            xc = x_proj[t * B:(t + 1) * B, :]                     # [B, 4H]
            h[0], c[0] = activate(xc + mm(h[0], enc_wh[0]), c[0])
            for l in range(1, L):
                gates = mm(h[l - 1], enc_wx[l]) + mm(h[l], enc_wh[l]) + enc_b[l]
                h[l], c[l] = activate(gates, c[l])

        # -------------------------- decoder ----------------------------
        # first decoder input = last encoder input, projected once (bias folded)
        x_last = x_all[(t_in - 1) * B:t_in * B, :]
        x_contrib = mm(x_last, dec0_wx) + dec_b[0]                # [B, 4H]

        outs = []
        for _ in range(t_out):
            h[0], c[0] = activate(x_contrib + mm(h[0], dec_wh[0]), c[0])
            for l in range(1, L):
                gates = mm(h[l - 1], dec_wx[l]) + mm(h[l], dec_wh[l]) + dec_b[l]
                h[l], c[l] = activate(gates, c[l])
            # fused Linear head + next step's layer-0 x-projection: ONE matmul
            comb = mm(h[L - 1], combo_w) + combo_b                # [B, lanes]
            x_contrib = comb[:, :G]            # next-step gates (bias included)
            outs.append(comb[:, G:G + O])      # linear output for this step

        # single lane-dense (128-multiple) store; wrapper strips the padding
        pad = out_ref.shape[1] - t_out * O
        if pad > 0:
            outs.append(jnp.zeros((B, pad), f32))
        out_ref[...] = jnp.concatenate(outs, axis=1).astype(out_ref.dtype)

    return kernel


# ----------------------------- wrapper / glue ---------------------------------

def init_params(key, input_size, output_size, hidden, num_layers):
    """Deterministic PyTorch-style uniform(-1/sqrt(H), 1/sqrt(H)) init."""
    bound = 1.0 / np.sqrt(hidden)
    keys = iter(jax.random.split(key, 8 * num_layers + 2))

    def uni(shape):
        return jax.random.uniform(next(keys), shape, jnp.float32, -bound, bound)

    def make_lstm(first_in):
        layers = []
        for l in range(num_layers):
            in_l = first_in if l == 0 else hidden
            layers.append(dict(
                wih=uni((4 * hidden, in_l)),
                whh=uni((4 * hidden, hidden)),
                bih=uni((4 * hidden,)),
                bhh=uni((4 * hidden,)),
            ))
        return layers

    return dict(
        enc=make_lstm(input_size),
        dec=make_lstm(output_size),
        lin_w=uni((output_size, hidden)),
        lin_b=uni((output_size,)),
    )


def seq2seq_forward(input_seq, params, *, sequence_length, hidden, num_layers,
                    output_size):
    B, T_in, input_size = input_seq.shape
    if input_size != output_size:
        raise ValueError("decoder feeds its own output back as input; "
                         "input_size must equal output_size")

    # time-major and flattened to [T_in*B, I] so the encoder layer-0 input
    # projection is a single hoisted matmul in the kernel
    x_flat = jnp.transpose(input_seq, (1, 0, 2)).reshape(
        T_in * B, input_size).astype(jnp.float32)

    w_slab, w_off, b_slab, b_off, lanes = _pack_params(
        params, hidden, output_size, num_layers)

    out_lanes = _round_up(sequence_length * output_size, 128)
    kernel = _make_kernel(w_off, b_off, lanes, num_layers, T_in,
                          sequence_length, hidden, B, output_size)
    vmem = pl.BlockSpec(memory_space=pltpu.MemorySpace.VMEM)

    out_pad = pl.pallas_call(
        kernel,
        out_shape=jax.ShapeDtypeStruct((B, out_lanes), jnp.float32),
        in_specs=[vmem, vmem, vmem],
        out_specs=vmem,
        compiler_params=pltpu.CompilerParams(
            vmem_limit_bytes=32 * 1024 * 1024),
    )(x_flat, w_slab, b_slab)

    out = out_pad[:, :sequence_length * output_size]
    return out.reshape(B, sequence_length, output_size)


# ----------------------------- pure-JAX reference -----------------------------

def ref_forward(input_seq, params, *, sequence_length, hidden, num_layers):
    H = hidden

    def cell(x, h, c, lp):
        gates = x @ lp["wih"].T + lp["bih"] + h @ lp["whh"].T + lp["bhh"]
        i = jax.nn.sigmoid(gates[:, :H])
        f = jax.nn.sigmoid(gates[:, H:2 * H])
        g = jnp.tanh(gates[:, 2 * H:3 * H])
        o = jax.nn.sigmoid(gates[:, 3 * H:])
        c_new = f * c + i * g
        return o * jnp.tanh(c_new), c_new

    B, T_in, _ = input_seq.shape
    h = [jnp.zeros((B, H), jnp.float32) for _ in range(num_layers)]
    c = [jnp.zeros((B, H), jnp.float32) for _ in range(num_layers)]
    for t in range(T_in):
        layer_in = input_seq[:, t, :]
        for l in range(num_layers):
            h[l], c[l] = cell(layer_in, h[l], c[l], params["enc"][l])
            layer_in = h[l]
    dec_in = input_seq[:, -1, :]
    outs = []
    for _ in range(sequence_length):
        layer_in = dec_in
        for l in range(num_layers):
            h[l], c[l] = cell(layer_in, h[l], c[l], params["dec"][l])
            layer_in = h[l]
        out = layer_in @ params["lin_w"].T + params["lin_b"]
        outs.append(out[:, None, :])
        dec_in = out
    return jnp.concatenate(outs, axis=1)


# ----------------------------------- main --------------------------------------

if __name__ == "__main__":
    batch = 2
    input_size = 8          # must equal output_size (decoder consumes outputs)
    output_size = 8
    hidden = 32
    num_layers = 2
    t_in = 8                # encoder input length
    sequence_length = 8     # decoder output length

    key = jax.random.PRNGKey(0)
    k_x, k_p = jax.random.split(key)
    input_seq = jax.random.normal(k_x, (batch, t_in, input_size), jnp.float32)
    params = init_params(k_p, input_size, output_size, hidden, num_layers)

    out = seq2seq_forward(input_seq, params,
                          sequence_length=sequence_length, hidden=hidden,
                          num_layers=num_layers, output_size=output_size)
    out = jax.block_until_ready(out)

    ref = ref_forward(input_seq, params, sequence_length=sequence_length,
                      hidden=hidden, num_layers=num_layers)
    ref = jax.block_until_ready(ref)

    assert out.shape == (batch, sequence_length, output_size), out.shape
    # Kernel uses bf16 MXU operands (fp32 accumulate/state, f32 biases) vs the
    # fp32 reference, so the tolerance is loosened accordingly.
    np.testing.assert_allclose(np.asarray(out), np.asarray(ref),
                               rtol=5e-2, atol=5e-2)
    print("KERNEL_OK")
</pallas_src>

<mosaic_0001>
module attributes {stable_mosaic.version = 11 : i64} {
  func.func @kernel(%arg0: memref<16x8xf32, #tpu.memory_space<vmem>>, %arg1: memref<240x256xbf16, #tpu.memory_space<vmem>>, %arg2: memref<8x256xf32, #tpu.memory_space<vmem>>, %arg3: memref<2x128xf32, #tpu.memory_space<vmem>>) attributes {dimension_semantics = [], scalar_prefetch = 0 : i64, scratch_operands = 0 : i64, tpu.core_type = #tpu.core_type<tc>} {
    %c0 = arith.constant 0 : index
    %c0_0 = arith.constant 0 : index
    %0 = vector.load %arg1[%c0, %c0_0] : memref<240x256xbf16, #tpu.memory_space<vmem>>, vector<8x256xbf16>
    %1 = vector.extract_strided_slice %0 {offsets = [0, 0], sizes = [8, 128], strides = [1, 1]} : vector<8x256xbf16> to vector<8x128xbf16>
    %c8 = arith.constant 8 : index
    %c0_1 = arith.constant 0 : index
    %2 = vector.load %arg1[%c8, %c0_1] : memref<240x256xbf16, #tpu.memory_space<vmem>>, vector<32x256xbf16>
    %3 = vector.extract_strided_slice %2 {offsets = [0, 0], sizes = [32, 128], strides = [1, 1]} : vector<32x256xbf16> to vector<32x128xbf16>
    %c40 = arith.constant 40 : index
    %c0_2 = arith.constant 0 : index
    %4 = vector.load %arg1[%c40, %c0_2] : memref<240x256xbf16, #tpu.memory_space<vmem>>, vector<32x256xbf16>
    %5 = vector.extract_strided_slice %4 {offsets = [0, 0], sizes = [32, 128], strides = [1, 1]} : vector<32x256xbf16> to vector<32x128xbf16>
    %c72 = arith.constant 72 : index
    %c0_3 = arith.constant 0 : index
    %6 = vector.load %arg1[%c72, %c0_3] : memref<240x256xbf16, #tpu.memory_space<vmem>>, vector<32x256xbf16>
    %7 = vector.extract_strided_slice %6 {offsets = [0, 0], sizes = [32, 128], strides = [1, 1]} : vector<32x256xbf16> to vector<32x128xbf16>
    %c104 = arith.constant 104 : index
    %c0_4 = arith.constant 0 : index
    %8 = vector.load %arg1[%c104, %c0_4] : memref<240x256xbf16, #tpu.memory_space<vmem>>, vector<8x256xbf16>
    %9 = vector.extract_strided_slice %8 {offsets = [0, 0], sizes = [8, 128], strides = [1, 1]} : vector<8x256xbf16> to vector<8x128xbf16>
    %c112 = arith.constant 112 : index
    %c0_5 = arith.constant 0 : index
    %10 = vector.load %arg1[%c112, %c0_5] : memref<240x256xbf16, #tpu.memory_space<vmem>>, vector<32x256xbf16>
    %11 = vector.extract_strided_slice %10 {offsets = [0, 0], sizes = [32, 128], strides = [1, 1]} : vector<32x256xbf16> to vector<32x128xbf16>
    %c144 = arith.constant 144 : index
    %c0_6 = arith.constant 0 : index
    %12 = vector.load %arg1[%c144, %c0_6] : memref<240x256xbf16, #tpu.memory_space<vmem>>, vector<32x256xbf16>
    %13 = vector.extract_strided_slice %12 {offsets = [0, 0], sizes = [32, 128], strides = [1, 1]} : vector<32x256xbf16> to vector<32x128xbf16>
    %c176 = arith.constant 176 : index
    %c0_7 = arith.constant 0 : index
    %14 = vector.load %arg1[%c176, %c0_7] : memref<240x256xbf16, #tpu.memory_space<vmem>>, vector<32x256xbf16>
    %15 = vector.extract_strided_slice %14 {offsets = [0, 0], sizes = [32, 128], strides = [1, 1]} : vector<32x256xbf16> to vector<32x128xbf16>
    %c208 = arith.constant 208 : index
    %c0_8 = arith.constant 0 : index
    %16 = vector.load %arg1[%c208, %c0_8] : memref<240x256xbf16, #tpu.memory_space<vmem>>, vector<32x256xbf16>
    %c1 = arith.constant 1 : index
    %c0_9 = arith.constant 0 : index
    %17 = vector.load %arg2[%c1, %c0_9] : memref<8x256xf32, #tpu.memory_space<vmem>>, vector<1x128xf32>
    %18 = vector.shape_cast %17 : vector<1x128xf32> to vector<1x128xf32>
    %19 = vector.broadcast %18 : vector<1x128xf32> to vector<2x128xf32>
    %c2 = arith.constant 2 : index
    %c0_10 = arith.constant 0 : index
    %20 = vector.load %arg2[%c2, %c0_10] : memref<8x256xf32, #tpu.memory_space<vmem>>, vector<1x128xf32>
    %21 = vector.shape_cast %20 : vector<1x128xf32> to vector<1x128xf32>
    %22 = vector.broadcast %21 : vector<1x128xf32> to vector<2x128xf32>
    %c3 = arith.constant 3 : index
    %c0_11 = arith.constant 0 : index
    %23 = vector.load %arg2[%c3, %c0_11] : memref<8x256xf32, #tpu.memory_space<vmem>>, vector<1x128xf32>
    %24 = vector.shape_cast %23 : vector<1x128xf32> to vector<1x128xf32>
    %25 = vector.broadcast %24 : vector<1x128xf32> to vector<2x128xf32>
    %c4 = arith.constant 4 : index
    %c0_12 = arith.constant 0 : index
    %26 = vector.load %arg2[%c4, %c0_12] : memref<8x256xf32, #tpu.memory_space<vmem>>, vector<1x256xf32>
    %27 = vector.shape_cast %26 : vector<1x256xf32> to vector<1x256xf32>
    %28 = vector.broadcast %27 : vector<1x256xf32> to vector<2x256xf32>
    %29 = tpu.iota {dimensions = array<i32: 1>} : vector<2x128xi32>
    %c64_i32 = arith.constant 64 : i32
    %30 = vector.broadcast %c64_i32 : i32 to vector<2x128xi32>
    %31 = arith.cmpi sge, %29, %30 : vector<2x128xi32>
    %c96_i32 = arith.constant 96 : i32
    %32 = vector.broadcast %c96_i32 : i32 to vector<2x128xi32>
    %33 = arith.cmpi slt, %29, %32 : vector<2x128xi32>
    %34 = arith.andi %31, %33 : vector<2x128xi1>
    %c0_13 = arith.constant 0 : index
    %c0_14 = arith.constant 0 : index
    %35 = vector.load %arg0[%c0_13, %c0_14] : memref<16x8xf32, #tpu.memory_space<vmem>>, vector<16x8xf32>
    %36 = arith.truncf %35 : vector<16x8xf32> to vector<16x8xbf16>
    %cst = arith.constant dense<0.000000e+00> : vector<16x128xf32>
    %37 = tpu.matmul %36, %1, %cst {dimension_numbers = #tpu.dot_dimension_numbers<[1], [0], [0], [1], [0, 0, 1, 1], [], []>} : vector<16x8xbf16>, vector<8x128xbf16>, vector<16x128xf32> -> vector<16x128xf32>
    %c0_15 = arith.constant 0 : index
    %c0_16 = arith.constant 0 : index
    %38 = vector.load %arg2[%c0_15, %c0_16] : memref<8x256xf32, #tpu.memory_space<vmem>>, vector<1x128xf32>
    %39 = vector.shape_cast %38 : vector<1x128xf32> to vector<1x128xf32>
    %40 = vector.broadcast %39 : vector<1x128xf32> to vector<16x128xf32>
    %41 = arith.addf %37, %40 : vector<16x128xf32>
    %cst_17 = arith.constant 0.000000e+00 : f32
    %42 = vector.broadcast %cst_17 : f32 to vector<2x32xf32>
    %43 = vector.extract_strided_slice %41 {offsets = [0, 0], sizes = [2, 128], strides = [1, 1]} : vector<16x128xf32> to vector<2x128xf32>
    %44 = arith.truncf %42 : vector<2x32xf32> to vector<2x32xbf16>
    %cst_18 = arith.constant dense<0.000000e+00> : vector<2x128xf32>
    %45 = tpu.matmul %44, %3, %cst_18 {dimension_numbers = #tpu.dot_dimension_numbers<[1], [0], [0], [1], [0, 0, 1, 1], [], []>} : vector<2x32xbf16>, vector<32x128xbf16>, vector<2x128xf32> -> vector<2x128xf32>
    %46 = arith.addf %43, %45 : vector<2x128xf32>
    %47 = math.tanh %46 : vector<2x128xf32>
    %48 = arith.negf %46 : vector<2x128xf32>
    %49 = math.exp %48 : vector<2x128xf32>
    %cst_19 = arith.constant 1.000000e+00 : f32
    %50 = vector.broadcast %cst_19 : f32 to vector<2x128xf32>
    %51 = arith.addf %50, %49 : vector<2x128xf32>
    %52 = arith.divf %50, %51 : vector<2x128xf32>
    %53 = arith.select %34, %47, %52 : vector<2x128xi1>, vector<2x128xf32>
    %54 = vector.extract_strided_slice %53 {offsets = [0, 0], sizes = [2, 32], strides = [1, 1]} : vector<2x128xf32> to vector<2x32xf32>
    %55 = vector.extract_strided_slice %53 {offsets = [0, 32], sizes = [2, 32], strides = [1, 1]} : vector<2x128xf32> to vector<2x32xf32>
    %56 = vector.extract_strided_slice %53 {offsets = [0, 64], sizes = [2, 32], strides = [1, 1]} : vector<2x128xf32> to vector<2x32xf32>
    %57 = vector.extract_strided_slice %53 {offsets = [0, 96], sizes = [2, 32], strides = [1, 1]} : vector<2x128xf32> to vector<2x32xf32>
    %58 = arith.mulf %55, %42 : vector<2x32xf32>
    %59 = arith.mulf %54, %56 : vector<2x32xf32>
    %60 = arith.addf %58, %59 : vector<2x32xf32>
    %61 = math.tanh %60 : vector<2x32xf32>
    %62 = arith.mulf %57, %61 : vector<2x32xf32>
    %63 = arith.truncf %62 : vector<2x32xf32> to vector<2x32xbf16>
    %cst_20 = arith.constant dense<0.000000e+00> : vector<2x128xf32>
    %64 = tpu.matmul %63, %7, %cst_20 {dimension_numbers = #tpu.dot_dimension_numbers<[1], [0], [0], [1], [0, 0, 1, 1], [], []>} : vector<2x32xbf16>, vector<32x128xbf16>, vector<2x128xf32> -> vector<2x128xf32>
    %65 = arith.truncf %42 : vector<2x32xf32> to vector<2x32xbf16>
    %cst_21 = arith.constant dense<0.000000e+00> : vector<2x128xf32>
    %66 = tpu.matmul %65, %5, %cst_21 {dimension_numbers = #tpu.dot_dimension_numbers<[1], [0], [0], [1], [0, 0, 1, 1], [], []>} : vector<2x32xbf16>, vector<32x128xbf16>, vector<2x128xf32> -> vector<2x128xf32>
    %67 = arith.addf %64, %66 : vector<2x128xf32>
    %68 = arith.addf %67, %19 : vector<2x128xf32>
    %69 = math.tanh %68 : vector<2x128xf32>
    %70 = arith.negf %68 : vector<2x128xf32>
    %71 = math.exp %70 : vector<2x128xf32>
    %cst_22 = arith.constant 1.000000e+00 : f32
    %72 = vector.broadcast %cst_22 : f32 to vector<2x128xf32>
    %73 = arith.addf %72, %71 : vector<2x128xf32>
    %74 = arith.divf %72, %73 : vector<2x128xf32>
    %75 = arith.select %34, %69, %74 : vector<2x128xi1>, vector<2x128xf32>
    %76 = vector.extract_strided_slice %75 {offsets = [0, 0], sizes = [2, 32], strides = [1, 1]} : vector<2x128xf32> to vector<2x32xf32>
    %77 = vector.extract_strided_slice %75 {offsets = [0, 32], sizes = [2, 32], strides = [1, 1]} : vector<2x128xf32> to vector<2x32xf32>
    %78 = vector.extract_strided_slice %75 {offsets = [0, 64], sizes = [2, 32], strides = [1, 1]} : vector<2x128xf32> to vector<2x32xf32>
    %79 = vector.extract_strided_slice %75 {offsets = [0, 96], sizes = [2, 32], strides = [1, 1]} : vector<2x128xf32> to vector<2x32xf32>
    %80 = arith.mulf %77, %42 : vector<2x32xf32>
    %81 = arith.mulf %76, %78 : vector<2x32xf32>
    %82 = arith.addf %80, %81 : vector<2x32xf32>
    %83 = math.tanh %82 : vector<2x32xf32>
    %84 = arith.mulf %79, %83 : vector<2x32xf32>
    %85 = vector.extract_strided_slice %41 {offsets = [2, 0], sizes = [2, 128], strides = [1, 1]} : vector<16x128xf32> to vector<2x128xf32>
    %86 = arith.truncf %62 : vector<2x32xf32> to vector<2x32xbf16>
    %cst_23 = arith.constant dense<0.000000e+00> : vector<2x128xf32>
    %87 = tpu.matmul %86, %3, %cst_23 {dimension_numbers = #tpu.dot_dimension_numbers<[1], [0], [0], [1], [0, 0, 1, 1], [], []>} : vector<2x32xbf16>, vector<32x128xbf16>, vector<2x128xf32> -> vector<2x128xf32>
    %88 = arith.addf %85, %87 : vector<2x128xf32>
    %89 = math.tanh %88 : vector<2x128xf32>
    %90 = arith.negf %88 : vector<2x128xf32>
    %91 = math.exp %90 : vector<2x128xf32>
    %cst_24 = arith.constant 1.000000e+00 : f32
    %92 = vector.broadcast %cst_24 : f32 to vector<2x128xf32>
    %93 = arith.addf %92, %91 : vector<2x128xf32>
    %94 = arith.divf %92, %93 : vector<2x128xf32>
    %95 = arith.select %34, %89, %94 : vector<2x128xi1>, vector<2x128xf32>
    %96 = vector.extract_strided_slice %95 {offsets = [0, 0], sizes = [2, 32], strides = [1, 1]} : vector<2x128xf32> to vector<2x32xf32>
    %97 = vector.extract_strided_slice %95 {offsets = [0, 32], sizes = [2, 32], strides = [1, 1]} : vector<2x128xf32> to vector<2x32xf32>
    %98 = vector.extract_strided_slice %95 {offsets = [0, 64], sizes = [2, 32], strides = [1, 1]} : vector<2x128xf32> to vector<2x32xf32>
    %99 = vector.extract_strided_slice %95 {offsets = [0, 96], sizes = [2, 32], strides = [1, 1]} : vector<2x128xf32> to vector<2x32xf32>
    %100 = arith.mulf %97, %60 : vector<2x32xf32>
    %101 = arith.mulf %96, %98 : vector<2x32xf32>
    %102 = arith.addf %100, %101 : vector<2x32xf32>
    %103 = math.tanh %102 : vector<2x32xf32>
    %104 = arith.mulf %99, %103 : vector<2x32xf32>
    %105 = arith.truncf %104 : vector<2x32xf32> to vector<2x32xbf16>
    %cst_25 = arith.constant dense<0.000000e+00> : vector<2x128xf32>
    %106 = tpu.matmul %105, %7, %cst_25 {dimension_numbers = #tpu.dot_dimension_numbers<[1], [0], [0], [1], [0, 0, 1, 1], [], []>} : vector<2x32xbf16>, vector<32x128xbf16>, vector<2x128xf32> -> vector<2x128xf32>
    %107 = arith.truncf %84 : vector<2x32xf32> to vector<2x32xbf16>
    %cst_26 = arith.constant dense<0.000000e+00> : vector<2x128xf32>
    %108 = tpu.matmul %107, %5, %cst_26 {dimension_numbers = #tpu.dot_dimension_numbers<[1], [0], [0], [1], [0, 0, 1, 1], [], []>} : vector<2x32xbf16>, vector<32x128xbf16>, vector<2x128xf32> -> vector<2x128xf32>
    %109 = arith.addf %106, %108 : vector<2x128xf32>
    %110 = arith.addf %109, %19 : vector<2x128xf32>
    %111 = math.tanh %110 : vector<2x128xf32>
    %112 = arith.negf %110 : vector<2x128xf32>
    %113 = math.exp %112 : vector<2x128xf32>
    %cst_27 = arith.constant 1.000000e+00 : f32
    %114 = vector.broadcast %cst_27 : f32 to vector<2x128xf32>
    %115 = arith.addf %114, %113 : vector<2x128xf32>
    %116 = arith.divf %114, %115 : vector<2x128xf32>
    %117 = arith.select %34, %111, %116 : vector<2x128xi1>, vector<2x128xf32>
    %118 = vector.extract_strided_slice %117 {offsets = [0, 0], sizes = [2, 32], strides = [1, 1]} : vector<2x128xf32> to vector<2x32xf32>
    %119 = vector.extract_strided_slice %117 {offsets = [0, 32], sizes = [2, 32], strides = [1, 1]} : vector<2x128xf32> to vector<2x32xf32>
    %120 = vector.extract_strided_slice %117 {offsets = [0, 64], sizes = [2, 32], strides = [1, 1]} : vector<2x128xf32> to vector<2x32xf32>
    %121 = vector.extract_strided_slice %117 {offsets = [0, 96], sizes = [2, 32], strides = [1, 1]} : vector<2x128xf32> to vector<2x32xf32>
    %122 = arith.mulf %119, %82 : vector<2x32xf32>
    %123 = arith.mulf %118, %120 : vector<2x32xf32>
    %124 = arith.addf %122, %123 : vector<2x32xf32>
    %125 = math.tanh %124 : vector<2x32xf32>
    %126 = arith.mulf %121, %125 : vector<2x32xf32>
    %127 = vector.extract_strided_slice %41 {offsets = [4, 0], sizes = [2, 128], strides = [1, 1]} : vector<16x128xf32> to vector<2x128xf32>
    %128 = arith.truncf %104 : vector<2x32xf32> to vector<2x32xbf16>
    %cst_28 = arith.constant dense<0.000000e+00> : vector<2x128xf32>
    %129 = tpu.matmul %128, %3, %cst_28 {dimension_numbers = #tpu.dot_dimension_numbers<[1], [0], [0], [1], [0, 0, 1, 1], [], []>} : vector<2x32xbf16>, vector<32x128xbf16>, vector<2x128xf32> -> vector<2x128xf32>
    %130 = arith.addf %127, %129 : vector<2x128xf32>
    %131 = math.tanh %130 : vector<2x128xf32>
    %132 = arith.negf %130 : vector<2x128xf32>
    %133 = math.exp %132 : vector<2x128xf32>
    %cst_29 = arith.constant 1.000000e+00 : f32
    %134 = vector.broadcast %cst_29 : f32 to vector<2x128xf32>
    %135 = arith.addf %134, %133 : vector<2x128xf32>
    %136 = arith.divf %134, %135 : vector<2x128xf32>
    %137 = arith.select %34, %131, %136 : vector<2x128xi1>, vector<2x128xf32>
    %138 = vector.extract_strided_slice %137 {offsets = [0, 0], sizes = [2, 32], strides = [1, 1]} : vector<2x128xf32> to vector<2x32xf32>
    %139 = vector.extract_strided_slice %137 {offsets = [0, 32], sizes = [2, 32], strides = [1, 1]} : vector<2x128xf32> to vector<2x32xf32>
    %140 = vector.extract_strided_slice %137 {offsets = [0, 64], sizes = [2, 32], strides = [1, 1]} : vector<2x128xf32> to vector<2x32xf32>
    %141 = vector.extract_strided_slice %137 {offsets = [0, 96], sizes = [2, 32], strides = [1, 1]} : vector<2x128xf32> to vector<2x32xf32>
    %142 = arith.mulf %139, %102 : vector<2x32xf32>
    %143 = arith.mulf %138, %140 : vector<2x32xf32>
    %144 = arith.addf %142, %143 : vector<2x32xf32>
    %145 = math.tanh %144 : vector<2x32xf32>
    %146 = arith.mulf %141, %145 : vector<2x32xf32>
    %147 = arith.truncf %146 : vector<2x32xf32> to vector<2x32xbf16>
    %cst_30 = arith.constant dense<0.000000e+00> : vector<2x128xf32>
    %148 = tpu.matmul %147, %7, %cst_30 {dimension_numbers = #tpu.dot_dimension_numbers<[1], [0], [0], [1], [0, 0, 1, 1], [], []>} : vector<2x32xbf16>, vector<32x128xbf16>, vector<2x128xf32> -> vector<2x128xf32>
    %149 = arith.truncf %126 : vector<2x32xf32> to vector<2x32xbf16>
    %cst_31 = arith.constant dense<0.000000e+00> : vector<2x128xf32>
    %150 = tpu.matmul %149, %5, %cst_31 {dimension_numbers = #tpu.dot_dimension_numbers<[1], [0], [0], [1], [0, 0, 1, 1], [], []>} : vector<2x32xbf16>, vector<32x128xbf16>, vector<2x128xf32> -> vector<2x128xf32>
    %151 = arith.addf %148, %150 : vector<2x128xf32>
    %152 = arith.addf %151, %19 : vector<2x128xf32>
    %153 = math.tanh %152 : vector<2x128xf32>
    %154 = arith.negf %152 : vector<2x128xf32>
    %155 = math.exp %154 : vector<2x128xf32>
    %cst_32 = arith.constant 1.000000e+00 : f32
    %156 = vector.broadcast %cst_32 : f32 to vector<2x128xf32>
    %157 = arith.addf %156, %155 : vector<2x128xf32>
    %158 = arith.divf %156, %157 : vector<2x128xf32>
    %159 = arith.select %34, %153, %158 : vector<2x128xi1>, vector<2x128xf32>
    %160 = vector.extract_strided_slice %159 {offsets = [0, 0], sizes = [2, 32], strides = [1, 1]} : vector<2x128xf32> to vector<2x32xf32>
    %161 = vector.extract_strided_slice %159 {offsets = [0, 32], sizes = [2, 32], strides = [1, 1]} : vector<2x128xf32> to vector<2x32xf32>
    %162 = vector.extract_strided_slice %159 {offsets = [0, 64], sizes = [2, 32], strides = [1, 1]} : vector<2x128xf32> to vector<2x32xf32>
    %163 = vector.extract_strided_slice %159 {offsets = [0, 96], sizes = [2, 32], strides = [1, 1]} : vector<2x128xf32> to vector<2x32xf32>
    %164 = arith.mulf %161, %124 : vector<2x32xf32>
    %165 = arith.mulf %160, %162 : vector<2x32xf32>
    %166 = arith.addf %164, %165 : vector<2x32xf32>
    %167 = math.tanh %166 : vector<2x32xf32>
    %168 = arith.mulf %163, %167 : vector<2x32xf32>
    %169 = vector.extract_strided_slice %41 {offsets = [6, 0], sizes = [2, 128], strides = [1, 1]} : vector<16x128xf32> to vector<2x128xf32>
    %170 = arith.truncf %146 : vector<2x32xf32> to vector<2x32xbf16>
    %cst_33 = arith.constant dense<0.000000e+00> : vector<2x128xf32>
    %171 = tpu.matmul %170, %3, %cst_33 {dimension_numbers = #tpu.dot_dimension_numbers<[1], [0], [0], [1], [0, 0, 1, 1], [], []>} : vector<2x32xbf16>, vector<32x128xbf16>, vector<2x128xf32> -> vector<2x128xf32>
    %172 = arith.addf %169, %171 : vector<2x128xf32>
    %173 = math.tanh %172 : vector<2x128xf32>
    %174 = arith.negf %172 : vector<2x128xf32>
    %175 = math.exp %174 : vector<2x128xf32>
    %cst_34 = arith.constant 1.000000e+00 : f32
    %176 = vector.broadcast %cst_34 : f32 to vector<2x128xf32>
    %177 = arith.addf %176, %175 : vector<2x128xf32>
    %178 = arith.divf %176, %177 : vector<2x128xf32>
    %179 = arith.select %34, %173, %178 : vector<2x128xi1>, vector<2x128xf32>
    %180 = vector.extract_strided_slice %179 {offsets = [0, 0], sizes = [2, 32], strides = [1, 1]} : vector<2x128xf32> to vector<2x32xf32>
    %181 = vector.extract_strided_slice %179 {offsets = [0, 32], sizes = [2, 32], strides = [1, 1]} : vector<2x128xf32> to vector<2x32xf32>
    %182 = vector.extract_strided_slice %179 {offsets = [0, 64], sizes = [2, 32], strides = [1, 1]} : vector<2x128xf32> to vector<2x32xf32>
    %183 = vector.extract_strided_slice %179 {offsets = [0, 96], sizes = [2, 32], strides = [1, 1]} : vector<2x128xf32> to vector<2x32xf32>
    %184 = arith.mulf %181, %144 : vector<2x32xf32>
    %185 = arith.mulf %180, %182 : vector<2x32xf32>
    %186 = arith.addf %184, %185 : vector<2x32xf32>
    %187 = math.tanh %186 : vector<2x32xf32>
    %188 = arith.mulf %183, %187 : vector<2x32xf32>
    %189 = arith.truncf %188 : vector<2x32xf32> to vector<2x32xbf16>
    %cst_35 = arith.constant dense<0.000000e+00> : vector<2x128xf32>
    %190 = tpu.matmul %189, %7, %cst_35 {dimension_numbers = #tpu.dot_dimension_numbers<[1], [0], [0], [1], [0, 0, 1, 1], [], []>} : vector<2x32xbf16>, vector<32x128xbf16>, vector<2x128xf32> -> vector<2x128xf32>
    %191 = arith.truncf %168 : vector<2x32xf32> to vector<2x32xbf16>
    %cst_36 = arith.constant dense<0.000000e+00> : vector<2x128xf32>
    %192 = tpu.matmul %191, %5, %cst_36 {dimension_numbers = #tpu.dot_dimension_numbers<[1], [0], [0], [1], [0, 0, 1, 1], [], []>} : vector<2x32xbf16>, vector<32x128xbf16>, vector<2x128xf32> -> vector<2x128xf32>
    %193 = arith.addf %190, %192 : vector<2x128xf32>
    %194 = arith.addf %193, %19 : vector<2x128xf32>
    %195 = math.tanh %194 : vector<2x128xf32>
    %196 = arith.negf %194 : vector<2x128xf32>
    %197 = math.exp %196 : vector<2x128xf32>
    %cst_37 = arith.constant 1.000000e+00 : f32
    %198 = vector.broadcast %cst_37 : f32 to vector<2x128xf32>
    %199 = arith.addf %198, %197 : vector<2x128xf32>
    %200 = arith.divf %198, %199 : vector<2x128xf32>
    %201 = arith.select %34, %195, %200 : vector<2x128xi1>, vector<2x128xf32>
    %202 = vector.extract_strided_slice %201 {offsets = [0, 0], sizes = [2, 32], strides = [1, 1]} : vector<2x128xf32> to vector<2x32xf32>
    %203 = vector.extract_strided_slice %201 {offsets = [0, 32], sizes = [2, 32], strides = [1, 1]} : vector<2x128xf32> to vector<2x32xf32>
    %204 = vector.extract_strided_slice %201 {offsets = [0, 64], sizes = [2, 32], strides = [1, 1]} : vector<2x128xf32> to vector<2x32xf32>
    %205 = vector.extract_strided_slice %201 {offsets = [0, 96], sizes = [2, 32], strides = [1, 1]} : vector<2x128xf32> to vector<2x32xf32>
    %206 = arith.mulf %203, %166 : vector<2x32xf32>
    %207 = arith.mulf %202, %204 : vector<2x32xf32>
    %208 = arith.addf %206, %207 : vector<2x32xf32>
    %209 = math.tanh %208 : vector<2x32xf32>
    %210 = arith.mulf %205, %209 : vector<2x32xf32>
    %211 = vector.extract_strided_slice %41 {offsets = [8, 0], sizes = [2, 128], strides = [1, 1]} : vector<16x128xf32> to vector<2x128xf32>
    %212 = arith.truncf %188 : vector<2x32xf32> to vector<2x32xbf16>
    %cst_38 = arith.constant dense<0.000000e+00> : vector<2x128xf32>
    %213 = tpu.matmul %212, %3, %cst_38 {dimension_numbers = #tpu.dot_dimension_numbers<[1], [0], [0], [1], [0, 0, 1, 1], [], []>} : vector<2x32xbf16>, vector<32x128xbf16>, vector<2x128xf32> -> vector<2x128xf32>
    %214 = arith.addf %211, %213 : vector<2x128xf32>
    %215 = math.tanh %214 : vector<2x128xf32>
    %216 = arith.negf %214 : vector<2x128xf32>
    %217 = math.exp %216 : vector<2x128xf32>
    %cst_39 = arith.constant 1.000000e+00 : f32
    %218 = vector.broadcast %cst_39 : f32 to vector<2x128xf32>
    %219 = arith.addf %218, %217 : vector<2x128xf32>
    %220 = arith.divf %218, %219 : vector<2x128xf32>
    %221 = arith.select %34, %215, %220 : vector<2x128xi1>, vector<2x128xf32>
    %222 = vector.extract_strided_slice %221 {offsets = [0, 0], sizes = [2, 32], strides = [1, 1]} : vector<2x128xf32> to vector<2x32xf32>
    %223 = vector.extract_strided_slice %221 {offsets = [0, 32], sizes = [2, 32], strides = [1, 1]} : vector<2x128xf32> to vector<2x32xf32>
    %224 = vector.extract_strided_slice %221 {offsets = [0, 64], sizes = [2, 32], strides = [1, 1]} : vector<2x128xf32> to vector<2x32xf32>
    %225 = vector.extract_strided_slice %221 {offsets = [0, 96], sizes = [2, 32], strides = [1, 1]} : vector<2x128xf32> to vector<2x32xf32>
    %226 = arith.mulf %223, %186 : vector<2x32xf32>
    %227 = arith.mulf %222, %224 : vector<2x32xf32>
    %228 = arith.addf %226, %227 : vector<2x32xf32>
    %229 = math.tanh %228 : vector<2x32xf32>
    %230 = arith.mulf %225, %229 : vector<2x32xf32>
    %231 = arith.truncf %230 : vector<2x32xf32> to vector<2x32xbf16>
    %cst_40 = arith.constant dense<0.000000e+00> : vector<2x128xf32>
    %232 = tpu.matmul %231, %7, %cst_40 {dimension_numbers = #tpu.dot_dimension_numbers<[1], [0], [0], [1], [0, 0, 1, 1], [], []>} : vector<2x32xbf16>, vector<32x128xbf16>, vector<2x128xf32> -> vector<2x128xf32>
    %233 = arith.truncf %210 : vector<2x32xf32> to vector<2x32xbf16>
    %cst_41 = arith.constant dense<0.000000e+00> : vector<2x128xf32>
    %234 = tpu.matmul %233, %5, %cst_41 {dimension_numbers = #tpu.dot_dimension_numbers<[1], [0], [0], [1], [0, 0, 1, 1], [], []>} : vector<2x32xbf16>, vector<32x128xbf16>, vector<2x128xf32> -> vector<2x128xf32>
    %235 = arith.addf %232, %234 : vector<2x128xf32>
    %236 = arith.addf %235, %19 : vector<2x128xf32>
    %237 = math.tanh %236 : vector<2x128xf32>
    %238 = arith.negf %236 : vector<2x128xf32>
    %239 = math.exp %238 : vector<2x128xf32>
    %cst_42 = arith.constant 1.000000e+00 : f32
    %240 = vector.broadcast %cst_42 : f32 to vector<2x128xf32>
    %241 = arith.addf %240, %239 : vector<2x128xf32>
    %242 = arith.divf %240, %241 : vector<2x128xf32>
    %243 = arith.select %34, %237, %242 : vector<2x128xi1>, vector<2x128xf32>
    %244 = vector.extract_strided_slice %243 {offsets = [0, 0], sizes = [2, 32], strides = [1, 1]} : vector<2x128xf32> to vector<2x32xf32>
    %245 = vector.extract_strided_slice %243 {offsets = [0, 32], sizes = [2, 32], strides = [1, 1]} : vector<2x128xf32> to vector<2x32xf32>
    %246 = vector.extract_strided_slice %243 {offsets = [0, 64], sizes = [2, 32], strides = [1, 1]} : vector<2x128xf32> to vector<2x32xf32>
    %247 = vector.extract_strided_slice %243 {offsets = [0, 96], sizes = [2, 32], strides = [1, 1]} : vector<2x128xf32> to vector<2x32xf32>
    %248 = arith.mulf %245, %208 : vector<2x32xf32>
    %249 = arith.mulf %244, %246 : vector<2x32xf32>
    %250 = arith.addf %248, %249 : vector<2x32xf32>
    %251 = math.tanh %250 : vector<2x32xf32>
    %252 = arith.mulf %247, %251 : vector<2x32xf32>
    %253 = vector.extract_strided_slice %41 {offsets = [10, 0], sizes = [2, 128], strides = [1, 1]} : vector<16x128xf32> to vector<2x128xf32>
    %254 = arith.truncf %230 : vector<2x32xf32> to vector<2x32xbf16>
    %cst_43 = arith.constant dense<0.000000e+00> : vector<2x128xf32>
    %255 = tpu.matmul %254, %3, %cst_43 {dimension_numbers = #tpu.dot_dimension_numbers<[1], [0], [0], [1], [0, 0, 1, 1], [], []>} : vector<2x32xbf16>, vector<32x128xbf16>, vector<2x128xf32> -> vector<2x128xf32>
    %256 = arith.addf %253, %255 : vector<2x128xf32>
    %257 = math.tanh %256 : vector<2x128xf32>
    %258 = arith.negf %256 : vector<2x128xf32>
    %259 = math.exp %258 : vector<2x128xf32>
    %cst_44 = arith.constant 1.000000e+00 : f32
    %260 = vector.broadcast %cst_44 : f32 to vector<2x128xf32>
    %261 = arith.addf %260, %259 : vector<2x128xf32>
    %262 = arith.divf %260, %261 : vector<2x128xf32>
    %263 = arith.select %34, %257, %262 : vector<2x128xi1>, vector<2x128xf32>
    %264 = vector.extract_strided_slice %263 {offsets = [0, 0], sizes = [2, 32], strides = [1, 1]} : vector<2x128xf32> to vector<2x32xf32>
    %265 = vector.extract_strided_slice %263 {offsets = [0, 32], sizes = [2, 32], strides = [1, 1]} : vector<2x128xf32> to vector<2x32xf32>
    %266 = vector.extract_strided_slice %263 {offsets = [0, 64], sizes = [2, 32], strides = [1, 1]} : vector<2x128xf32> to vector<2x32xf32>
    %267 = vector.extract_strided_slice %263 {offsets = [0, 96], sizes = [2, 32], strides = [1, 1]} : vector<2x128xf32> to vector<2x32xf32>
    %268 = arith.mulf %265, %228 : vector<2x32xf32>
    %269 = arith.mulf %264, %266 : vector<2x32xf32>
    %270 = arith.addf %268, %269 : vector<2x32xf32>
    %271 = math.tanh %270 : vector<2x32xf32>
    %272 = arith.mulf %267, %271 : vector<2x32xf32>
    %273 = arith.truncf %272 : vector<2x32xf32> to vector<2x32xbf16>
    %cst_45 = arith.constant dense<0.000000e+00> : vector<2x128xf32>
    %274 = tpu.matmul %273, %7, %cst_45 {dimension_numbers = #tpu.dot_dimension_numbers<[1], [0], [0], [1], [0, 0, 1, 1], [], []>} : vector<2x32xbf16>, vector<32x128xbf16>, vector<2x128xf32> -> vector<2x128xf32>
    %275 = arith.truncf %252 : vector<2x32xf32> to vector<2x32xbf16>
    %cst_46 = arith.constant dense<0.000000e+00> : vector<2x128xf32>
    %276 = tpu.matmul %275, %5, %cst_46 {dimension_numbers = #tpu.dot_dimension_numbers<[1], [0], [0], [1], [0, 0, 1, 1], [], []>} : vector<2x32xbf16>, vector<32x128xbf16>, vector<2x128xf32> -> vector<2x128xf32>
    %277 = arith.addf %274, %276 : vector<2x128xf32>
    %278 = arith.addf %277, %19 : vector<2x128xf32>
    %279 = math.tanh %278 : vector<2x128xf32>
    %280 = arith.negf %278 : vector<2x128xf32>
    %281 = math.exp %280 : vector<2x128xf32>
    %cst_47 = arith.constant 1.000000e+00 : f32
    %282 = vector.broadcast %cst_47 : f32 to vector<2x128xf32>
    %283 = arith.addf %282, %281 : vector<2x128xf32>
    %284 = arith.divf %282, %283 : vector<2x128xf32>
    %285 = arith.select %34, %279, %284 : vector<2x128xi1>, vector<2x128xf32>
    %286 = vector.extract_strided_slice %285 {offsets = [0, 0], sizes = [2, 32], strides = [1, 1]} : vector<2x128xf32> to vector<2x32xf32>
    %287 = vector.extract_strided_slice %285 {offsets = [0, 32], sizes = [2, 32], strides = [1, 1]} : vector<2x128xf32> to vector<2x32xf32>
    %288 = vector.extract_strided_slice %285 {offsets = [0, 64], sizes = [2, 32], strides = [1, 1]} : vector<2x128xf32> to vector<2x32xf32>
    %289 = vector.extract_strided_slice %285 {offsets = [0, 96], sizes = [2, 32], strides = [1, 1]} : vector<2x128xf32> to vector<2x32xf32>
    %290 = arith.mulf %287, %250 : vector<2x32xf32>
    %291 = arith.mulf %286, %288 : vector<2x32xf32>
    %292 = arith.addf %290, %291 : vector<2x32xf32>
    %293 = math.tanh %292 : vector<2x32xf32>
    %294 = arith.mulf %289, %293 : vector<2x32xf32>
    %295 = vector.extract_strided_slice %41 {offsets = [12, 0], sizes = [2, 128], strides = [1, 1]} : vector<16x128xf32> to vector<2x128xf32>
    %296 = arith.truncf %272 : vector<2x32xf32> to vector<2x32xbf16>
    %cst_48 = arith.constant dense<0.000000e+00> : vector<2x128xf32>
    %297 = tpu.matmul %296, %3, %cst_48 {dimension_numbers = #tpu.dot_dimension_numbers<[1], [0], [0], [1], [0, 0, 1, 1], [], []>} : vector<2x32xbf16>, vector<32x128xbf16>, vector<2x128xf32> -> vector<2x128xf32>
    %298 = arith.addf %295, %297 : vector<2x128xf32>
    %299 = math.tanh %298 : vector<2x128xf32>
    %300 = arith.negf %298 : vector<2x128xf32>
    %301 = math.exp %300 : vector<2x128xf32>
    %cst_49 = arith.constant 1.000000e+00 : f32
    %302 = vector.broadcast %cst_49 : f32 to vector<2x128xf32>
    %303 = arith.addf %302, %301 : vector<2x128xf32>
    %304 = arith.divf %302, %303 : vector<2x128xf32>
    %305 = arith.select %34, %299, %304 : vector<2x128xi1>, vector<2x128xf32>
    %306 = vector.extract_strided_slice %305 {offsets = [0, 0], sizes = [2, 32], strides = [1, 1]} : vector<2x128xf32> to vector<2x32xf32>
    %307 = vector.extract_strided_slice %305 {offsets = [0, 32], sizes = [2, 32], strides = [1, 1]} : vector<2x128xf32> to vector<2x32xf32>
    %308 = vector.extract_strided_slice %305 {offsets = [0, 64], sizes = [2, 32], strides = [1, 1]} : vector<2x128xf32> to vector<2x32xf32>
    %309 = vector.extract_strided_slice %305 {offsets = [0, 96], sizes = [2, 32], strides = [1, 1]} : vector<2x128xf32> to vector<2x32xf32>
    %310 = arith.mulf %307, %270 : vector<2x32xf32>
    %311 = arith.mulf %306, %308 : vector<2x32xf32>
    %312 = arith.addf %310, %311 : vector<2x32xf32>
    %313 = math.tanh %312 : vector<2x32xf32>
    %314 = arith.mulf %309, %313 : vector<2x32xf32>
    %315 = arith.truncf %314 : vector<2x32xf32> to vector<2x32xbf16>
    %cst_50 = arith.constant dense<0.000000e+00> : vector<2x128xf32>
    %316 = tpu.matmul %315, %7, %cst_50 {dimension_numbers = #tpu.dot_dimension_numbers<[1], [0], [0], [1], [0, 0, 1, 1], [], []>} : vector<2x32xbf16>, vector<32x128xbf16>, vector<2x128xf32> -> vector<2x128xf32>
    %317 = arith.truncf %294 : vector<2x32xf32> to vector<2x32xbf16>
    %cst_51 = arith.constant dense<0.000000e+00> : vector<2x128xf32>
    %318 = tpu.matmul %317, %5, %cst_51 {dimension_numbers = #tpu.dot_dimension_numbers<[1], [0], [0], [1], [0, 0, 1, 1], [], []>} : vector<2x32xbf16>, vector<32x128xbf16>, vector<2x128xf32> -> vector<2x128xf32>
    %319 = arith.addf %316, %318 : vector<2x128xf32>
    %320 = arith.addf %319, %19 : vector<2x128xf32>
    %321 = math.tanh %320 : vector<2x128xf32>
    %322 = arith.negf %320 : vector<2x128xf32>
    %323 = math.exp %322 : vector<2x128xf32>
    %cst_52 = arith.constant 1.000000e+00 : f32
    %324 = vector.broadcast %cst_52 : f32 to vector<2x128xf32>
    %325 = arith.addf %324, %323 : vector<2x128xf32>
    %326 = arith.divf %324, %325 : vector<2x128xf32>
    %327 = arith.select %34, %321, %326 : vector<2x128xi1>, vector<2x128xf32>
    %328 = vector.extract_strided_slice %327 {offsets = [0, 0], sizes = [2, 32], strides = [1, 1]} : vector<2x128xf32> to vector<2x32xf32>
    %329 = vector.extract_strided_slice %327 {offsets = [0, 32], sizes = [2, 32], strides = [1, 1]} : vector<2x128xf32> to vector<2x32xf32>
    %330 = vector.extract_strided_slice %327 {offsets = [0, 64], sizes = [2, 32], strides = [1, 1]} : vector<2x128xf32> to vector<2x32xf32>
    %331 = vector.extract_strided_slice %327 {offsets = [0, 96], sizes = [2, 32], strides = [1, 1]} : vector<2x128xf32> to vector<2x32xf32>
    %332 = arith.mulf %329, %292 : vector<2x32xf32>
    %333 = arith.mulf %328, %330 : vector<2x32xf32>
    %334 = arith.addf %332, %333 : vector<2x32xf32>
    %335 = math.tanh %334 : vector<2x32xf32>
    %336 = arith.mulf %331, %335 : vector<2x32xf32>
    %337 = vector.extract_strided_slice %41 {offsets = [14, 0], sizes = [2, 128], strides = [1, 1]} : vector<16x128xf32> to vector<2x128xf32>
    %338 = arith.truncf %314 : vector<2x32xf32> to vector<2x32xbf16>
    %cst_53 = arith.constant dense<0.000000e+00> : vector<2x128xf32>
    %339 = tpu.matmul %338, %3, %cst_53 {dimension_numbers = #tpu.dot_dimension_numbers<[1], [0], [0], [1], [0, 0, 1, 1], [], []>} : vector<2x32xbf16>, vector<32x128xbf16>, vector<2x128xf32> -> vector<2x128xf32>
    %340 = arith.addf %337, %339 : vector<2x128xf32>
    %341 = math.tanh %340 : vector<2x128xf32>
    %342 = arith.negf %340 : vector<2x128xf32>
    %343 = math.exp %342 : vector<2x128xf32>
    %cst_54 = arith.constant 1.000000e+00 : f32
    %344 = vector.broadcast %cst_54 : f32 to vector<2x128xf32>
    %345 = arith.addf %344, %343 : vector<2x128xf32>
    %346 = arith.divf %344, %345 : vector<2x128xf32>
    %347 = arith.select %34, %341, %346 : vector<2x128xi1>, vector<2x128xf32>
    %348 = vector.extract_strided_slice %347 {offsets = [0, 0], sizes = [2, 32], strides = [1, 1]} : vector<2x128xf32> to vector<2x32xf32>
    %349 = vector.extract_strided_slice %347 {offsets = [0, 32], sizes = [2, 32], strides = [1, 1]} : vector<2x128xf32> to vector<2x32xf32>
    %350 = vector.extract_strided_slice %347 {offsets = [0, 64], sizes = [2, 32], strides = [1, 1]} : vector<2x128xf32> to vector<2x32xf32>
    %351 = vector.extract_strided_slice %347 {offsets = [0, 96], sizes = [2, 32], strides = [1, 1]} : vector<2x128xf32> to vector<2x32xf32>
    %352 = arith.mulf %349, %312 : vector<2x32xf32>
    %353 = arith.mulf %348, %350 : vector<2x32xf32>
    %354 = arith.addf %352, %353 : vector<2x32xf32>
    %355 = math.tanh %354 : vector<2x32xf32>
    %356 = arith.mulf %351, %355 : vector<2x32xf32>
    %357 = arith.truncf %356 : vector<2x32xf32> to vector<2x32xbf16>
    %cst_55 = arith.constant dense<0.000000e+00> : vector<2x128xf32>
    %358 = tpu.matmul %357, %7, %cst_55 {dimension_numbers = #tpu.dot_dimension_numbers<[1], [0], [0], [1], [0, 0, 1, 1], [], []>} : vector<2x32xbf16>, vector<32x128xbf16>, vector<2x128xf32> -> vector<2x128xf32>
    %359 = arith.truncf %336 : vector<2x32xf32> to vector<2x32xbf16>
    %cst_56 = arith.constant dense<0.000000e+00> : vector<2x128xf32>
    %360 = tpu.matmul %359, %5, %cst_56 {dimension_numbers = #tpu.dot_dimension_numbers<[1], [0], [0], [1], [0, 0, 1, 1], [], []>} : vector<2x32xbf16>, vector<32x128xbf16>, vector<2x128xf32> -> vector<2x128xf32>
    %361 = arith.addf %358, %360 : vector<2x128xf32>
    %362 = arith.addf %361, %19 : vector<2x128xf32>
    %363 = math.tanh %362 : vector<2x128xf32>
    %364 = arith.negf %362 : vector<2x128xf32>
    %365 = math.exp %364 : vector<2x128xf32>
    %cst_57 = arith.constant 1.000000e+00 : f32
    %366 = vector.broadcast %cst_57 : f32 to vector<2x128xf32>
    %367 = arith.addf %366, %365 : vector<2x128xf32>
    %368 = arith.divf %366, %367 : vector<2x128xf32>
    %369 = arith.select %34, %363, %368 : vector<2x128xi1>, vector<2x128xf32>
    %370 = vector.extract_strided_slice %369 {offsets = [0, 0], sizes = [2, 32], strides = [1, 1]} : vector<2x128xf32> to vector<2x32xf32>
    %371 = vector.extract_strided_slice %369 {offsets = [0, 32], sizes = [2, 32], strides = [1, 1]} : vector<2x128xf32> to vector<2x32xf32>
    %372 = vector.extract_strided_slice %369 {offsets = [0, 64], sizes = [2, 32], strides = [1, 1]} : vector<2x128xf32> to vector<2x32xf32>
    %373 = vector.extract_strided_slice %369 {offsets = [0, 96], sizes = [2, 32], strides = [1, 1]} : vector<2x128xf32> to vector<2x32xf32>
    %374 = arith.mulf %371, %334 : vector<2x32xf32>
    %375 = arith.mulf %370, %372 : vector<2x32xf32>
    %376 = arith.addf %374, %375 : vector<2x32xf32>
    %377 = math.tanh %376 : vector<2x32xf32>
    %378 = arith.mulf %373, %377 : vector<2x32xf32>
    %379 = vector.extract_strided_slice %35 {offsets = [14, 0], sizes = [2, 8], strides = [1, 1]} : vector<16x8xf32> to vector<2x8xf32>
    %380 = arith.truncf %379 : vector<2x8xf32> to vector<2x8xbf16>
    %cst_58 = arith.constant dense<0.000000e+00> : vector<2x128xf32>
    %381 = tpu.matmul %380, %9, %cst_58 {dimension_numbers = #tpu.dot_dimension_numbers<[1], [0], [0], [1], [0, 0, 1, 1], [], []>} : vector<2x8xbf16>, vector<8x128xbf16>, vector<2x128xf32> -> vector<2x128xf32>
    %382 = arith.addf %381, %22 : vector<2x128xf32>
    %383 = arith.truncf %356 : vector<2x32xf32> to vector<2x32xbf16>
    %cst_59 = arith.constant dense<0.000000e+00> : vector<2x128xf32>
    %384 = tpu.matmul %383, %11, %cst_59 {dimension_numbers = #tpu.dot_dimension_numbers<[1], [0], [0], [1], [0, 0, 1, 1], [], []>} : vector<2x32xbf16>, vector<32x128xbf16>, vector<2x128xf32> -> vector<2x128xf32>
    %385 = arith.addf %382, %384 : vector<2x128xf32>
    %386 = math.tanh %385 : vector<2x128xf32>
    %387 = arith.negf %385 : vector<2x128xf32>
    %388 = math.exp %387 : vector<2x128xf32>
    %cst_60 = arith.constant 1.000000e+00 : f32
    %389 = vector.broadcast %cst_60 : f32 to vector<2x128xf32>
    %390 = arith.addf %389, %388 : vector<2x128xf32>
    %391 = arith.divf %389, %390 : vector<2x128xf32>
    %392 = arith.select %34, %386, %391 : vector<2x128xi1>, vector<2x128xf32>
    %393 = vector.extract_strided_slice %392 {offsets = [0, 0], sizes = [2, 32], strides = [1, 1]} : vector<2x128xf32> to vector<2x32xf32>
    %394 = vector.extract_strided_slice %392 {offsets = [0, 32], sizes = [2, 32], strides = [1, 1]} : vector<2x128xf32> to vector<2x32xf32>
    %395 = vector.extract_strided_slice %392 {offsets = [0, 64], sizes = [2, 32], strides = [1, 1]} : vector<2x128xf32> to vector<2x32xf32>
    %396 = vector.extract_strided_slice %392 {offsets = [0, 96], sizes = [2, 32], strides = [1, 1]} : vector<2x128xf32> to vector<2x32xf32>
    %397 = arith.mulf %394, %354 : vector<2x32xf32>
    %398 = arith.mulf %393, %395 : vector<2x32xf32>
    %399 = arith.addf %397, %398 : vector<2x32xf32>
    %400 = math.tanh %399 : vector<2x32xf32>
    %401 = arith.mulf %396, %400 : vector<2x32xf32>
    %402 = arith.truncf %401 : vector<2x32xf32> to vector<2x32xbf16>
    %cst_61 = arith.constant dense<0.000000e+00> : vector<2x128xf32>
    %403 = tpu.matmul %402, %15, %cst_61 {dimension_numbers = #tpu.dot_dimension_numbers<[1], [0], [0], [1], [0, 0, 1, 1], [], []>} : vector<2x32xbf16>, vector<32x128xbf16>, vector<2x128xf32> -> vector<2x128xf32>
    %404 = arith.truncf %378 : vector<2x32xf32> to vector<2x32xbf16>
    %cst_62 = arith.constant dense<0.000000e+00> : vector<2x128xf32>
    %405 = tpu.matmul %404, %13, %cst_62 {dimension_numbers = #tpu.dot_dimension_numbers<[1], [0], [0], [1], [0, 0, 1, 1], [], []>} : vector<2x32xbf16>, vector<32x128xbf16>, vector<2x128xf32> -> vector<2x128xf32>
    %406 = arith.addf %403, %405 : vector<2x128xf32>
    %407 = arith.addf %406, %25 : vector<2x128xf32>
    %408 = math.tanh %407 : vector<2x128xf32>
    %409 = arith.negf %407 : vector<2x128xf32>
    %410 = math.exp %409 : vector<2x128xf32>
    %cst_63 = arith.constant 1.000000e+00 : f32
    %411 = vector.broadcast %cst_63 : f32 to vector<2x128xf32>
    %412 = arith.addf %411, %410 : vector<2x128xf32>
    %413 = arith.divf %411, %412 : vector<2x128xf32>
    %414 = arith.select %34, %408, %413 : vector<2x128xi1>, vector<2x128xf32>
    %415 = vector.extract_strided_slice %414 {offsets = [0, 0], sizes = [2, 32], strides = [1, 1]} : vector<2x128xf32> to vector<2x32xf32>
    %416 = vector.extract_strided_slice %414 {offsets = [0, 32], sizes = [2, 32], strides = [1, 1]} : vector<2x128xf32> to vector<2x32xf32>
    %417 = vector.extract_strided_slice %414 {offsets = [0, 64], sizes = [2, 32], strides = [1, 1]} : vector<2x128xf32> to vector<2x32xf32>
    %418 = vector.extract_strided_slice %414 {offsets = [0, 96], sizes = [2, 32], strides = [1, 1]} : vector<2x128xf32> to vector<2x32xf32>
    %419 = arith.mulf %416, %376 : vector<2x32xf32>
    %420 = arith.mulf %415, %417 : vector<2x32xf32>
    %421 = arith.addf %419, %420 : vector<2x32xf32>
    %422 = math.tanh %421 : vector<2x32xf32>
    %423 = arith.mulf %418, %422 : vector<2x32xf32>
    %424 = arith.truncf %423 : vector<2x32xf32> to vector<2x32xbf16>
    %cst_64 = arith.constant dense<0.000000e+00> : vector<2x256xf32>
    %425 = tpu.matmul %424, %16, %cst_64 {dimension_numbers = #tpu.dot_dimension_numbers<[1], [0], [0], [1], [0, 0, 1, 1], [], []>} : vector<2x32xbf16>, vector<32x256xbf16>, vector<2x256xf32> -> vector<2x256xf32>
    %426 = arith.addf %425, %28 : vector<2x256xf32>
    %427 = vector.extract_strided_slice %426 {offsets = [0, 0], sizes = [2, 128], strides = [1, 1]} : vector<2x256xf32> to vector<2x128xf32>
    %428 = vector.extract_strided_slice %426 {offsets = [0, 128], sizes = [2, 8], strides = [1, 1]} : vector<2x256xf32> to vector<2x8xf32>
    %429 = arith.truncf %401 : vector<2x32xf32> to vector<2x32xbf16>
    %cst_65 = arith.constant dense<0.000000e+00> : vector<2x128xf32>
    %430 = tpu.matmul %429, %11, %cst_65 {dimension_numbers = #tpu.dot_dimension_numbers<[1], [0], [0], [1], [0, 0, 1, 1], [], []>} : vector<2x32xbf16>, vector<32x128xbf16>, vector<2x128xf32> -> vector<2x128xf32>
    %431 = arith.addf %427, %430 : vector<2x128xf32>
    %432 = math.tanh %431 : vector<2x128xf32>
    %433 = arith.negf %431 : vector<2x128xf32>
    %434 = math.exp %433 : vector<2x128xf32>
    %cst_66 = arith.constant 1.000000e+00 : f32
    %435 = vector.broadcast %cst_66 : f32 to vector<2x128xf32>
    %436 = arith.addf %435, %434 : vector<2x128xf32>
    %437 = arith.divf %435, %436 : vector<2x128xf32>
    %438 = arith.select %34, %432, %437 : vector<2x128xi1>, vector<2x128xf32>
    %439 = vector.extract_strided_slice %438 {offsets = [0, 0], sizes = [2, 32], strides = [1, 1]} : vector<2x128xf32> to vector<2x32xf32>
    %440 = vector.extract_strided_slice %438 {offsets = [0, 32], sizes = [2, 32], strides = [1, 1]} : vector<2x128xf32> to vector<2x32xf32>
    %441 = vector.extract_strided_slice %438 {offsets = [0, 64], sizes = [2, 32], strides = [1, 1]} : vector<2x128xf32> to vector<2x32xf32>
    %442 = vector.extract_strided_slice %438 {offsets = [0, 96], sizes = [2, 32], strides = [1, 1]} : vector<2x128xf32> to vector<2x32xf32>
    %443 = arith.mulf %440, %399 : vector<2x32xf32>
    %444 = arith.mulf %439, %441 : vector<2x32xf32>
    %445 = arith.addf %443, %444 : vector<2x32xf32>
    %446 = math.tanh %445 : vector<2x32xf32>
    %447 = arith.mulf %442, %446 : vector<2x32xf32>
    %448 = arith.truncf %447 : vector<2x32xf32> to vector<2x32xbf16>
    %cst_67 = arith.constant dense<0.000000e+00> : vector<2x128xf32>
    %449 = tpu.matmul %448, %15, %cst_67 {dimension_numbers = #tpu.dot_dimension_numbers<[1], [0], [0], [1], [0, 0, 1, 1], [], []>} : vector<2x32xbf16>, vector<32x128xbf16>, vector<2x128xf32> -> vector<2x128xf32>
    %450 = arith.truncf %423 : vector<2x32xf32> to vector<2x32xbf16>
    %cst_68 = arith.constant dense<0.000000e+00> : vector<2x128xf32>
    %451 = tpu.matmul %450, %13, %cst_68 {dimension_numbers = #tpu.dot_dimension_numbers<[1], [0], [0], [1], [0, 0, 1, 1], [], []>} : vector<2x32xbf16>, vector<32x128xbf16>, vector<2x128xf32> -> vector<2x128xf32>
    %452 = arith.addf %449, %451 : vector<2x128xf32>
    %453 = arith.addf %452, %25 : vector<2x128xf32>
    %454 = math.tanh %453 : vector<2x128xf32>
    %455 = arith.negf %453 : vector<2x128xf32>
    %456 = math.exp %455 : vector<2x128xf32>
    %cst_69 = arith.constant 1.000000e+00 : f32
    %457 = vector.broadcast %cst_69 : f32 to vector<2x128xf32>
    %458 = arith.addf %457, %456 : vector<2x128xf32>
    %459 = arith.divf %457, %458 : vector<2x128xf32>
    %460 = arith.select %34, %454, %459 : vector<2x128xi1>, vector<2x128xf32>
    %461 = vector.extract_strided_slice %460 {offsets = [0, 0], sizes = [2, 32], strides = [1, 1]} : vector<2x128xf32> to vector<2x32xf32>
    %462 = vector.extract_strided_slice %460 {offsets = [0, 32], sizes = [2, 32], strides = [1, 1]} : vector<2x128xf32> to vector<2x32xf32>
    %463 = vector.extract_strided_slice %460 {offsets = [0, 64], sizes = [2, 32], strides = [1, 1]} : vector<2x128xf32> to vector<2x32xf32>
    %464 = vector.extract_strided_slice %460 {offsets = [0, 96], sizes = [2, 32], strides = [1, 1]} : vector<2x128xf32> to vector<2x32xf32>
    %465 = arith.mulf %462, %421 : vector<2x32xf32>
    %466 = arith.mulf %461, %463 : vector<2x32xf32>
    %467 = arith.addf %465, %466 : vector<2x32xf32>
    %468 = math.tanh %467 : vector<2x32xf32>
    %469 = arith.mulf %464, %468 : vector<2x32xf32>
    %470 = arith.truncf %469 : vector<2x32xf32> to vector<2x32xbf16>
    %cst_70 = arith.constant dense<0.000000e+00> : vector<2x256xf32>
    %471 = tpu.matmul %470, %16, %cst_70 {dimension_numbers = #tpu.dot_dimension_numbers<[1], [0], [0], [1], [0, 0, 1, 1], [], []>} : vector<2x32xbf16>, vector<32x256xbf16>, vector<2x256xf32> -> vector<2x256xf32>
    %472 = arith.addf %471, %28 : vector<2x256xf32>
    %473 = vector.extract_strided_slice %472 {offsets = [0, 0], sizes = [2, 128], strides = [1, 1]} : vector<2x256xf32> to vector<2x128xf32>
    %474 = vector.extract_strided_slice %472 {offsets = [0, 128], sizes = [2, 8], strides = [1, 1]} : vector<2x256xf32> to vector<2x8xf32>
    %475 = arith.truncf %447 : vector<2x32xf32> to vector<2x32xbf16>
    %cst_71 = arith.constant dense<0.000000e+00> : vector<2x128xf32>
    %476 = tpu.matmul %475, %11, %cst_71 {dimension_numbers = #tpu.dot_dimension_numbers<[1], [0], [0], [1], [0, 0, 1, 1], [], []>} : vector<2x32xbf16>, vector<32x128xbf16>, vector<2x128xf32> -> vector<2x128xf32>
    %477 = arith.addf %473, %476 : vector<2x128xf32>
    %478 = math.tanh %477 : vector<2x128xf32>
    %479 = arith.negf %477 : vector<2x128xf32>
    %480 = math.exp %479 : vector<2x128xf32>
    %cst_72 = arith.constant 1.000000e+00 : f32
    %481 = vector.broadcast %cst_72 : f32 to vector<2x128xf32>
    %482 = arith.addf %481, %480 : vector<2x128xf32>
    %483 = arith.divf %481, %482 : vector<2x128xf32>
    %484 = arith.select %34, %478, %483 : vector<2x128xi1>, vector<2x128xf32>
    %485 = vector.extract_strided_slice %484 {offsets = [0, 0], sizes = [2, 32], strides = [1, 1]} : vector<2x128xf32> to vector<2x32xf32>
    %486 = vector.extract_strided_slice %484 {offsets = [0, 32], sizes = [2, 32], strides = [1, 1]} : vector<2x128xf32> to vector<2x32xf32>
    %487 = vector.extract_strided_slice %484 {offsets = [0, 64], sizes = [2, 32], strides = [1, 1]} : vector<2x128xf32> to vector<2x32xf32>
    %488 = vector.extract_strided_slice %484 {offsets = [0, 96], sizes = [2, 32], strides = [1, 1]} : vector<2x128xf32> to vector<2x32xf32>
    %489 = arith.mulf %486, %445 : vector<2x32xf32>
    %490 = arith.mulf %485, %487 : vector<2x32xf32>
    %491 = arith.addf %489, %490 : vector<2x32xf32>
    %492 = math.tanh %491 : vector<2x32xf32>
    %493 = arith.mulf %488, %492 : vector<2x32xf32>
    %494 = arith.truncf %493 : vector<2x32xf32> to vector<2x32xbf16>
    %cst_73 = arith.constant dense<0.000000e+00> : vector<2x128xf32>
    %495 = tpu.matmul %494, %15, %cst_73 {dimension_numbers = #tpu.dot_dimension_numbers<[1], [0], [0], [1], [0, 0, 1, 1], [], []>} : vector<2x32xbf16>, vector<32x128xbf16>, vector<2x128xf32> -> vector<2x128xf32>
    %496 = arith.truncf %469 : vector<2x32xf32> to vector<2x32xbf16>
    %cst_74 = arith.constant dense<0.000000e+00> : vector<2x128xf32>
    %497 = tpu.matmul %496, %13, %cst_74 {dimension_numbers = #tpu.dot_dimension_numbers<[1], [0], [0], [1], [0, 0, 1, 1], [], []>} : vector<2x32xbf16>, vector<32x128xbf16>, vector<2x128xf32> -> vector<2x128xf32>
    %498 = arith.addf %495, %497 : vector<2x128xf32>
    %499 = arith.addf %498, %25 : vector<2x128xf32>
    %500 = math.tanh %499 : vector<2x128xf32>
    %501 = arith.negf %499 : vector<2x128xf32>
    %502 = math.exp %501 : vector<2x128xf32>
    %cst_75 = arith.constant 1.000000e+00 : f32
    %503 = vector.broadcast %cst_75 : f32 to vector<2x128xf32>
    %504 = arith.addf %503, %502 : vector<2x128xf32>
    %505 = arith.divf %503, %504 : vector<2x128xf32>
    %506 = arith.select %34, %500, %505 : vector<2x128xi1>, vector<2x128xf32>
    %507 = vector.extract_strided_slice %506 {offsets = [0, 0], sizes = [2, 32], strides = [1, 1]} : vector<2x128xf32> to vector<2x32xf32>
    %508 = vector.extract_strided_slice %506 {offsets = [0, 32], sizes = [2, 32], strides = [1, 1]} : vector<2x128xf32> to vector<2x32xf32>
    %509 = vector.extract_strided_slice %506 {offsets = [0, 64], sizes = [2, 32], strides = [1, 1]} : vector<2x128xf32> to vector<2x32xf32>
    %510 = vector.extract_strided_slice %506 {offsets = [0, 96], sizes = [2, 32], strides = [1, 1]} : vector<2x128xf32> to vector<2x32xf32>
    %511 = arith.mulf %508, %467 : vector<2x32xf32>
    %512 = arith.mulf %507, %509 : vector<2x32xf32>
    %513 = arith.addf %511, %512 : vector<2x32xf32>
    %514 = math.tanh %513 : vector<2x32xf32>
    %515 = arith.mulf %510, %514 : vector<2x32xf32>
    %516 = arith.truncf %515 : vector<2x32xf32> to vector<2x32xbf16>
    %cst_76 = arith.constant dense<0.000000e+00> : vector<2x256xf32>
    %517 = tpu.matmul %516, %16, %cst_76 {dimension_numbers = #tpu.dot_dimension_numbers<[1], [0], [0], [1], [0, 0, 1, 1], [], []>} : vector<2x32xbf16>, vector<32x256xbf16>, vector<2x256xf32> -> vector<2x256xf32>
    %518 = arith.addf %517, %28 : vector<2x256xf32>
    %519 = vector.extract_strided_slice %518 {offsets = [0, 0], sizes = [2, 128], strides = [1, 1]} : vector<2x256xf32> to vector<2x128xf32>
    %520 = vector.extract_strided_slice %518 {offsets = [0, 128], sizes = [2, 8], strides = [1, 1]} : vector<2x256xf32> to vector<2x8xf32>
    %521 = arith.truncf %493 : vector<2x32xf32> to vector<2x32xbf16>
    %cst_77 = arith.constant dense<0.000000e+00> : vector<2x128xf32>
    %522 = tpu.matmul %521, %11, %cst_77 {dimension_numbers = #tpu.dot_dimension_numbers<[1], [0], [0], [1], [0, 0, 1, 1], [], []>} : vector<2x32xbf16>, vector<32x128xbf16>, vector<2x128xf32> -> vector<2x128xf32>
    %523 = arith.addf %519, %522 : vector<2x128xf32>
    %524 = math.tanh %523 : vector<2x128xf32>
    %525 = arith.negf %523 : vector<2x128xf32>
    %526 = math.exp %525 : vector<2x128xf32>
    %cst_78 = arith.constant 1.000000e+00 : f32
    %527 = vector.broadcast %cst_78 : f32 to vector<2x128xf32>
    %528 = arith.addf %527, %526 : vector<2x128xf32>
    %529 = arith.divf %527, %528 : vector<2x128xf32>
    %530 = arith.select %34, %524, %529 : vector<2x128xi1>, vector<2x128xf32>
    %531 = vector.extract_strided_slice %530 {offsets = [0, 0], sizes = [2, 32], strides = [1, 1]} : vector<2x128xf32> to vector<2x32xf32>
    %532 = vector.extract_strided_slice %530 {offsets = [0, 32], sizes = [2, 32], strides = [1, 1]} : vector<2x128xf32> to vector<2x32xf32>
    %533 = vector.extract_strided_slice %530 {offsets = [0, 64], sizes = [2, 32], strides = [1, 1]} : vector<2x128xf32> to vector<2x32xf32>
    %534 = vector.extract_strided_slice %530 {offsets = [0, 96], sizes = [2, 32], strides = [1, 1]} : vector<2x128xf32> to vector<2x32xf32>
    %535 = arith.mulf %532, %491 : vector<2x32xf32>
    %536 = arith.mulf %531, %533 : vector<2x32xf32>
    %537 = arith.addf %535, %536 : vector<2x32xf32>
    %538 = math.tanh %537 : vector<2x32xf32>
    %539 = arith.mulf %534, %538 : vector<2x32xf32>
    %540 = arith.truncf %539 : vector<2x32xf32> to vector<2x32xbf16>
    %cst_79 = arith.constant dense<0.000000e+00> : vector<2x128xf32>
    %541 = tpu.matmul %540, %15, %cst_79 {dimension_numbers = #tpu.dot_dimension_numbers<[1], [0], [0], [1], [0, 0, 1, 1], [], []>} : vector<2x32xbf16>, vector<32x128xbf16>, vector<2x128xf32> -> vector<2x128xf32>
    %542 = arith.truncf %515 : vector<2x32xf32> to vector<2x32xbf16>
    %cst_80 = arith.constant dense<0.000000e+00> : vector<2x128xf32>
    %543 = tpu.matmul %542, %13, %cst_80 {dimension_numbers = #tpu.dot_dimension_numbers<[1], [0], [0], [1], [0, 0, 1, 1], [], []>} : vector<2x32xbf16>, vector<32x128xbf16>, vector<2x128xf32> -> vector<2x128xf32>
    %544 = arith.addf %541, %543 : vector<2x128xf32>
    %545 = arith.addf %544, %25 : vector<2x128xf32>
    %546 = math.tanh %545 : vector<2x128xf32>
    %547 = arith.negf %545 : vector<2x128xf32>
    %548 = math.exp %547 : vector<2x128xf32>
    %cst_81 = arith.constant 1.000000e+00 : f32
    %549 = vector.broadcast %cst_81 : f32 to vector<2x128xf32>
    %550 = arith.addf %549, %548 : vector<2x128xf32>
    %551 = arith.divf %549, %550 : vector<2x128xf32>
    %552 = arith.select %34, %546, %551 : vector<2x128xi1>, vector<2x128xf32>
    %553 = vector.extract_strided_slice %552 {offsets = [0, 0], sizes = [2, 32], strides = [1, 1]} : vector<2x128xf32> to vector<2x32xf32>
    %554 = vector.extract_strided_slice %552 {offsets = [0, 32], sizes = [2, 32], strides = [1, 1]} : vector<2x128xf32> to vector<2x32xf32>
    %555 = vector.extract_strided_slice %552 {offsets = [0, 64], sizes = [2, 32], strides = [1, 1]} : vector<2x128xf32> to vector<2x32xf32>
    %556 = vector.extract_strided_slice %552 {offsets = [0, 96], sizes = [2, 32], strides = [1, 1]} : vector<2x128xf32> to vector<2x32xf32>
    %557 = arith.mulf %554, %513 : vector<2x32xf32>
    %558 = arith.mulf %553, %555 : vector<2x32xf32>
    %559 = arith.addf %557, %558 : vector<2x32xf32>
    %560 = math.tanh %559 : vector<2x32xf32>
    %561 = arith.mulf %556, %560 : vector<2x32xf32>
    %562 = arith.truncf %561 : vector<2x32xf32> to vector<2x32xbf16>
    %cst_82 = arith.constant dense<0.000000e+00> : vector<2x256xf32>
    %563 = tpu.matmul %562, %16, %cst_82 {dimension_numbers = #tpu.dot_dimension_numbers<[1], [0], [0], [1], [0, 0, 1, 1], [], []>} : vector<2x32xbf16>, vector<32x256xbf16>, vector<2x256xf32> -> vector<2x256xf32>
    %564 = arith.addf %563, %28 : vector<2x256xf32>
    %565 = vector.extract_strided_slice %564 {offsets = [0, 0], sizes = [2, 128], strides = [1, 1]} : vector<2x256xf32> to vector<2x128xf32>
    %566 = vector.extract_strided_slice %564 {offsets = [0, 128], sizes = [2, 8], strides = [1, 1]} : vector<2x256xf32> to vector<2x8xf32>
    %567 = arith.truncf %539 : vector<2x32xf32> to vector<2x32xbf16>
    %cst_83 = arith.constant dense<0.000000e+00> : vector<2x128xf32>
    %568 = tpu.matmul %567, %11, %cst_83 {dimension_numbers = #tpu.dot_dimension_numbers<[1], [0], [0], [1], [0, 0, 1, 1], [], []>} : vector<2x32xbf16>, vector<32x128xbf16>, vector<2x128xf32> -> vector<2x128xf32>
    %569 = arith.addf %565, %568 : vector<2x128xf32>
    %570 = math.tanh %569 : vector<2x128xf32>
    %571 = arith.negf %569 : vector<2x128xf32>
    %572 = math.exp %571 : vector<2x128xf32>
    %cst_84 = arith.constant 1.000000e+00 : f32
    %573 = vector.broadcast %cst_84 : f32 to vector<2x128xf32>
    %574 = arith.addf %573, %572 : vector<2x128xf32>
    %575 = arith.divf %573, %574 : vector<2x128xf32>
    %576 = arith.select %34, %570, %575 : vector<2x128xi1>, vector<2x128xf32>
    %577 = vector.extract_strided_slice %576 {offsets = [0, 0], sizes = [2, 32], strides = [1, 1]} : vector<2x128xf32> to vector<2x32xf32>
    %578 = vector.extract_strided_slice %576 {offsets = [0, 32], sizes = [2, 32], strides = [1, 1]} : vector<2x128xf32> to vector<2x32xf32>
    %579 = vector.extract_strided_slice %576 {offsets = [0, 64], sizes = [2, 32], strides = [1, 1]} : vector<2x128xf32> to vector<2x32xf32>
    %580 = vector.extract_strided_slice %576 {offsets = [0, 96], sizes = [2, 32], strides = [1, 1]} : vector<2x128xf32> to vector<2x32xf32>
    %581 = arith.mulf %578, %537 : vector<2x32xf32>
    %582 = arith.mulf %577, %579 : vector<2x32xf32>
    %583 = arith.addf %581, %582 : vector<2x32xf32>
    %584 = math.tanh %583 : vector<2x32xf32>
    %585 = arith.mulf %580, %584 : vector<2x32xf32>
    %586 = arith.truncf %585 : vector<2x32xf32> to vector<2x32xbf16>
    %cst_85 = arith.constant dense<0.000000e+00> : vector<2x128xf32>
    %587 = tpu.matmul %586, %15, %cst_85 {dimension_numbers = #tpu.dot_dimension_numbers<[1], [0], [0], [1], [0, 0, 1, 1], [], []>} : vector<2x32xbf16>, vector<32x128xbf16>, vector<2x128xf32> -> vector<2x128xf32>
    %588 = arith.truncf %561 : vector<2x32xf32> to vector<2x32xbf16>
    %cst_86 = arith.constant dense<0.000000e+00> : vector<2x128xf32>
    %589 = tpu.matmul %588, %13, %cst_86 {dimension_numbers = #tpu.dot_dimension_numbers<[1], [0], [0], [1], [0, 0, 1, 1], [], []>} : vector<2x32xbf16>, vector<32x128xbf16>, vector<2x128xf32> -> vector<2x128xf32>
    %590 = arith.addf %587, %589 : vector<2x128xf32>
    %591 = arith.addf %590, %25 : vector<2x128xf32>
    %592 = math.tanh %591 : vector<2x128xf32>
    %593 = arith.negf %591 : vector<2x128xf32>
    %594 = math.exp %593 : vector<2x128xf32>
    %cst_87 = arith.constant 1.000000e+00 : f32
    %595 = vector.broadcast %cst_87 : f32 to vector<2x128xf32>
    %596 = arith.addf %595, %594 : vector<2x128xf32>
    %597 = arith.divf %595, %596 : vector<2x128xf32>
    %598 = arith.select %34, %592, %597 : vector<2x128xi1>, vector<2x128xf32>
    %599 = vector.extract_strided_slice %598 {offsets = [0, 0], sizes = [2, 32], strides = [1, 1]} : vector<2x128xf32> to vector<2x32xf32>
    %600 = vector.extract_strided_slice %598 {offsets = [0, 32], sizes = [2, 32], strides = [1, 1]} : vector<2x128xf32> to vector<2x32xf32>
    %601 = vector.extract_strided_slice %598 {offsets = [0, 64], sizes = [2, 32], strides = [1, 1]} : vector<2x128xf32> to vector<2x32xf32>
    %602 = vector.extract_strided_slice %598 {offsets = [0, 96], sizes = [2, 32], strides = [1, 1]} : vector<2x128xf32> to vector<2x32xf32>
    %603 = arith.mulf %600, %559 : vector<2x32xf32>
    %604 = arith.mulf %599, %601 : vector<2x32xf32>
    %605 = arith.addf %603, %604 : vector<2x32xf32>
    %606 = math.tanh %605 : vector<2x32xf32>
    %607 = arith.mulf %602, %606 : vector<2x32xf32>
    %608 = arith.truncf %607 : vector<2x32xf32> to vector<2x32xbf16>
    %cst_88 = arith.constant dense<0.000000e+00> : vector<2x256xf32>
    %609 = tpu.matmul %608, %16, %cst_88 {dimension_numbers = #tpu.dot_dimension_numbers<[1], [0], [0], [1], [0, 0, 1, 1], [], []>} : vector<2x32xbf16>, vector<32x256xbf16>, vector<2x256xf32> -> vector<2x256xf32>
    %610 = arith.addf %609, %28 : vector<2x256xf32>
    %611 = vector.extract_strided_slice %610 {offsets = [0, 0], sizes = [2, 128], strides = [1, 1]} : vector<2x256xf32> to vector<2x128xf32>
    %612 = vector.extract_strided_slice %610 {offsets = [0, 128], sizes = [2, 8], strides = [1, 1]} : vector<2x256xf32> to vector<2x8xf32>
    %613 = arith.truncf %585 : vector<2x32xf32> to vector<2x32xbf16>
    %cst_89 = arith.constant dense<0.000000e+00> : vector<2x128xf32>
    %614 = tpu.matmul %613, %11, %cst_89 {dimension_numbers = #tpu.dot_dimension_numbers<[1], [0], [0], [1], [0, 0, 1, 1], [], []>} : vector<2x32xbf16>, vector<32x128xbf16>, vector<2x128xf32> -> vector<2x128xf32>
    %615 = arith.addf %611, %614 : vector<2x128xf32>
    %616 = math.tanh %615 : vector<2x128xf32>
    %617 = arith.negf %615 : vector<2x128xf32>
    %618 = math.exp %617 : vector<2x128xf32>
    %cst_90 = arith.constant 1.000000e+00 : f32
    %619 = vector.broadcast %cst_90 : f32 to vector<2x128xf32>
    %620 = arith.addf %619, %618 : vector<2x128xf32>
    %621 = arith.divf %619, %620 : vector<2x128xf32>
    %622 = arith.select %34, %616, %621 : vector<2x128xi1>, vector<2x128xf32>
    %623 = vector.extract_strided_slice %622 {offsets = [0, 0], sizes = [2, 32], strides = [1, 1]} : vector<2x128xf32> to vector<2x32xf32>
    %624 = vector.extract_strided_slice %622 {offsets = [0, 32], sizes = [2, 32], strides = [1, 1]} : vector<2x128xf32> to vector<2x32xf32>
    %625 = vector.extract_strided_slice %622 {offsets = [0, 64], sizes = [2, 32], strides = [1, 1]} : vector<2x128xf32> to vector<2x32xf32>
    %626 = vector.extract_strided_slice %622 {offsets = [0, 96], sizes = [2, 32], strides = [1, 1]} : vector<2x128xf32> to vector<2x32xf32>
    %627 = arith.mulf %624, %583 : vector<2x32xf32>
    %628 = arith.mulf %623, %625 : vector<2x32xf32>
    %629 = arith.addf %627, %628 : vector<2x32xf32>
    %630 = math.tanh %629 : vector<2x32xf32>
    %631 = arith.mulf %626, %630 : vector<2x32xf32>
    %632 = arith.truncf %631 : vector<2x32xf32> to vector<2x32xbf16>
    %cst_91 = arith.constant dense<0.000000e+00> : vector<2x128xf32>
    %633 = tpu.matmul %632, %15, %cst_91 {dimension_numbers = #tpu.dot_dimension_numbers<[1], [0], [0], [1], [0, 0, 1, 1], [], []>} : vector<2x32xbf16>, vector<32x128xbf16>, vector<2x128xf32> -> vector<2x128xf32>
    %634 = arith.truncf %607 : vector<2x32xf32> to vector<2x32xbf16>
    %cst_92 = arith.constant dense<0.000000e+00> : vector<2x128xf32>
    %635 = tpu.matmul %634, %13, %cst_92 {dimension_numbers = #tpu.dot_dimension_numbers<[1], [0], [0], [1], [0, 0, 1, 1], [], []>} : vector<2x32xbf16>, vector<32x128xbf16>, vector<2x128xf32> -> vector<2x128xf32>
    %636 = arith.addf %633, %635 : vector<2x128xf32>
    %637 = arith.addf %636, %25 : vector<2x128xf32>
    %638 = math.tanh %637 : vector<2x128xf32>
    %639 = arith.negf %637 : vector<2x128xf32>
    %640 = math.exp %639 : vector<2x128xf32>
    %cst_93 = arith.constant 1.000000e+00 : f32
    %641 = vector.broadcast %cst_93 : f32 to vector<2x128xf32>
    %642 = arith.addf %641, %640 : vector<2x128xf32>
    %643 = arith.divf %641, %642 : vector<2x128xf32>
    %644 = arith.select %34, %638, %643 : vector<2x128xi1>, vector<2x128xf32>
    %645 = vector.extract_strided_slice %644 {offsets = [0, 0], sizes = [2, 32], strides = [1, 1]} : vector<2x128xf32> to vector<2x32xf32>
    %646 = vector.extract_strided_slice %644 {offsets = [0, 32], sizes = [2, 32], strides = [1, 1]} : vector<2x128xf32> to vector<2x32xf32>
    %647 = vector.extract_strided_slice %644 {offsets = [0, 64], sizes = [2, 32], strides = [1, 1]} : vector<2x128xf32> to vector<2x32xf32>
    %648 = vector.extract_strided_slice %644 {offsets = [0, 96], sizes = [2, 32], strides = [1, 1]} : vector<2x128xf32> to vector<2x32xf32>
    %649 = arith.mulf %646, %605 : vector<2x32xf32>
    %650 = arith.mulf %645, %647 : vector<2x32xf32>
    %651 = arith.addf %649, %650 : vector<2x32xf32>
    %652 = math.tanh %651 : vector<2x32xf32>
    %653 = arith.mulf %648, %652 : vector<2x32xf32>
    %654 = arith.truncf %653 : vector<2x32xf32> to vector<2x32xbf16>
    %cst_94 = arith.constant dense<0.000000e+00> : vector<2x256xf32>
    %655 = tpu.matmul %654, %16, %cst_94 {dimension_numbers = #tpu.dot_dimension_numbers<[1], [0], [0], [1], [0, 0, 1, 1], [], []>} : vector<2x32xbf16>, vector<32x256xbf16>, vector<2x256xf32> -> vector<2x256xf32>
    %656 = arith.addf %655, %28 : vector<2x256xf32>
    %657 = vector.extract_strided_slice %656 {offsets = [0, 0], sizes = [2, 128], strides = [1, 1]} : vector<2x256xf32> to vector<2x128xf32>
    %658 = vector.extract_strided_slice %656 {offsets = [0, 128], sizes = [2, 8], strides = [1, 1]} : vector<2x256xf32> to vector<2x8xf32>
    %659 = arith.truncf %631 : vector<2x32xf32> to vector<2x32xbf16>
    %cst_95 = arith.constant dense<0.000000e+00> : vector<2x128xf32>
    %660 = tpu.matmul %659, %11, %cst_95 {dimension_numbers = #tpu.dot_dimension_numbers<[1], [0], [0], [1], [0, 0, 1, 1], [], []>} : vector<2x32xbf16>, vector<32x128xbf16>, vector<2x128xf32> -> vector<2x128xf32>
    %661 = arith.addf %657, %660 : vector<2x128xf32>
    %662 = math.tanh %661 : vector<2x128xf32>
    %663 = arith.negf %661 : vector<2x128xf32>
    %664 = math.exp %663 : vector<2x128xf32>
    %cst_96 = arith.constant 1.000000e+00 : f32
    %665 = vector.broadcast %cst_96 : f32 to vector<2x128xf32>
    %666 = arith.addf %665, %664 : vector<2x128xf32>
    %667 = arith.divf %665, %666 : vector<2x128xf32>
    %668 = arith.select %34, %662, %667 : vector<2x128xi1>, vector<2x128xf32>
    %669 = vector.extract_strided_slice %668 {offsets = [0, 0], sizes = [2, 32], strides = [1, 1]} : vector<2x128xf32> to vector<2x32xf32>
    %670 = vector.extract_strided_slice %668 {offsets = [0, 32], sizes = [2, 32], strides = [1, 1]} : vector<2x128xf32> to vector<2x32xf32>
    %671 = vector.extract_strided_slice %668 {offsets = [0, 64], sizes = [2, 32], strides = [1, 1]} : vector<2x128xf32> to vector<2x32xf32>
    %672 = vector.extract_strided_slice %668 {offsets = [0, 96], sizes = [2, 32], strides = [1, 1]} : vector<2x128xf32> to vector<2x32xf32>
    %673 = arith.mulf %670, %629 : vector<2x32xf32>
    %674 = arith.mulf %669, %671 : vector<2x32xf32>
    %675 = arith.addf %673, %674 : vector<2x32xf32>
    %676 = math.tanh %675 : vector<2x32xf32>
    %677 = arith.mulf %672, %676 : vector<2x32xf32>
    %678 = arith.truncf %677 : vector<2x32xf32> to vector<2x32xbf16>
    %cst_97 = arith.constant dense<0.000000e+00> : vector<2x128xf32>
    %679 = tpu.matmul %678, %15, %cst_97 {dimension_numbers = #tpu.dot_dimension_numbers<[1], [0], [0], [1], [0, 0, 1, 1], [], []>} : vector<2x32xbf16>, vector<32x128xbf16>, vector<2x128xf32> -> vector<2x128xf32>
    %680 = arith.truncf %653 : vector<2x32xf32> to vector<2x32xbf16>
    %cst_98 = arith.constant dense<0.000000e+00> : vector<2x128xf32>
    %681 = tpu.matmul %680, %13, %cst_98 {dimension_numbers = #tpu.dot_dimension_numbers<[1], [0], [0], [1], [0, 0, 1, 1], [], []>} : vector<2x32xbf16>, vector<32x128xbf16>, vector<2x128xf32> -> vector<2x128xf32>
    %682 = arith.addf %679, %681 : vector<2x128xf32>
    %683 = arith.addf %682, %25 : vector<2x128xf32>
    %684 = math.tanh %683 : vector<2x128xf32>
    %685 = arith.negf %683 : vector<2x128xf32>
    %686 = math.exp %685 : vector<2x128xf32>
    %cst_99 = arith.constant 1.000000e+00 : f32
    %687 = vector.broadcast %cst_99 : f32 to vector<2x128xf32>
    %688 = arith.addf %687, %686 : vector<2x128xf32>
    %689 = arith.divf %687, %688 : vector<2x128xf32>
    %690 = arith.select %34, %684, %689 : vector<2x128xi1>, vector<2x128xf32>
    %691 = vector.extract_strided_slice %690 {offsets = [0, 0], sizes = [2, 32], strides = [1, 1]} : vector<2x128xf32> to vector<2x32xf32>
    %692 = vector.extract_strided_slice %690 {offsets = [0, 32], sizes = [2, 32], strides = [1, 1]} : vector<2x128xf32> to vector<2x32xf32>
    %693 = vector.extract_strided_slice %690 {offsets = [0, 64], sizes = [2, 32], strides = [1, 1]} : vector<2x128xf32> to vector<2x32xf32>
    %694 = vector.extract_strided_slice %690 {offsets = [0, 96], sizes = [2, 32], strides = [1, 1]} : vector<2x128xf32> to vector<2x32xf32>
    %695 = arith.mulf %692, %651 : vector<2x32xf32>
    %696 = arith.mulf %691, %693 : vector<2x32xf32>
    %697 = arith.addf %695, %696 : vector<2x32xf32>
    %698 = math.tanh %697 : vector<2x32xf32>
    %699 = arith.mulf %694, %698 : vector<2x32xf32>
    %700 = arith.truncf %699 : vector<2x32xf32> to vector<2x32xbf16>
    %cst_100 = arith.constant dense<0.000000e+00> : vector<2x256xf32>
    %701 = tpu.matmul %700, %16, %cst_100 {dimension_numbers = #tpu.dot_dimension_numbers<[1], [0], [0], [1], [0, 0, 1, 1], [], []>} : vector<2x32xbf16>, vector<32x256xbf16>, vector<2x256xf32> -> vector<2x256xf32>
    %702 = arith.addf %701, %28 : vector<2x256xf32>
    %703 = vector.extract_strided_slice %702 {offsets = [0, 0], sizes = [2, 128], strides = [1, 1]} : vector<2x256xf32> to vector<2x128xf32>
    %704 = vector.extract_strided_slice %702 {offsets = [0, 128], sizes = [2, 8], strides = [1, 1]} : vector<2x256xf32> to vector<2x8xf32>
    %705 = arith.truncf %677 : vector<2x32xf32> to vector<2x32xbf16>
    %cst_101 = arith.constant dense<0.000000e+00> : vector<2x128xf32>
    %706 = tpu.matmul %705, %11, %cst_101 {dimension_numbers = #tpu.dot_dimension_numbers<[1], [0], [0], [1], [0, 0, 1, 1], [], []>} : vector<2x32xbf16>, vector<32x128xbf16>, vector<2x128xf32> -> vector<2x128xf32>
    %707 = arith.addf %703, %706 : vector<2x128xf32>
    %708 = math.tanh %707 : vector<2x128xf32>
    %709 = arith.negf %707 : vector<2x128xf32>
    %710 = math.exp %709 : vector<2x128xf32>
    %cst_102 = arith.constant 1.000000e+00 : f32
    %711 = vector.broadcast %cst_102 : f32 to vector<2x128xf32>
    %712 = arith.addf %711, %710 : vector<2x128xf32>
    %713 = arith.divf %711, %712 : vector<2x128xf32>
    %714 = arith.select %34, %708, %713 : vector<2x128xi1>, vector<2x128xf32>
    %715 = vector.extract_strided_slice %714 {offsets = [0, 0], sizes = [2, 32], strides = [1, 1]} : vector<2x128xf32> to vector<2x32xf32>
    %716 = vector.extract_strided_slice %714 {offsets = [0, 32], sizes = [2, 32], strides = [1, 1]} : vector<2x128xf32> to vector<2x32xf32>
    %717 = vector.extract_strided_slice %714 {offsets = [0, 64], sizes = [2, 32], strides = [1, 1]} : vector<2x128xf32> to vector<2x32xf32>
    %718 = vector.extract_strided_slice %714 {offsets = [0, 96], sizes = [2, 32], strides = [1, 1]} : vector<2x128xf32> to vector<2x32xf32>
    %719 = arith.mulf %716, %675 : vector<2x32xf32>
    %720 = arith.mulf %715, %717 : vector<2x32xf32>
    %721 = arith.addf %719, %720 : vector<2x32xf32>
    %722 = math.tanh %721 : vector<2x32xf32>
    %723 = arith.mulf %718, %722 : vector<2x32xf32>
    %724 = arith.truncf %723 : vector<2x32xf32> to vector<2x32xbf16>
    %cst_103 = arith.constant dense<0.000000e+00> : vector<2x128xf32>
    %725 = tpu.matmul %724, %15, %cst_103 {dimension_numbers = #tpu.dot_dimension_numbers<[1], [0], [0], [1], [0, 0, 1, 1], [], []>} : vector<2x32xbf16>, vector<32x128xbf16>, vector<2x128xf32> -> vector<2x128xf32>
    %726 = arith.truncf %699 : vector<2x32xf32> to vector<2x32xbf16>
    %cst_104 = arith.constant dense<0.000000e+00> : vector<2x128xf32>
    %727 = tpu.matmul %726, %13, %cst_104 {dimension_numbers = #tpu.dot_dimension_numbers<[1], [0], [0], [1], [0, 0, 1, 1], [], []>} : vector<2x32xbf16>, vector<32x128xbf16>, vector<2x128xf32> -> vector<2x128xf32>
    %728 = arith.addf %725, %727 : vector<2x128xf32>
    %729 = arith.addf %728, %25 : vector<2x128xf32>
    %730 = math.tanh %729 : vector<2x128xf32>
    %731 = arith.negf %729 : vector<2x128xf32>
    %732 = math.exp %731 : vector<2x128xf32>
    %cst_105 = arith.constant 1.000000e+00 : f32
    %733 = vector.broadcast %cst_105 : f32 to vector<2x128xf32>
    %734 = arith.addf %733, %732 : vector<2x128xf32>
    %735 = arith.divf %733, %734 : vector<2x128xf32>
    %736 = arith.select %34, %730, %735 : vector<2x128xi1>, vector<2x128xf32>
    %737 = vector.extract_strided_slice %736 {offsets = [0, 0], sizes = [2, 32], strides = [1, 1]} : vector<2x128xf32> to vector<2x32xf32>
    %738 = vector.extract_strided_slice %736 {offsets = [0, 32], sizes = [2, 32], strides = [1, 1]} : vector<2x128xf32> to vector<2x32xf32>
    %739 = vector.extract_strided_slice %736 {offsets = [0, 64], sizes = [2, 32], strides = [1, 1]} : vector<2x128xf32> to vector<2x32xf32>
    %740 = vector.extract_strided_slice %736 {offsets = [0, 96], sizes = [2, 32], strides = [1, 1]} : vector<2x128xf32> to vector<2x32xf32>
    %741 = arith.mulf %738, %697 : vector<2x32xf32>
    %742 = arith.mulf %737, %739 : vector<2x32xf32>
    %743 = arith.addf %741, %742 : vector<2x32xf32>
    %744 = math.tanh %743 : vector<2x32xf32>
    %745 = arith.mulf %740, %744 : vector<2x32xf32>
    %746 = arith.truncf %745 : vector<2x32xf32> to vector<2x32xbf16>
    %cst_106 = arith.constant dense<0.000000e+00> : vector<2x256xf32>
    %747 = tpu.matmul %746, %16, %cst_106 {dimension_numbers = #tpu.dot_dimension_numbers<[1], [0], [0], [1], [0, 0, 1, 1], [], []>} : vector<2x32xbf16>, vector<32x256xbf16>, vector<2x256xf32> -> vector<2x256xf32>
    %748 = arith.addf %747, %28 : vector<2x256xf32>
    %749 = vector.extract_strided_slice %748 {offsets = [0, 128], sizes = [2, 8], strides = [1, 1]} : vector<2x256xf32> to vector<2x8xf32>
    %cst_107 = arith.constant 0.000000e+00 : f32
    %750 = vector.broadcast %cst_107 : f32 to vector<2x64xf32>
    %751 = tpu.concatenate %428, %474, %520, %566, %612, %658, %704, %749, %750 in 1 : vector<2x8xf32>, vector<2x8xf32>, vector<2x8xf32>, vector<2x8xf32>, vector<2x8xf32>, vector<2x8xf32>, vector<2x8xf32>, vector<2x8xf32>, vector<2x64xf32> -> vector<2x128xf32>
    %c0_108 = arith.constant 0 : index
    %c0_109 = arith.constant 0 : index
    %752 = vector.load %arg3[%c0_108, %c0_109] : memref<2x128xf32, #tpu.memory_space<vmem>>, vector<2x128xf32>
    tpu.vector_store %arg3[%c0_108, %c0_109], %751 {strides = array<i32>} : memref<2x128xf32, #tpu.memory_space<vmem>>, vector<2x128xf32>,
    return
  }
}

</mosaic_0001>

<bundles_post_ra>
// kernel: tpu_custom_call.1
= control target key start
LH: loop header
LB: loop body
LE: loop exit
PB: predicated region body
PF: predicated region fallthrough
CT: control target
= control target key end

     0   :  { %8 = vsyncpa [#allocation3], 0  ;;  %s5609_s0 = inlined_call_operand.vmem [shape: f32[16,8], index: 0, kind: input, shape index: {}]   ;;  %s5610_s1 = inlined_call_operand.hbm [shape: bf16[240,256], index: 1, kind: input, shape index: {}]   ;;  %s5611_s2 = inlined_call_operand.vmem [shape: f32[8,256], index: 2, kind: input, shape index: {}]   ;;  %s5612_s3 = inlined_call_operand.hbm [shape: f32[2,128], index: 3, kind: output, shape index: {}]  }
   0x1   :  { %9 = vsyncpa [#allocation4], 0  ;;  %s4697_s12 = smov [#allocation2]   ;;  %s4649_s16 = scalar_lea.hbm %s5610_s1, 3840 }
   0x2   :  { %s17_s13 = sshll.u32 %s4697_s12, 4  ;;  %p4650_p0 = scmp.ne.s32.totalorder %s5610_s1, %s4649_s16  ;;  %s18_s13 = int_to_ptr.vmem [resolvable:$true] %s17_s13 }
   0x3   :  { %p4653_p1 = scmp.lt.u32.totalorder %s4649_s16, %s5610_s1 }
   0x5   :  { %p4655_p2 = pnand %p4653_p1, %p4650_p0 }
   0x7   :  { %4658 = shalt.err (!%p4655_p2)
}
   0x8   :  { %s4659_s21 = scalar_lea.vmem %s18_s13, 3840  ;;  %p4664_p4 = scmp.lt.s32.totalorder %s18_s13, %s18_s13 }
   0x9   :  { %p4660_p3 = scmp.ne.s32.totalorder %s18_s13, %s4659_s21  ;;  %p4665_p5 = scmp.lt.s32.totalorder %s4659_s21, %s4659_s21 }
   0xb   :  { %p4666_p6 = por %p4665_p5, %p4664_p4 }
   0xd   :  { %p4667_p7 = pnand %p4666_p6, %p4660_p3 }
   0xf   :  { %4670 = shalt.err (!%p4667_p7)
}
  0x10   :  { %s4698_s22 = smov 128   ;;  %s4699_s23 = smov 8  }
  0x11   :  { %23 = dma.hbm_to_vmem [thread:$0]  %s5610_s1, 3840, %s18_s13, [#allocation3], %s4698_s22, %s4698_s22, %s4699_s23  }
  0x12   :  { %4693 = dma.done.wait [#allocation3], 3840  }
  0x13   :  { %4694 = vsyncadd [#allocation3], 4294963456  ;;  %v4700_v0 = vmov 0.0   ;;  %vm4701_vm0 = vmmov 0   ;;  %vm89_vm1 = vcmask 1043456   ;;  %v30_v1 = vld [vmem:[#allocation2] sm:$0xff]  ;;  %v66_v23 = vlaneseq }
  0x14   :  { %3941 = vmatprep.subr.bf16.mxu0 %v4700_v0  ;;  %3947 = vmatprep.subr.bf16.mxu1 %v4700_v0  ;;  %v91_v2 = vsel %vm89_vm1, %v30_v1, 0  ;;  %v4751_v3 = vld [vmem:[#allocation2 + $0x8] ss:$8 sps:$4 sm:$0xff]   ;;  %v81_v4 = vld [vmem:[%s5609_s0] sm:$0xff]  ;;  %vm85_vm2 = vcmask 64512   ;;  %v4702_v8 = vmov 0  }
  0x15   :  { %3943 = vmatprep.mubr.msk.bf16.mxu0 %vm4701_vm0, %v4700_v0  ;;  %3951 = vmatprep.mubr.msk.bf16.mxu1 %vm4701_vm0, %v4700_v0  ;;  %v82_v5 = vld [vmem:[%s5609_s0 + $0x8] sm:$0xff]  ;;  %v4760_v7 = vld [vmem:[#allocation2 + $0x18] ss:$8 sps:$4 sm:$0xff]   ;;  %v77_v25 = vand.u32 127, %v66_v23  ;;  %s4703_s4 = smov 64   ;;  %s4704_s5 = smov 32  }
  0x16   :  { %3942 = vmatpush3.bf16.msra.mxu0 %v91_v2  ;;  %3948 = vmatpush3.bf16.msra.mxu1 %v4751_v3  ;;  %v83_v6 = vpack.c.bf16 %v82_v5, %v81_v4  ;;  %v84_v9 = vld [vmem:[%s5611_s2] ss:$0 sm:$0xff]  ;;  %v4792_v35 = vld [vmem:[#allocation2 + $0x28] ss:$8 sps:$4 sm:$0xff]   ;;  %vm146_vm6 = vcmask 261120   ;;  %s4706_s19 = smov 40  }
  0x17   :  { %3955 = vmatprep.subr.bf16.mxu0 %v4700_v0  ;;  %3949 = vmatprep.subr.bf16.mxu1 %v4700_v0  ;;  %vm78_vm3 = vcmp.ge.s32.totalorder %v77_v25, 64  ;;  %vm79_vm4 = vcmp.lt.s32.totalorder %v77_v25, 96  ;;  %v4794_v36 = vld [vmem:[#allocation2 + $0x48] ss:$8 sps:$4 sm:$0xff]   ;;  %v4797_v37 = vld [vmem:[#allocation2 + $0x38] ss:$8 sps:$4 sm:$0xff]  }
  0x18   :  { %vm4781_vm5 = vmand %vm78_vm3, %vm79_vm4  ;;  %v4800_v38 = vld [vmem:[#allocation2 + $0x58] ss:$8 sps:$4 sm:$0xff]   ;;  %s4707_s20 = smov 16   ;;  %s4708_s21 = smov 48   ;;  %vm3659_vm7 = vcmask 130048   ;;  %vm3661_vm8 = vcmask 195584  }
  0x19   :  { %3944 = vmatmul.mubr.msk.bf16.vlgmr.msra.gmra.mrb[0].mxu0 %vm85_vm2, %v83_v6  ;;  %v4834_v48 = vld [vmem:[%s5611_s2 + $0x1] ss:$0 sm:$0xff]  ;;  %s4709_s22 = smov 56   ;;  %vm3664_vm9 = vcmask 326656   ;;  %vm3666_vm10 = vcmask 392192   ;;  %vm3668_vm11 = vcmask 457728  }
  0x1a   :  { %3959 = vmatprep.mubr.msk.bf16.mxu0 %vm4701_vm0, %v4700_v0  ;;  %3950 = vmatpush3.bf16.msra.mxu1 %v4760_v7  ;;  %vm3670_vm12 = vcmask 523264  }
  0x1b   :  { %3963 = vmatprep.subr.bf16.mxu1 %v4700_v0  ;;  %3956 = vmatpush3.bf16.msra.mxu0 %v4792_v35 }
  0x1c   :  { %3957 = vmatprep.subr.bf16.mxu0 %v4700_v0 }
  0x1d   :  { %3952 = vmatmul.mubr.bf16.vlgmr.msra.gmra.mrb[0].mxu1 %v4702_v8 }
  0x1e   :  { %3967 = vmatprep.mubr.msk.bf16.mxu1 %vm4701_vm0, %v4700_v0  ;;  %3964 = vmatpush3.bf16.msra.mxu1 %v4794_v36 }
  0x1f   :  { %3965 = vmatprep.subr.bf16.mxu1 %v4700_v0  ;;  %3958 = vmatpush3.bf16.msra.mxu0 %v4797_v37 }
  0x20   :  { %3971 = vmatprep.subr.bf16.mxu0 %v4700_v0 }
  0x22   :  { %3966 = vmatpush3.bf16.msra.mxu1 %v4800_v38  ;;  %3960 = vmatmul.mubr.bf16.vlgmr.msra.gmra.mrb[4].mxu0 %v4702_v8 }
  0x23   :  { %3979 = vmatprep.subr.bf16.mxu1 %v4700_v0  ;;  %3972 = vmatpush3.bf16.msra.mxu0 %v4751_v3 }
  0x24   :  { %3975 = vmatprep.mubr.msk.bf16.mxu0 %vm4701_vm0, %v4700_v0  ;;  %3973 = vmatprep.subr.bf16.mxu0 %v4700_v0 }
  0x27   :  { %3974 = vmatpush3.bf16.msra.mxu0 %v4760_v7 }
  0x28   :  { %3987 = vmatprep.subr.bf16.mxu0 %v4700_v0 }
  0xec   :  { %v127_v10 = vpop.f32.mrb[0].mxu0 }
  0xed   :  { %v3945_v11 = vpop.f32.mrb[1].mxu0  ;;  %v4775_v12 = vadd.f32 %v127_v10, %v84_v9 }
  0xee   :  { %v130_v13 = vpop.f32.mrb[2].mxu0 }
  0xef   :  { %v4777_v14 = vadd.f32 %v130_v13, %v84_v9  ;;  %v3946_v15 = vpop.f32.mrb[3].mxu0 }
  0xf0   :  { %v184_v16 = vpop.f32.mrb[0].mxu1 }
  0xf1   :  { %v190_v17 = vadd.f32 %v184_v16, %v4775_v12  ;;  %v3953_v18 = vpop.f32.mrb[1].mxu1 }
  0xf2   :  { %v187_v19 = vpop.f32.mrb[2].mxu1 }
  0xf3   :  { %v3692_v20 = vmul.f32 -1.442695, %v190_v17  ;;  %v3954_v21 = vpop.f32.mrb[3].mxu1 }
  0xf5   :  { %4374 = vpow2.f32 %v3692_v20  ;;  %v263_v43 = vpop.f32.mrb[4].mxu0 }
  0xf6   :  { %4376 = vtanh.f32 %v190_v17  ;;  %v3961_v44 = vpop.f32.mrb[5].mxu0 }
  0xf7   :  { %v266_v45 = vpop.f32.mrb[6].mxu0 }
  0xf8   :  { %v3962_v46 = vpop.f32.mrb[7].mxu0 }
  0xff   :  { %v4375_v22 = vpop.eup %4374 }
 0x100   :  { %v195_v24 = vadd.f32 1.0, %v4375_v22  ;;  %v4377_v27 = vpop.eup %4376 }
 0x102   :  { %4378 = vrcp.f32 %v195_v24 }
 0x10c   :  { %v4379_v28 = vpop.eup %4378 }
 0x10d   :  { %v198_v29 = vsel %vm4781_vm5, %v4377_v27, %v4379_v28 }
 0x10e   :  { %201 = vrot.lane.b32.xlu0 %v198_v29, %s4703_s4  ;;  %v199_v32 = vmul.f32 0.0, %v198_v29 }
 0x180   :  { %v202_v30 = vpop.permute.xlu0 %201 }
 0x181   :  { %v204_v31 = vmul.f32 %v202_v30, %v198_v29 }
 0x183   :  { %206 = vrot.lane.b32.xlu0 %v204_v31, %s4704_s5 }
 0x1f5   :  { %v207_v33 = vpop.permute.xlu0 %206 }
 0x1f6   :  { %v4789_v34 = vadd.f32 %v207_v33, %v199_v32 }
 0x1f8   :  { %4380 = vtanh.f32 %v4789_v34  ;;  %v406_v19 = vrot.slane %v4789_v34, 6 }
 0x202   :  { %v4381_v39 = vpop.eup %4380 }
 0x203   :  { %212 = vrot.lane.b32.xlu1 %v4381_v39, %s4703_s4 }
 0x275   :  { %v213_v40 = vpop.permute.xlu1 %212 }
 0x276   :  { %v215_v41 = vmul.f32 %v213_v40, %v198_v29 }
 0x278   :  { %v216_v42 = vpack.c.bf16 %v215_v41, %v215_v41 }
 0x27a   :  { %270 = vrot.lane.b32.xlu1 %v216_v42, %s4704_s5 }
 0x2ec   :  { %v271_v47 = vpop.permute.xlu1 %270 }
 0x2ed   :  { %3968 = vmatmul.mubr.msk.bf16.vlgmr.msra.gmra.mrb[4].mxu1 %vm146_vm6, %v271_v47  ;;  %3976 = vmatmul.mubr.msk.bf16.vlgmr.msra.gmra.mrb[8].mxu0 %vm146_vm6, %v271_v47 }
 0x2ee   :  { %3980 = vmatpush3.bf16.msra.mxu1 %v4792_v35  ;;  %3988 = vmatpush3.bf16.msra.mxu0 %v4794_v36 }
 0x2ef   :  { %3981 = vmatprep.subr.bf16.mxu1 %v4700_v0  ;;  %3989 = vmatprep.subr.bf16.mxu0 %v4700_v0 }
 0x2f0   :  { %3983 = vmatprep.mubr.msk.bf16.mxu1 %vm4701_vm0, %v4700_v0  ;;  %3991 = vmatprep.mubr.msk.bf16.mxu0 %vm4701_vm0, %v4700_v0 }
 0x2f2   :  { %3982 = vmatpush3.bf16.msra.mxu1 %v4797_v37  ;;  %3990 = vmatpush3.bf16.msra.mxu0 %v4800_v38 }
 0x2f3   :  { %3995 = vmatprep.subr.bf16.mxu1 %v4700_v0  ;;  %4003 = vmatprep.subr.bf16.mxu0 %v4700_v0 }
 0x3c0   :  { %v321_v49 = vpop.f32.mrb[4].mxu1  ;;  %v387_v50 = vpop.f32.mrb[8].mxu0 }
 0x3c1   :  { %v322_v51 = vadd.f32 %v321_v49, %v263_v43  ;;  %v394_v52 = vrot.slane %v387_v50, 6  ;;  %v3969_v53 = vpop.f32.mrb[5].mxu1  ;;  %v3977_v54 = vpop.f32.mrb[9].mxu0 }
 0x3c2   :  { %v324_v55 = vpop.f32.mrb[6].mxu1  ;;  %v390_v56 = vpop.f32.mrb[10].mxu0 }
 0x3c3   :  { %v327_v57 = vadd.f32 %v322_v51, %v4834_v48  ;;  %v396_v58 = vadd.f32 %v394_v52, %v4775_v12  ;;  %v3970_v59 = vpop.f32.mrb[7].mxu1  ;;  %v3978_v60 = vpop.f32.mrb[11].mxu0 }
 0x3c5   :  { %v3698_v61 = vmul.f32 -1.442695, %v327_v57  ;;  %v3700_v62 = vmul.f32 -1.442695, %v396_v58 }
 0x3c7   :  { %4382 = vpow2.f32 %v3698_v61 }
 0x3c8   :  { %4384 = vpow2.f32 %v3700_v62 }
 0x3c9   :  { %4386 = vtanh.f32 %v327_v57 }
 0x3ca   :  { %4388 = vtanh.f32 %v396_v58 }
 0x3d1   :  { %v4383_v63 = vpop.eup %4382 }
 0x3d2   :  { %v4385_v1 = vpop.eup %4384  ;;  %v332_v2 = vadd.f32 1.0, %v4383_v63 }
 0x3d3   :  { %v401_v4 = vadd.f32 1.0, %v4385_v1  ;;  %v4387_v5 = vpop.eup %4386 }
 0x3d4   :  { %4390 = vrcp.f32 %v332_v2  ;;  %v4389_v6 = vpop.eup %4388 }
 0x3d5   :  { %4392 = vrcp.f32 %v401_v4 }
 0x3de   :  { %v4391_v9 = vpop.eup %4390 }
 0x3df   :  { %v4393_v10 = vpop.eup %4392  ;;  %v335_v11 = vsel %vm4781_vm5, %v4387_v5, %v4391_v9 }
 0x3e0   :  { %338 = vrot.lane.b32.xlu0 %v335_v11, %s4703_s4  ;;  %v404_v13 = vsel %vm4781_vm5, %v4389_v6, %v4393_v10  ;;  %v336_v20 = vmul.f32 0.0, %v335_v11 }
 0x3e1   :  { %410 = vrot.lane.b32.xlu1 %v404_v13, %s4703_s4  ;;  %v408_v22 = vmul.f32 %v406_v19, %v404_v13 }
 0x452   :  { %v339_v15 = vpop.permute.xlu0 %338 }
 0x453   :  { %v341_v16 = vmul.f32 %v339_v15, %v335_v11  ;;  %v411_v17 = vpop.permute.xlu1 %410 }
 0x454   :  { %v413_v18 = vmul.f32 %v411_v17, %v404_v13 }
 0x455   :  { %343 = vrot.lane.b32.xlu0 %v341_v16, %s4704_s5 }
 0x456   :  { %415 = vrot.lane.b32.xlu1 %v413_v18, %s4704_s5 }
 0x4c7   :  { %v344_v21 = vpop.permute.xlu0 %343 }
 0x4c8   :  { %v4847_v24 = vadd.f32 %v344_v21, %v336_v20  ;;  %v416_v25 = vpop.permute.xlu1 %415 }
 0x4c9   :  { %v4849_v27 = vadd.f32 %v416_v25, %v408_v22 }
 0x4ca   :  { %4394 = vtanh.f32 %v4847_v24 }
 0x4cb   :  { %4396 = vtanh.f32 %v4849_v27  ;;  %v599_v21 = vrot.slane %v4849_v27, 6 }
 0x4d4   :  { %v4395_v28 = vpop.eup %4394 }
 0x4d5   :  { %v4397_v29 = vpop.eup %4396  ;;  %349 = vrot.lane.b32.xlu0 %v4395_v28, %s4703_s4 }
 0x4d6   :  { %421 = vrot.lane.b32.xlu1 %v4397_v29, %s4703_s4 }
 0x547   :  { %v350_v30 = vpop.permute.xlu0 %349 }
 0x548   :  { %v352_v31 = vmul.f32 %v350_v30, %v335_v11  ;;  %v422_v32 = vpop.permute.xlu1 %421 }
 0x549   :  { %v424_v33 = vmul.f32 %v422_v32, %v404_v13 }
 0x54a   :  { %v426_v34 = vpack.c.bf16 %v352_v31, %v352_v31 }
 0x54b   :  { %v425_v39 = vpack.c.bf16 %v424_v33, %v424_v33 }
 0x54c   :  { %428 = vrot.lane.b32.xlu0 %v426_v34, %s4704_s5 }
 0x54d   :  { %v474_v40 = vrot.slane %v425_v39, 1 }
 0x54f   :  { %475 = vrot.lane.b32.xlu1 %v474_v40, %s4704_s5 }
 0x5be   :  { %v429_v41 = vpop.permute.xlu0 %428 }
 0x5bf   :  { %3984 = vmatmul.mubr.msk.bf16.vlgmr.msra.gmra.mrb[8].mxu1 %vm146_vm6, %v429_v41 }
 0x5c0   :  { %3996 = vmatpush3.bf16.msra.mxu1 %v4751_v3  ;;  %3999 = vmatprep.mubr.msk.bf16.mxu1 %vm4701_vm0, %v4700_v0 }
 0x5c1   :  { %v476_v42 = vpop.permute.xlu1 %475  ;;  %3997 = vmatprep.subr.bf16.mxu1 %v4700_v0 }
 0x5c2   :  { %3992 = vmatmul.mubr.msk.bf16.vlgmr.msra.gmra.mrb[12].mxu0 %vm146_vm6, %v476_v42 }
 0x5c3   :  { %4004 = vmatpush3.bf16.msra.mxu0 %v4792_v35  ;;  %4007 = vmatprep.mubr.msk.bf16.mxu0 %vm4701_vm0, %v4700_v0 }
 0x5c4   :  { %3998 = vmatpush3.bf16.msra.mxu1 %v4760_v7  ;;  %4005 = vmatprep.subr.bf16.mxu0 %v4700_v0 }
 0x5c5   :  { %4011 = vmatprep.subr.bf16.mxu1 %v4700_v0 }
 0x5c7   :  { %4000 = vmatmul.mubr.msk.bf16.vlgmr.msra.gmra.mrb[12].mxu1 %vm146_vm6, %v476_v42  ;;  %4006 = vmatpush3.bf16.msra.mxu0 %v4797_v37 }
 0x5c8   :  { %4012 = vmatpush3.bf16.msra.mxu1 %v4794_v36  ;;  %4019 = vmatprep.subr.bf16.mxu0 %v4700_v0 }
 0x5c9   :  { %4013 = vmatprep.subr.bf16.mxu1 %v4700_v0  ;;  %4015 = vmatprep.mubr.msk.bf16.mxu1 %vm4701_vm0, %v4700_v0 }
 0x5cc   :  { %4014 = vmatpush3.bf16.msra.mxu1 %v4800_v38 }
 0x5cd   :  { %4027 = vmatprep.subr.bf16.mxu1 %v4700_v0 }
 0x692   :  { %v467_v43 = vpop.f32.mrb[8].mxu1 }
 0x693   :  { %v3985_v44 = vpop.f32.mrb[9].mxu1 }
 0x694   :  { %v470_v45 = vpop.f32.mrb[10].mxu1 }
 0x695   :  { %v514_v46 = vpop.f32.mrb[12].mxu0  ;;  %v3986_v47 = vpop.f32.mrb[11].mxu1 }
 0x696   :  { %v515_v49 = vadd.f32 %v514_v46, %v467_v43  ;;  %v3993_v50 = vpop.f32.mrb[13].mxu0 }
 0x697   :  { %v517_v51 = vpop.f32.mrb[14].mxu0 }
 0x698   :  { %v520_v52 = vadd.f32 %v515_v49, %v4834_v48  ;;  %v3994_v53 = vpop.f32.mrb[15].mxu0 }
 0x69a   :  { %v3703_v54 = vmul.f32 -1.442695, %v520_v52  ;;  %v580_v55 = vpop.f32.mrb[12].mxu1 }
 0x69b   :  { %v587_v56 = vrot.slane %v580_v55, 4  ;;  %v4001_v57 = vpop.f32.mrb[13].mxu1 }
 0x69c   :  { %4398 = vpow2.f32 %v3703_v54  ;;  %v583_v58 = vpop.f32.mrb[14].mxu1 }
 0x69d   :  { %v589_v59 = vadd.f32 %v587_v56, %v4775_v12  ;;  %v4002_v60 = vpop.f32.mrb[15].mxu1 }
 0x69f   :  { %v3705_v61 = vmul.f32 -1.442695, %v589_v59 }
 0x6a1   :  { %4400 = vpow2.f32 %v3705_v61 }
 0x6a2   :  { %4402 = vtanh.f32 %v520_v52 }
 0x6a6   :  { %v4399_v62 = vpop.eup %4398 }
 0x6a7   :  { %v525_v63 = vadd.f32 1.0, %v4399_v62 }
 0x6a9   :  { %4404 = vrcp.f32 %v525_v63 }
 0x6aa   :  { %4406 = vtanh.f32 %v589_v59 }
 0x6ab   :  { %v4401_v1 = vpop.eup %4400 }
 0x6ac   :  { %v594_v2 = vadd.f32 1.0, %v4401_v1  ;;  %v4403_v4 = vpop.eup %4402 }
 0x6ae   :  { %4408 = vrcp.f32 %v594_v2 }
 0x6b3   :  { %v4405_v5 = vpop.eup %4404 }
 0x6b4   :  { %v528_v6 = vsel %vm4781_vm5, %v4403_v4, %v4405_v5  ;;  %v4407_v9 = vpop.eup %4406 }
 0x6b5   :  { %531 = vrot.lane.b32.xlu0 %v528_v6, %s4703_s4  ;;  %v529_v18 = vmul.f32 %v528_v6, %v4847_v24 }
 0x6b8   :  { %v4409_v10 = vpop.eup %4408 }
 0x6b9   :  { %v597_v11 = vsel %vm4781_vm5, %v4407_v9, %v4409_v10 }
 0x6ba   :  { %603 = vrot.lane.b32.xlu1 %v597_v11, %s4703_s4  ;;  %v601_v22 = vmul.f32 %v599_v21, %v597_v11 }
 0x727   :  { %v532_v13 = vpop.permute.xlu0 %531 }
 0x728   :  { %v534_v15 = vmul.f32 %v532_v13, %v528_v6 }
 0x72a   :  { %536 = vrot.lane.b32.xlu0 %v534_v15, %s4704_s5 }
 0x72c   :  { %v604_v16 = vpop.permute.xlu1 %603 }
 0x72d   :  { %v606_v17 = vmul.f32 %v604_v16, %v597_v11 }
 0x72f   :  { %608 = vrot.lane.b32.xlu1 %v606_v17, %s4704_s5 }
 0x79c   :  { %v537_v19 = vpop.permute.xlu0 %536 }
 0x79d   :  { %v4889_v20 = vadd.f32 %v537_v19, %v529_v18 }
 0x79f   :  { %4410 = vtanh.f32 %v4889_v20 }
 0x7a1   :  { %v609_v25 = vpop.permute.xlu1 %608 }
 0x7a2   :  { %v4893_v28 = vadd.f32 %v609_v25, %v601_v22 }
 0x7a4   :  { %4412 = vtanh.f32 %v4893_v28  ;;  %v792_v16 = vrot.slane %v4893_v28, 6 }
 0x7a9   :  { %v4411_v29 = vpop.eup %4410 }
 0x7aa   :  { %542 = vrot.lane.b32.xlu0 %v4411_v29, %s4703_s4 }
 0x7ae   :  { %v4413_v30 = vpop.eup %4412 }
 0x7af   :  { %614 = vrot.lane.b32.xlu1 %v4413_v30, %s4703_s4 }
 0x81c   :  { %v543_v24 = vpop.permute.xlu0 %542 }
 0x81d   :  { %v545_v31 = vmul.f32 %v543_v24, %v528_v6 }
 0x81f   :  { %v619_v32 = vpack.c.bf16 %v545_v31, %v545_v31 }
 0x821   :  { %621 = vrot.lane.b32.xlu0 %v619_v32, %s4704_s5  ;;  %v615_v27 = vpop.permute.xlu1 %614 }
 0x822   :  { %v617_v33 = vmul.f32 %v615_v27, %v597_v11 }
 0x824   :  { %v618_v34 = vpack.c.bf16 %v617_v33, %v617_v33 }
 0x826   :  { %v667_v39 = vrot.slane %v618_v34, 2 }
 0x828   :  { %668 = vrot.lane.b32.xlu1 %v667_v39, %s4704_s5 }
 0x893   :  { %v622_v40 = vpop.permute.xlu0 %621 }
 0x894   :  { %4008 = vmatmul.mubr.msk.bf16.vlgmr.msra.gmra.mrb[16].mxu0 %vm146_vm6, %v622_v40 }
 0x895   :  { %4020 = vmatpush3.bf16.msra.mxu0 %v4751_v3  ;;  %4023 = vmatprep.mubr.msk.bf16.mxu0 %vm4701_vm0, %v4700_v0 }
 0x896   :  { %4021 = vmatprep.subr.bf16.mxu0 %v4700_v0 }
 0x899   :  { %4022 = vmatpush3.bf16.msra.mxu0 %v4760_v7 }
 0x89a   :  { %v669_v41 = vpop.permute.xlu1 %668  ;;  %4035 = vmatprep.subr.bf16.mxu0 %v4700_v0 }
 0x89b   :  { %4016 = vmatmul.mubr.msk.bf16.vlgmr.msra.gmra.mrb[16].mxu1 %vm146_vm6, %v669_v41 }
 0x89c   :  { %4024 = vmatmul.mubr.msk.bf16.vlgmr.msra.gmra.mrb[20].mxu0 %vm146_vm6, %v669_v41  ;;  %4028 = vmatpush3.bf16.msra.mxu1 %v4792_v35 }
 0x89d   :  { %4029 = vmatprep.subr.bf16.mxu1 %v4700_v0  ;;  %4036 = vmatpush3.bf16.msra.mxu0 %v4794_v36 }
 0x89e   :  { %4037 = vmatprep.subr.bf16.mxu0 %v4700_v0  ;;  %4031 = vmatprep.mubr.msk.bf16.mxu1 %vm4701_vm0, %v4700_v0 }
 0x89f   :  { %4039 = vmatprep.mubr.msk.bf16.mxu0 %vm4701_vm0, %v4700_v0 }
 0x8a0   :  { %4030 = vmatpush3.bf16.msra.mxu1 %v4797_v37 }
 0x8a1   :  { %4038 = vmatpush3.bf16.msra.mxu0 %v4800_v38  ;;  %4043 = vmatprep.subr.bf16.mxu1 %v4700_v0 }
 0x8a2   :  { %4051 = vmatprep.subr.bf16.mxu0 %v4700_v0 }
 0x967   :  { %v660_v42 = vpop.f32.mrb[16].mxu0 }
 0x968   :  { %v4009_v43 = vpop.f32.mrb[17].mxu0 }
 0x969   :  { %v663_v44 = vpop.f32.mrb[18].mxu0 }
 0x96a   :  { %v4010_v45 = vpop.f32.mrb[19].mxu0 }
 0x96e   :  { %v707_v46 = vpop.f32.mrb[16].mxu1 }
 0x96f   :  { %v708_v47 = vadd.f32 %v707_v46, %v660_v42  ;;  %v773_v49 = vpop.f32.mrb[20].mxu0  ;;  %v4017_v50 = vpop.f32.mrb[17].mxu1 }
 0x970   :  { %v780_v51 = vrot.slane %v773_v49, 2  ;;  %v4025_v52 = vpop.f32.mrb[21].mxu0  ;;  %v710_v53 = vpop.f32.mrb[18].mxu1 }
 0x971   :  { %v713_v54 = vadd.f32 %v708_v47, %v4834_v48  ;;  %v776_v55 = vpop.f32.mrb[22].mxu0  ;;  %v4018_v56 = vpop.f32.mrb[19].mxu1 }
 0x972   :  { %v782_v57 = vadd.f32 %v780_v51, %v4775_v12  ;;  %v4026_v58 = vpop.f32.mrb[23].mxu0 }
 0x973   :  { %v3708_v59 = vmul.f32 -1.442695, %v713_v54 }
 0x974   :  { %v3710_v60 = vmul.f32 -1.442695, %v782_v57 }
 0x975   :  { %4414 = vpow2.f32 %v3708_v59 }
 0x976   :  { %4416 = vpow2.f32 %v3710_v60 }
 0x977   :  { %4418 = vtanh.f32 %v713_v54 }
 0x978   :  { %4420 = vtanh.f32 %v782_v57 }
 0x97f   :  { %v4415_v61 = vpop.eup %4414 }
 0x980   :  { %v4417_v62 = vpop.eup %4416  ;;  %v718_v63 = vadd.f32 1.0, %v4415_v61 }
 0x981   :  { %v787_v1 = vadd.f32 1.0, %v4417_v62  ;;  %v4419_v2 = vpop.eup %4418 }
 0x982   :  { %4422 = vrcp.f32 %v718_v63  ;;  %v4421_v4 = vpop.eup %4420 }
 0x983   :  { %4424 = vrcp.f32 %v787_v1 }
 0x98c   :  { %v4423_v5 = vpop.eup %4422 }
 0x98d   :  { %v4425_v6 = vpop.eup %4424  ;;  %v721_v12 = vsel %vm4781_vm5, %v4419_v2, %v4423_v5 }
 0x98e   :  { %724 = vrot.lane.b32.xlu0 %v721_v12, %s4703_s4  ;;  %v790_v9 = vsel %vm4781_vm5, %v4421_v4, %v4425_v6  ;;  %v722_v17 = vmul.f32 %v721_v12, %v4889_v20 }
 0x98f   :  { %796 = vrot.lane.b32.xlu1 %v790_v9, %s4703_s4  ;;  %v794_v19 = vmul.f32 %v792_v16, %v790_v9 }
 0xa00   :  { %v725_v10 = vpop.permute.xlu0 %724 }
 0xa01   :  { %v727_v11 = vmul.f32 %v725_v10, %v721_v12  ;;  %v797_v13 = vpop.permute.xlu1 %796 }
 0xa02   :  { %v799_v15 = vmul.f32 %v797_v13, %v790_v9 }
 0xa03   :  { %729 = vrot.lane.b32.xlu0 %v727_v11, %s4704_s5 }
 0xa04   :  { %801 = vrot.lane.b32.xlu1 %v799_v15, %s4704_s5 }
 0xa75   :  { %v730_v18 = vpop.permute.xlu0 %729 }
 0xa76   :  { %v4933_v21 = vadd.f32 %v730_v18, %v722_v17  ;;  %v802_v22 = vpop.permute.xlu1 %801 }
 0xa77   :  { %v4935_v25 = vadd.f32 %v802_v22, %v794_v19 }
 0xa78   :  { %4426 = vtanh.f32 %v4933_v21 }
 0xa79   :  { %4428 = vtanh.f32 %v4935_v25  ;;  %v982_v13 = vrot.slane %v4935_v25, 6 }
 0xa82   :  { %v4427_v29 = vpop.eup %4426 }
 0xa83   :  { %v4429_v30 = vpop.eup %4428  ;;  %735 = vrot.lane.b32.xlu0 %v4427_v29, %s4703_s4 }
 0xa84   :  { %807 = vrot.lane.b32.xlu1 %v4429_v30, %s4703_s4 }
 0xaf5   :  { %v736_v28 = vpop.permute.xlu0 %735 }
 0xaf6   :  { %v738_v24 = vmul.f32 %v736_v28, %v721_v12  ;;  %v808_v20 = vpop.permute.xlu1 %807 }
 0xaf7   :  { %v810_v31 = vmul.f32 %v808_v20, %v790_v9 }
 0xaf8   :  { %v812_v32 = vpack.c.bf16 %v738_v24, %v738_v24 }
 0xaf9   :  { %v811_v27 = vpack.c.bf16 %v810_v31, %v810_v31 }
 0xafa   :  { %814 = vrot.lane.b32.xlu0 %v812_v32, %s4704_s5 }
 0xafb   :  { %v860_v33 = vrot.slane %v811_v27, 3 }
 0xafd   :  { %861 = vrot.lane.b32.xlu1 %v860_v33, %s4704_s5 }
 0xb6c   :  { %v815_v34 = vpop.permute.xlu0 %814 }
 0xb6d   :  { %4032 = vmatmul.mubr.msk.bf16.vlgmr.msra.gmra.mrb[20].mxu1 %vm146_vm6, %v815_v34 }
 0xb6e   :  { %4044 = vmatpush3.bf16.msra.mxu1 %v4751_v3  ;;  %4047 = vmatprep.mubr.msk.bf16.mxu1 %vm4701_vm0, %v4700_v0 }
 0xb6f   :  { %v862_v39 = vpop.permute.xlu1 %861  ;;  %4045 = vmatprep.subr.bf16.mxu1 %v4700_v0 }
 0xb70   :  { %4040 = vmatmul.mubr.msk.bf16.vlgmr.msra.gmra.mrb[24].mxu0 %vm146_vm6, %v862_v39 }
 0xb71   :  { %4052 = vmatpush3.bf16.msra.mxu0 %v4792_v35  ;;  %4055 = vmatprep.mubr.msk.bf16.mxu0 %vm4701_vm0, %v4700_v0 }
 0xb72   :  { %4046 = vmatpush3.bf16.msra.mxu1 %v4760_v7  ;;  %4053 = vmatprep.subr.bf16.mxu0 %v4700_v0 }
 0xb73   :  { %4059 = vmatprep.subr.bf16.mxu1 %v4700_v0 }
 0xb75   :  { %4048 = vmatmul.mubr.msk.bf16.vlgmr.msra.gmra.mrb[24].mxu1 %vm146_vm6, %v862_v39  ;;  %4054 = vmatpush3.bf16.msra.mxu0 %v4797_v37 }
 0xb76   :  { %4060 = vmatpush3.bf16.msra.mxu1 %v4794_v36  ;;  %4067 = vmatprep.subr.bf16.mxu0 %v4700_v0 }
 0xb77   :  { %4061 = vmatprep.subr.bf16.mxu1 %v4700_v0  ;;  %4063 = vmatprep.mubr.msk.bf16.mxu1 %vm4701_vm0, %v4700_v0 }
 0xb7a   :  { %4062 = vmatpush3.bf16.msra.mxu1 %v4800_v38 }
 0xb7b   :  { %4075 = vmatprep.subr.bf16.mxu1 %v4700_v0 }
 0xc40   :  { %v853_v40 = vpop.f32.mrb[20].mxu1 }
 0xc41   :  { %v4033_v41 = vpop.f32.mrb[21].mxu1 }
 0xc42   :  { %v856_v42 = vpop.f32.mrb[22].mxu1 }
 0xc43   :  { %v900_v43 = vpop.f32.mrb[24].mxu0  ;;  %v4034_v44 = vpop.f32.mrb[23].mxu1 }
 0xc44   :  { %v901_v45 = vadd.f32 %v900_v43, %v853_v40  ;;  %v4041_v46 = vpop.f32.mrb[25].mxu0 }
 0xc45   :  { %v903_v47 = vpop.f32.mrb[26].mxu0 }
 0xc46   :  { %v906_v49 = vadd.f32 %v901_v45, %v4834_v48  ;;  %v4042_v50 = vpop.f32.mrb[27].mxu0 }
 0xc48   :  { %v3713_v51 = vmul.f32 -1.442695, %v906_v49  ;;  %v966_v52 = vpop.f32.mrb[24].mxu1 }
 0xc49   :  { %v972_v53 = vadd.f32 %v966_v52, %v4777_v14  ;;  %v4049_v54 = vpop.f32.mrb[25].mxu1 }
 0xc4a   :  { %4430 = vpow2.f32 %v3713_v51  ;;  %v969_v55 = vpop.f32.mrb[26].mxu1 }
 0xc4b   :  { %v3715_v56 = vmul.f32 -1.442695, %v972_v53  ;;  %v4050_v57 = vpop.f32.mrb[27].mxu1 }
 0xc4d   :  { %4432 = vpow2.f32 %v3715_v56 }
 0xc4e   :  { %4434 = vtanh.f32 %v906_v49 }
 0xc54   :  { %v4431_v58 = vpop.eup %4430 }
 0xc55   :  { %v911_v59 = vadd.f32 1.0, %v4431_v58 }
 0xc57   :  { %v4433_v60 = vpop.eup %4432  ;;  %4436 = vrcp.f32 %v911_v59 }
 0xc58   :  { %v977_v61 = vadd.f32 1.0, %v4433_v60  ;;  %4438 = vtanh.f32 %v972_v53  ;;  %v4435_v62 = vpop.eup %4434 }
 0xc5a   :  { %4440 = vrcp.f32 %v977_v61 }
 0xc61   :  { %v4437_v63 = vpop.eup %4436 }
 0xc62   :  { %v914_v1 = vsel %vm4781_vm5, %v4435_v62, %v4437_v63  ;;  %v4439_v2 = vpop.eup %4438 }
 0xc63   :  { %917 = vrot.lane.b32.xlu0 %v914_v1, %s4703_s4  ;;  %v915_v11 = vmul.f32 %v914_v1, %v4933_v21 }
 0xc64   :  { %v4441_v4 = vpop.eup %4440 }
 0xc65   :  { %v980_v5 = vsel %vm4781_vm5, %v4439_v2, %v4441_v4 }
 0xc66   :  { %986 = vrot.lane.b32.xlu1 %v980_v5, %s4703_s4  ;;  %v984_v17 = vmul.f32 %v982_v13, %v980_v5 }
 0xcd5   :  { %v918_v6 = vpop.permute.xlu0 %917 }
 0xcd6   :  { %v920_v12 = vmul.f32 %v918_v6, %v914_v1 }
 0xcd8   :  { %922 = vrot.lane.b32.xlu0 %v920_v12, %s4704_s5  ;;  %v987_v9 = vpop.permute.xlu1 %986 }
 0xcd9   :  { %v989_v10 = vmul.f32 %v987_v9, %v980_v5 }
 0xcdb   :  { %991 = vrot.lane.b32.xlu1 %v989_v10, %s4704_s5 }
 0xd4a   :  { %v923_v15 = vpop.permute.xlu0 %922 }
 0xd4b   :  { %v4976_v16 = vadd.f32 %v923_v15, %v915_v11 }
 0xd4d   :  { %4442 = vtanh.f32 %v4976_v16  ;;  %v992_v18 = vpop.permute.xlu1 %991 }
 0xd4e   :  { %v4979_v19 = vadd.f32 %v992_v18, %v984_v17 }
 0xd50   :  { %4444 = vtanh.f32 %v4979_v19  ;;  %v1174_v9 = vrot.slane %v4979_v19, 6 }
 0xd57   :  { %v4443_v22 = vpop.eup %4442 }
 0xd58   :  { %928 = vrot.lane.b32.xlu0 %v4443_v22, %s4703_s4 }
 0xd5a   :  { %v4445_v29 = vpop.eup %4444 }
 0xd5b   :  { %997 = vrot.lane.b32.xlu1 %v4445_v29, %s4703_s4 }
 0xdca   :  { %v929_v21 = vpop.permute.xlu0 %928 }
 0xdcb   :  { %v931_v30 = vmul.f32 %v929_v21, %v914_v1 }
 0xdcd   :  { %v1002_v25 = vpack.c.bf16 %v931_v30, %v931_v30  ;;  %v998_v28 = vpop.permute.xlu1 %997 }
 0xdce   :  { %v1000_v24 = vmul.f32 %v998_v28, %v980_v5  ;;  %v5030_v28 = vld [vmem:[#allocation2 + $0x8] ss:$8 sps:$4 sm:$0xff]  }
 0xdcf   :  { %1004 = vrot.lane.b32.xlu0 %v1002_v25, %s4704_s5 }
 0xdd0   :  { %v1001_v20 = vpack.c.bf16 %v1000_v24, %v1000_v24  ;;  %v5036_v24 = vld [vmem:[#allocation2 + $0x18] ss:$8 sps:$4 sm:$0xff]  }
 0xdd2   :  { %1050 = vrot.lane.b32.xlu1 %v1001_v20, %s4704_s5 }
 0xe41   :  { %v1005_v31 = vpop.permute.xlu0 %1004 }
 0xe42   :  { %4056 = vmatmul.mubr.msk.bf16.vlgmr.msra.gmra.mrb[28].mxu0 %vm146_vm6, %v1005_v31 }
 0xe43   :  { %4068 = vmatpush3.bf16.msra.mxu0 %v4751_v3  ;;  %4071 = vmatprep.mubr.msk.bf16.mxu0 %vm4701_vm0, %v4700_v0 }
 0xe44   :  { %v1051_v32 = vpop.permute.xlu1 %1050  ;;  %4069 = vmatprep.subr.bf16.mxu0 %v4700_v0 }
 0xe45   :  { %4064 = vmatmul.mubr.msk.bf16.vlgmr.msra.gmra.mrb[28].mxu1 %vm146_vm6, %v1051_v32 }
 0xe46   :  { %4076 = vmatpush3.bf16.msra.mxu1 %v4792_v35  ;;  %4079 = vmatprep.mubr.msk.bf16.mxu1 %vm4701_vm0, %v4700_v0 }
 0xe47   :  { %4070 = vmatpush3.bf16.msra.mxu0 %v4760_v7  ;;  %4077 = vmatprep.subr.bf16.mxu1 %v4700_v0 }
 0xe48   :  { %4083 = vmatprep.subr.bf16.mxu0 %v4700_v0 }
 0xe4a   :  { %4072 = vmatmul.mubr.msk.bf16.vlgmr.msra.gmra.mrb[32].mxu0 %vm146_vm6, %v1051_v32  ;;  %4078 = vmatpush3.bf16.msra.mxu1 %v4797_v37 }
 0xe4b   :  { %4084 = vmatpush3.bf16.msra.mxu0 %v4794_v36  ;;  %4091 = vmatprep.subr.bf16.mxu1 %v4700_v0 }
 0xe4c   :  { %4085 = vmatprep.subr.bf16.mxu0 %v4700_v0  ;;  %4087 = vmatprep.mubr.msk.bf16.mxu0 %vm4701_vm0, %v4700_v0 }
 0xe4f   :  { %4086 = vmatpush3.bf16.msra.mxu0 %v4800_v38 }
 0xe50   :  { %4099 = vmatprep.subr.bf16.mxu0 %v4700_v0 }
 0xf15   :  { %v1043_v3 = vpop.f32.mrb[28].mxu0 }
 0xf16   :  { %v4057_v7 = vpop.f32.mrb[29].mxu0 }
 0xf17   :  { %v1046_v27 = vpop.f32.mrb[30].mxu0 }
 0xf18   :  { %v4058_v33 = vpop.f32.mrb[31].mxu0  ;;  %v1089_v34 = vpop.f32.mrb[28].mxu1 }
 0xf19   :  { %v1090_v39 = vadd.f32 %v1089_v34, %v1043_v3  ;;  %v4065_v40 = vpop.f32.mrb[29].mxu1 }
 0xf1a   :  { %v1092_v41 = vpop.f32.mrb[30].mxu1 }
 0xf1b   :  { %v1095_v42 = vadd.f32 %v1090_v39, %v4834_v48  ;;  %v4066_v43 = vpop.f32.mrb[31].mxu1 }
 0xf1d   :  { %v3718_v44 = vmul.f32 -1.442695, %v1095_v42  ;;  %v1155_v45 = vpop.f32.mrb[32].mxu0 }
 0xf1e   :  { %v1162_v46 = vrot.slane %v1155_v45, 6  ;;  %v4073_v47 = vpop.f32.mrb[33].mxu0 }
 0xf1f   :  { %4446 = vpow2.f32 %v3718_v44  ;;  %v1158_v49 = vpop.f32.mrb[34].mxu0 }
 0xf20   :  { %v1164_v50 = vadd.f32 %v1162_v46, %v4777_v14  ;;  %v4074_v51 = vpop.f32.mrb[35].mxu0 }
 0xf22   :  { %v3720_v52 = vmul.f32 -1.442695, %v1164_v50 }
 0xf24   :  { %4448 = vpow2.f32 %v3720_v52 }
 0xf25   :  { %4450 = vtanh.f32 %v1095_v42 }
 0xf29   :  { %v4447_v53 = vpop.eup %4446 }
 0xf2a   :  { %v1100_v54 = vadd.f32 1.0, %v4447_v53 }
 0xf2c   :  { %4452 = vrcp.f32 %v1100_v54 }
 0xf2d   :  { %4454 = vtanh.f32 %v1164_v50 }
 0xf2e   :  { %v4449_v55 = vpop.eup %4448 }
 0xf2f   :  { %v1169_v56 = vadd.f32 1.0, %v4449_v55  ;;  %v4451_v57 = vpop.eup %4450 }
 0xf31   :  { %4456 = vrcp.f32 %v1169_v56 }
 0xf36   :  { %v4453_v58 = vpop.eup %4452 }
 0xf37   :  { %v1103_v59 = vsel %vm4781_vm5, %v4451_v57, %v4453_v58  ;;  %v4455_v60 = vpop.eup %4454 }
 0xf38   :  { %1106 = vrot.lane.b32.xlu0 %v1103_v59, %s4703_s4  ;;  %v1104_v5 = vmul.f32 %v1103_v59, %v4976_v16 }
 0xf3b   :  { %v4457_v61 = vpop.eup %4456 }
 0xf3c   :  { %v1172_v62 = vsel %vm4781_vm5, %v4455_v60, %v4457_v61 }
 0xf3d   :  { %1178 = vrot.lane.b32.xlu1 %v1172_v62, %s4703_s4  ;;  %v1176_v10 = vmul.f32 %v1174_v9, %v1172_v62 }
 0xfaa   :  { %v1107_v63 = vpop.permute.xlu0 %1106 }
 0xfab   :  { %v1109_v1 = vmul.f32 %v1107_v63, %v1103_v59 }
 0xfad   :  { %1111 = vrot.lane.b32.xlu0 %v1109_v1, %s4704_s5 }
 0xfaf   :  { %v1179_v2 = vpop.permute.xlu1 %1178 }
 0xfb0   :  { %v1181_v4 = vmul.f32 %v1179_v2, %v1172_v62 }
 0xfb2   :  { %1183 = vrot.lane.b32.xlu1 %v1181_v4, %s4704_s5 }
0x101f   :  { %v1112_v6 = vpop.permute.xlu0 %1111 }
0x1020   :  { %v5018_v12 = vadd.f32 %v1112_v6, %v1104_v5 }
0x1022   :  { %4458 = vtanh.f32 %v5018_v12 }
0x1024   :  { %v1184_v11 = vpop.permute.xlu1 %1183 }
0x1025   :  { %v5022_v13 = vadd.f32 %v1184_v11, %v1176_v10 }
0x1027   :  { %4460 = vtanh.f32 %v5022_v13  ;;  %v1367_v61 = vrot.slane %v5022_v13, 6 }
0x102c   :  { %v4459_v15 = vpop.eup %4458 }
0x102d   :  { %1117 = vrot.lane.b32.xlu0 %v4459_v15, %s4703_s4 }
0x1031   :  { %v4461_v17 = vpop.eup %4460 }
0x1032   :  { %1189 = vrot.lane.b32.xlu1 %v4461_v17, %s4703_s4 }
0x109f   :  { %v1118_v16 = vpop.permute.xlu0 %1117 }
0x10a0   :  { %v1120_v18 = vmul.f32 %v1118_v16, %v1103_v59 }
0x10a2   :  { %v1194_v22 = vpack.c.bf16 %v1120_v18, %v1120_v18 }
0x10a4   :  { %v1190_v29 = vpop.permute.xlu1 %1189  ;;  %1196 = vrot.lane.b32.xlu0 %v1194_v22, %s4704_s5 }
0x10a5   :  { %v1192_v19 = vmul.f32 %v1190_v29, %v1172_v62  ;;  %v4632_v29 = vld [vmem:[#allocation2 + $0x28] ss:$8 sps:$4 sm:$0xff]  }
0x10a7   :  { %v1193_v21 = vpack.c.bf16 %v1192_v19, %v1192_v19  ;;  %v4633_v19 = vld [vmem:[#allocation2 + $0x38] ss:$8 sps:$4 sm:$0xff]  }
0x10a9   :  { %v1242_v30 = vrot.slane %v1193_v21, 1  ;;  %v4634_v21 = vld [vmem:[#allocation2 + $0x48] ss:$8 sps:$4 sm:$0xff]  }
0x10ab   :  { %1243 = vrot.lane.b32.xlu1 %v1242_v30, %s4704_s5  ;;  %v4635_v30 = vld [vmem:[#allocation2 + $0x58] ss:$8 sps:$4 sm:$0xff]  }
0x1116   :  { %v1197_v25 = vpop.permute.xlu0 %1196 }
0x1117   :  { %4080 = vmatmul.mubr.msk.bf16.vlgmr.msra.gmra.mrb[32].mxu1 %vm146_vm6, %v1197_v25 }
0x1118   :  { %4092 = vmatpush3.bf16.msra.mxu1 %v5030_v28  ;;  %4095 = vmatprep.mubr.msk.bf16.mxu1 %vm4701_vm0, %v4700_v0 }
0x1119   :  { %4093 = vmatprep.subr.bf16.mxu1 %v4700_v0 }
0x111c   :  { %4094 = vmatpush3.bf16.msra.mxu1 %v5036_v24 }
0x111d   :  { %v1244_v20 = vpop.permute.xlu1 %1243  ;;  %4107 = vmatprep.subr.bf16.mxu1 %v4700_v0 }
0x111e   :  { %4088 = vmatmul.mubr.msk.bf16.vlgmr.msra.gmra.mrb[36].mxu0 %vm146_vm6, %v1244_v20 }
0x111f   :  { %4096 = vmatmul.mubr.msk.bf16.vlgmr.msra.gmra.mrb[36].mxu1 %vm146_vm6, %v1244_v20  ;;  %4100 = vmatpush3.bf16.msra.mxu0 %v4792_v35 }
0x1120   :  { %4101 = vmatprep.subr.bf16.mxu0 %v4700_v0  ;;  %4108 = vmatpush3.bf16.msra.mxu1 %v4794_v36 }
0x1121   :  { %4103 = vmatprep.mubr.msk.bf16.mxu0 %vm4701_vm0, %v4700_v0  ;;  %4109 = vmatprep.subr.bf16.mxu1 %v4700_v0 }
0x1122   :  { %4111 = vmatprep.mubr.msk.bf16.mxu1 %vm4701_vm0, %v4700_v0 }
0x1123   :  { %4102 = vmatpush3.bf16.msra.mxu0 %v4797_v37 }
0x1124   :  { %4110 = vmatpush3.bf16.msra.mxu1 %v4800_v38  ;;  %4115 = vmatprep.subr.bf16.mxu0 %v4700_v0 }
0x1125   :  { %4123 = vmatprep.subr.bf16.mxu1 %v4700_v0 }
0x11ea   :  { %v1235_v35 = vpop.f32.mrb[32].mxu1 }
0x11eb   :  { %v4081_v31 = vpop.f32.mrb[33].mxu1 }
0x11ec   :  { %v1238_v32 = vpop.f32.mrb[34].mxu1 }
0x11ed   :  { %v4082_v36 = vpop.f32.mrb[35].mxu1 }
0x11f1   :  { %v1282_v3 = vpop.f32.mrb[36].mxu0 }
0x11f2   :  { %v1283_v7 = vadd.f32 %v1282_v3, %v1235_v35  ;;  %v4089_v27 = vpop.f32.mrb[37].mxu0  ;;  %v1348_v33 = vpop.f32.mrb[36].mxu1 }
0x11f3   :  { %v1285_v34 = vpop.f32.mrb[38].mxu0  ;;  %v1355_v39 = vrot.slane %v1348_v33, 4  ;;  %v4097_v40 = vpop.f32.mrb[37].mxu1 }
0x11f4   :  { %v1288_v41 = vadd.f32 %v1283_v7, %v4834_v48  ;;  %v4090_v37 = vpop.f32.mrb[39].mxu0  ;;  %v1351_v42 = vpop.f32.mrb[38].mxu1 }
0x11f5   :  { %v1357_v38 = vadd.f32 %v1355_v39, %v4777_v14  ;;  %v4098_v43 = vpop.f32.mrb[39].mxu1 }
0x11f6   :  { %v3723_v44 = vmul.f32 -1.442695, %v1288_v41 }
0x11f7   :  { %v3725_v45 = vmul.f32 -1.442695, %v1357_v38 }
0x11f8   :  { %4462 = vpow2.f32 %v3723_v44 }
0x11f9   :  { %4464 = vpow2.f32 %v3725_v45 }
0x11fa   :  { %4466 = vtanh.f32 %v1288_v41 }
0x11fb   :  { %4468 = vtanh.f32 %v1357_v38 }
0x1202   :  { %v4463_v46 = vpop.eup %4462 }
0x1203   :  { %v4465_v47 = vpop.eup %4464  ;;  %v1293_v49 = vadd.f32 1.0, %v4463_v46 }
0x1204   :  { %v1362_v50 = vadd.f32 1.0, %v4465_v47  ;;  %v4467_v51 = vpop.eup %4466 }
0x1205   :  { %4470 = vrcp.f32 %v1293_v49  ;;  %v4469_v52 = vpop.eup %4468 }
0x1206   :  { %4472 = vrcp.f32 %v1362_v50 }
0x120f   :  { %v4471_v53 = vpop.eup %4470 }
0x1210   :  { %v4473_v54 = vpop.eup %4472  ;;  %v1296_v55 = vsel %vm4781_vm5, %v4467_v51, %v4471_v53 }
0x1211   :  { %1299 = vrot.lane.b32.xlu1 %v1296_v55, %s4703_s4  ;;  %v1365_v56 = vsel %vm4781_vm5, %v4469_v52, %v4473_v54  ;;  %v1297_v62 = vmul.f32 %v1296_v55, %v5018_v12 }
0x1212   :  { %1371 = vrot.lane.b32.xlu0 %v1365_v56, %s4703_s4  ;;  %v1369_v1 = vmul.f32 %v1367_v61, %v1365_v56 }
0x1283   :  { %v1300_v57 = vpop.permute.xlu1 %1299 }
0x1284   :  { %v1302_v58 = vmul.f32 %v1300_v57, %v1296_v55  ;;  %v1372_v59 = vpop.permute.xlu0 %1371 }
0x1285   :  { %v1374_v60 = vmul.f32 %v1372_v59, %v1365_v56 }
0x1286   :  { %1304 = vrot.lane.b32.xlu1 %v1302_v58, %s4704_s5 }
0x1287   :  { %1376 = vrot.lane.b32.xlu0 %v1374_v60, %s4704_s5 }
0x12f8   :  { %v1305_v63 = vpop.permute.xlu1 %1304 }
0x12f9   :  { %v5066_v2 = vadd.f32 %v1305_v63, %v1297_v62  ;;  %v1377_v4 = vpop.permute.xlu0 %1376 }
0x12fa   :  { %v5068_v5 = vadd.f32 %v1377_v4, %v1369_v1 }
0x12fb   :  { %4474 = vtanh.f32 %v5066_v2 }
0x12fc   :  { %4476 = vtanh.f32 %v5068_v5  ;;  %v1560_v58 = vrot.slane %v5068_v5, 6 }
0x1305   :  { %v4475_v6 = vpop.eup %4474 }
0x1306   :  { %v4477_v9 = vpop.eup %4476  ;;  %1310 = vrot.lane.b32.xlu1 %v4475_v6, %s4703_s4 }
0x1307   :  { %1382 = vrot.lane.b32.xlu0 %v4477_v9, %s4703_s4 }
0x1378   :  { %v1311_v10 = vpop.permute.xlu1 %1310 }
0x1379   :  { %v1313_v11 = vmul.f32 %v1311_v10, %v1296_v55  ;;  %v1383_v12 = vpop.permute.xlu0 %1382 }
0x137a   :  { %v1385_v13 = vmul.f32 %v1383_v12, %v1365_v56 }
0x137b   :  { %v1387_v15 = vpack.c.bf16 %v1313_v11, %v1313_v11  ;;  %v43_v11 = vld [vmem:[#allocation2 + $0x68] sm:$0xff] }
0x137c   :  { %v1386_v17 = vpack.c.bf16 %v1385_v13, %v1385_v13  ;;  %v1707_v12 = vsel %vm89_vm1, %v43_v11, 0 }
0x137d   :  { %1389 = vrot.lane.b32.xlu0 %v1387_v15, %s4704_s5  ;;  %v4636_v15 = vld [vmem:[%s5609_s0 + $0x8] sm:$0xff] }
0x137e   :  { %v1435_v16 = vrot.slane %v1386_v17, 2  ;;  %v1700_v17 = vpack.c.bf16 %v4636_v15, %v4636_v15 }
0x1380   :  { %1436 = vrot.lane.b32.xlu1 %v1435_v16, %s4704_s5  ;;  %v1702_v16 = vrot.slane %v1700_v17, 3 }
0x13ef   :  { %v1390_v18 = vpop.permute.xlu0 %1389 }
0x13f0   :  { %4104 = vmatmul.mubr.msk.bf16.vlgmr.msra.gmra.mrb[40].mxu0 %vm146_vm6, %v1390_v18  ;;  %v5123_v18 = vld [vmem:[#allocation2 + $0x70] ss:$8 sps:$4 sm:$0xff]  }
0x13f1   :  { %4116 = vmatpush3.bf16.msra.mxu0 %v5030_v28  ;;  %4119 = vmatprep.mubr.msk.bf16.mxu0 %vm4701_vm0, %v4700_v0 }
0x13f2   :  { %v1437_v22 = vpop.permute.xlu1 %1436  ;;  %4117 = vmatprep.subr.bf16.mxu0 %v4700_v0 }
0x13f3   :  { %4112 = vmatmul.mubr.msk.bf16.vlgmr.msra.gmra.mrb[40].mxu1 %vm146_vm6, %v1437_v22 }
0x13f4   :  { %4124 = vmatpush3.bf16.msra.mxu1 %v4632_v29  ;;  %4127 = vmatprep.mubr.msk.bf16.mxu1 %vm4701_vm0, %v4700_v0  ;;  %v5130_v29 = vld [vmem:[#allocation2 + $0x80] ss:$8 sps:$4 sm:$0xff]  }
0x13f5   :  { %4118 = vmatpush3.bf16.msra.mxu0 %v5036_v24  ;;  %4125 = vmatprep.subr.bf16.mxu1 %v4700_v0 }
0x13f6   :  { %4131 = vmatprep.subr.bf16.mxu0 %v4700_v0 }
0x13f8   :  { %4120 = vmatmul.mubr.msk.bf16.vlgmr.msra.gmra.mrb[44].mxu0 %vm146_vm6, %v1437_v22  ;;  %4126 = vmatpush3.bf16.msra.mxu1 %v4633_v19 }
0x13f9   :  { %4132 = vmatpush3.bf16.msra.mxu0 %v4634_v21  ;;  %4139 = vmatprep.subr.bf16.mxu1 %v4700_v0 }
0x13fa   :  { %4133 = vmatprep.subr.bf16.mxu0 %v4700_v0  ;;  %4135 = vmatprep.mubr.msk.bf16.mxu0 %vm4701_vm0, %v4700_v0 }
0x13fd   :  { %4134 = vmatpush3.bf16.msra.mxu0 %v4635_v30 }
0x13fe   :  { %4153 = vmatprep.subr.bf16.mxu0 %v4700_v0 }
0x14c3   :  { %v1428_v25 = vpop.f32.mrb[40].mxu0 }
0x14c4   :  { %v4105_v28 = vpop.f32.mrb[41].mxu0 }
0x14c5   :  { %v1431_v24 = vpop.f32.mrb[42].mxu0 }
0x14c6   :  { %v4106_v20 = vpop.f32.mrb[43].mxu0  ;;  %v1475_v35 = vpop.f32.mrb[40].mxu1 }
0x14c7   :  { %v1476_v31 = vadd.f32 %v1475_v35, %v1428_v25  ;;  %v4113_v32 = vpop.f32.mrb[41].mxu1 }
0x14c8   :  { %v1478_v36 = vpop.f32.mrb[42].mxu1 }
0x14c9   :  { %v1481_v3 = vadd.f32 %v1476_v31, %v4834_v48  ;;  %v4114_v7 = vpop.f32.mrb[43].mxu1  ;;  %v4637_v31 = vld [vmem:[%s5611_s2 + $0x1] ss:$0 sm:$0xff] }
0x14ca   :  { %v61_v7 = vld [vmem:[%s5611_s2 + $0x2] ss:$0 sm:$0xff] }
0x14cb   :  { %v3728_v27 = vmul.f32 -1.442695, %v1481_v3  ;;  %v1541_v33 = vpop.f32.mrb[44].mxu0 }
0x14cc   :  { %v1548_v34 = vrot.slane %v1541_v33, 2  ;;  %v4121_v39 = vpop.f32.mrb[45].mxu0 }
0x14cd   :  { %4478 = vpow2.f32 %v3728_v27  ;;  %v1544_v40 = vpop.f32.mrb[46].mxu0 }
0x14ce   :  { %v1550_v41 = vadd.f32 %v1548_v34, %v4777_v14  ;;  %v4122_v37 = vpop.f32.mrb[47].mxu0 }
0x14d0   :  { %v3730_v42 = vmul.f32 -1.442695, %v1550_v41 }
0x14d2   :  { %4480 = vpow2.f32 %v3730_v42 }
0x14d3   :  { %4482 = vtanh.f32 %v1481_v3 }
0x14d7   :  { %v4479_v38 = vpop.eup %4478 }
0x14d8   :  { %v1486_v43 = vadd.f32 1.0, %v4479_v38 }
0x14da   :  { %4484 = vrcp.f32 %v1486_v43 }
0x14db   :  { %4486 = vtanh.f32 %v1550_v41 }
0x14dc   :  { %v4481_v44 = vpop.eup %4480 }
0x14dd   :  { %v1555_v45 = vadd.f32 1.0, %v4481_v44  ;;  %v4483_v48 = vpop.eup %4482 }
0x14df   :  { %4488 = vrcp.f32 %v1555_v45 }
0x14e4   :  { %v4485_v46 = vpop.eup %4484 }
0x14e5   :  { %v1489_v47 = vsel %vm4781_vm5, %v4483_v48, %v4485_v46  ;;  %v4487_v49 = vpop.eup %4486 }
0x14e6   :  { %1492 = vrot.lane.b32.xlu0 %v1489_v47, %s4703_s4  ;;  %v1490_v55 = vmul.f32 %v1489_v47, %v5066_v2 }
0x14e9   :  { %v4489_v14 = vpop.eup %4488 }
0x14ea   :  { %v1558_v50 = vsel %vm4781_vm5, %v4487_v49, %v4489_v14 }
0x14eb   :  { %1564 = vrot.lane.b32.xlu1 %v1558_v50, %s4703_s4  ;;  %v1562_v59 = vmul.f32 %v1560_v58, %v1558_v50 }
0x1558   :  { %v1493_v51 = vpop.permute.xlu0 %1492 }
0x1559   :  { %v1495_v52 = vmul.f32 %v1493_v51, %v1489_v47 }
0x155b   :  { %1497 = vrot.lane.b32.xlu0 %v1495_v52, %s4704_s5 }
0x155d   :  { %v1565_v53 = vpop.permute.xlu1 %1564 }
0x155e   :  { %v1567_v54 = vmul.f32 %v1565_v53, %v1558_v50 }
0x1560   :  { %1569 = vrot.lane.b32.xlu1 %v1567_v54, %s4704_s5 }
0x15cd   :  { %v1498_v56 = vpop.permute.xlu0 %1497 }
0x15ce   :  { %v5104_v57 = vadd.f32 %v1498_v56, %v1490_v55 }
0x15d0   :  { %4490 = vtanh.f32 %v5104_v57 }
0x15d2   :  { %v1570_v60 = vpop.permute.xlu1 %1569 }
0x15d3   :  { %v5108_v61 = vadd.f32 %v1570_v60, %v1562_v59 }
0x15d5   :  { %4492 = vtanh.f32 %v5108_v61  ;;  %v1811_v56 = vrot.slane %v5108_v61, 6 }
0x15da   :  { %v4491_v62 = vpop.eup %4490 }
0x15db   :  { %1503 = vrot.lane.b32.xlu0 %v4491_v62, %s4703_s4 }
0x15df   :  { %v4493_v63 = vpop.eup %4492 }
0x15e0   :  { %1575 = vrot.lane.b32.xlu1 %v4493_v63, %s4703_s4  ;;  %v5161_v63 = vld [vmem:[#allocation2 + $0x90] ss:$8 sps:$4 sm:$0xff]  }
0x164d   :  { %v1504_v1 = vpop.permute.xlu0 %1503 }
0x164e   :  { %v1506_v2 = vmul.f32 %v1504_v1, %v1489_v47 }
0x1650   :  { %v1580_v4 = vpack.c.bf16 %v1506_v2, %v1506_v2 }
0x1652   :  { %v1576_v6 = vpop.permute.xlu1 %1575  ;;  %1582 = vrot.lane.b32.xlu0 %v1580_v4, %s4704_s5 }
0x1653   :  { %v1578_v5 = vmul.f32 %v1576_v6, %v1558_v50 }
0x1655   :  { %v1579_v9 = vpack.c.bf16 %v1578_v5, %v1578_v5 }
0x1657   :  { %v1628_v10 = vrot.slane %v1579_v9, 3 }
0x1659   :  { %1629 = vrot.lane.b32.xlu1 %v1628_v10, %s4704_s5  ;;  %v5172_v10 = vld [vmem:[#allocation2 + $0xb0] ss:$8 sps:$4 sm:$0xff]  }
0x16c4   :  { %v1583_v13 = vpop.permute.xlu0 %1582 }
0x16c5   :  { %4128 = vmatmul.mubr.msk.bf16.vlgmr.msra.gmra.mrb[44].mxu1 %vm146_vm6, %v1583_v13 }
0x16c6   :  { %4140 = vmatpush3.bf16.msra.mxu1 %v1707_v12  ;;  %4141 = vmatprep.mubr.msk.bf16.mxu1 %vm4701_vm0, %v4700_v0  ;;  %v5176_v12 = vld [vmem:[#allocation2 + $0xc0] ss:$8 sps:$4 sm:$0xff]  }
0x16c7   :  { %4145 = vmatprep.subr.bf16.mxu1 %v4700_v0 }
0x16cb   :  { %v1630_v22 = vpop.permute.xlu1 %1629 }
0x16cc   :  { %4136 = vmatmul.mubr.msk.bf16.vlgmr.msra.gmra.mrb[48].mxu0 %vm146_vm6, %v1630_v22 }
0x16cd   :  { %4142 = vmatmul.mubr.msk.bf16.vlgmr.msra.gmra.mrb[48].mxu1 %vm85_vm2, %v1702_v16  ;;  %4157 = vmatprep.mubr.msk.bf16.mxu0 %vm4701_vm0, %v4700_v0 }
0x16ce   :  { %4146 = vmatpush3.bf16.msra.mxu1 %v5123_v18  ;;  %4149 = vmatprep.mubr.msk.bf16.mxu1 %vm4701_vm0, %v4700_v0 }
0x16cf   :  { %4147 = vmatprep.subr.bf16.mxu1 %v4700_v0  ;;  %4154 = vmatpush3.bf16.msra.mxu0 %v5161_v63 }
0x16d0   :  { %4155 = vmatprep.subr.bf16.mxu0 %v4700_v0 }
0x16d2   :  { %4148 = vmatpush3.bf16.msra.mxu1 %v5130_v29 }
0x16d9   :  { %4150 = vmatmul.mubr.msk.bf16.vlgmr.msra.gmra.mrb[48].mxu1 %vm146_vm6, %v1630_v22 }
0x16da   :  { %2033 = vmatprep.mubr.bf16.mxu1 %v4702_v8 }
0x1798   :  { %v1621_v19 = vpop.f32.mrb[44].mxu1 }
0x1799   :  { %v4129_v21 = vpop.f32.mrb[45].mxu1 }
0x179a   :  { %v1624_v30 = vpop.f32.mrb[46].mxu1 }
0x179b   :  { %v4130_v25 = vpop.f32.mrb[47].mxu1 }
0x179f   :  { %v1668_v28 = vpop.f32.mrb[48].mxu0 }
0x17a0   :  { %v1669_v24 = vadd.f32 %v1668_v28, %v1621_v19  ;;  %v4137_v20 = vpop.f32.mrb[49].mxu0  ;;  %v5200_v19 = vld [vmem:[%s5611_s2 + $0x3] ss:$0 sm:$0xff] }
0x17a1   :  { %v1671_v35 = vpop.f32.mrb[50].mxu0 }
0x17a2   :  { %v1674_v32 = vadd.f32 %v4637_v31, %v1669_v24  ;;  %v4138_v36 = vpop.f32.mrb[51].mxu0 }
0x17a4   :  { %v3733_v3 = vmul.f32 -1.442695, %v1674_v32 }
0x17a6   :  { %4494 = vpow2.f32 %v3733_v3 }
0x17ac   :  { %v1795_v27 = vpop.f32.mrb[48].mxu1 }
0x17ad   :  { %v4337_v33 = vadd.f32 %v1795_v27, %v61_v7  ;;  %v4151_v34 = vpop.f32.mrb[49].mxu1 }
0x17ae   :  { %v1798_v39 = vpop.f32.mrb[50].mxu1 }
0x17af   :  { %v3738_v40 = vmul.f32 -1.442695, %v4337_v33  ;;  %v4152_v41 = vpop.f32.mrb[51].mxu1 }
0x17b0   :  { %v4495_v37 = vpop.eup %4494 }
0x17b1   :  { %v1679_v42 = vadd.f32 1.0, %v4495_v37  ;;  %4496 = vpow2.f32 %v3738_v40 }
0x17b2   :  { %4498 = vtanh.f32 %v1674_v32 }
0x17b3   :  { %4500 = vrcp.f32 %v1679_v42 }
0x17b4   :  { %4502 = vtanh.f32 %v4337_v33 }
0x17bb   :  { %v4497_v38 = vpop.eup %4496 }
0x17bc   :  { %v4499_v43 = vpop.eup %4498  ;;  %v1806_v44 = vadd.f32 1.0, %v4497_v38 }
0x17bd   :  { %v4501_v45 = vpop.eup %4500 }
0x17be   :  { %4504 = vrcp.f32 %v1806_v44  ;;  %v1682_v48 = vsel %vm4781_vm5, %v4499_v43, %v4501_v45  ;;  %v4503_v46 = vpop.eup %4502  ;;  %v5211_v43 = vld [vmem:[#allocation2 + $0xd4] ss:$8 sps:$4 sm:$0xff]   ;;  %v5213_v44 = vld [vmem:[#allocation2 + $0xd0] ss:$8 sps:$4 sm:$0xff]   ;;  %v5215_v45 = vld [vmem:[#allocation2 + $0xe4] ss:$8 sps:$4 sm:$0xff]  }
0x17bf   :  { %1685 = vrot.lane.b32.xlu0 %v1682_v48, %s4703_s4  ;;  %v1683_v53 = vmul.f32 %v1682_v48, %v5104_v57  ;;  %v5164_v57 = vld [vmem:[#allocation2 + $0xa0] ss:$8 sps:$4 sm:$0xff]   ;;  %2001 = vmatprep.subr.bf16.mxu1 %v5211_v43 }
0x17c0   :  { %4156 = vmatpush3.bf16.msra.mxu0 %v5164_v57  ;;  %2002 = vmatpush1.bf16.msra.mxu1 %v5213_v44 }
0x17c1   :  { %4161 = vmatprep.subr.bf16.mxu0 %v4700_v0  ;;  %2003 = vmatprep.subr.bf16.mxu1 %v5215_v45 }
0x17c8   :  { %v4505_v47 = vpop.eup %4504 }
0x17c9   :  { %v1809_v49 = vsel %vm4781_vm5, %v4503_v46, %v4505_v47 }
0x17ca   :  { %1815 = vrot.lane.b32.xlu1 %v1809_v49, %s4703_s4  ;;  %v1813_v58 = vmul.f32 %v1811_v56, %v1809_v49 }
0x1831   :  { %v1686_v14 = vpop.permute.xlu0 %1685 }
0x1832   :  { %v1688_v50 = vmul.f32 %v1686_v14, %v1682_v48 }
0x1834   :  { %1690 = vrot.lane.b32.xlu0 %v1688_v50, %s4704_s5  ;;  %v3688_v50 = vld [vmem:[%s5611_s2 + $0x4] ss:$8 sm:$0x3] }
0x183c   :  { %v1816_v51 = vpop.permute.xlu1 %1815 }
0x183d   :  { %v1818_v52 = vmul.f32 %v1816_v51, %v1809_v49 }
0x183f   :  { %1820 = vrot.lane.b32.xlu1 %v1818_v52, %s4704_s5 }
0x18a6   :  { %v1691_v54 = vpop.permute.xlu0 %1690 }
0x18a7   :  { %v5153_v55 = vadd.f32 %v1691_v54, %v1683_v53 }
0x18a9   :  { %4506 = vtanh.f32 %v5153_v55 }
0x18b1   :  { %v1821_v59 = vpop.permute.xlu1 %1820 }
0x18b2   :  { %v5157_v60 = vadd.f32 %v1821_v59, %v1813_v58 }
0x18b3   :  { %v4507_v62 = vpop.eup %4506 }
0x18b4   :  { %4508 = vtanh.f32 %v5157_v60  ;;  %1696 = vrot.lane.b32.xlu0 %v4507_v62, %s4703_s4 }
0x18be   :  { %v4509_v61 = vpop.eup %4508 }
0x18bf   :  { %1826 = vrot.lane.b32.xlu1 %v4509_v61, %s4703_s4 }
0x1926   :  { %v1697_v1 = vpop.permute.xlu0 %1696 }
0x1927   :  { %v1699_v2 = vmul.f32 %v1697_v1, %v1682_v48  ;;  %v5219_v48 = vld [vmem:[#allocation2 + $0xe0] ss:$8 sps:$4 sm:$0xff]  }
0x1928   :  { %2004 = vmatpush1.bf16.msra.mxu1 %v5219_v48 }
0x1929   :  { %v1831_v4 = vpack.c.bf16 %v1699_v2, %v1699_v2  ;;  %4177 = vmatprep.subr.bf16.mxu1 %v4700_v0 }
0x192b   :  { %1833 = vrot.lane.b32.xlu0 %v1831_v4, %s4704_s5 }
0x1931   :  { %v1827_v6 = vpop.permute.xlu1 %1826 }
0x1932   :  { %v1829_v5 = vmul.f32 %v1827_v6, %v1809_v49  ;;  %v67_v49 = vshrl.u32 %v66_v23, 7 }
0x1934   :  { %v1830_v9 = vpack.c.bf16 %v1829_v5, %v1829_v5  ;;  %v72_v51 = vsub.s32 1, %v67_v49  ;;  %v68_v23 = vsub.s32 0, %v67_v49 }
0x1936   :  { %1891 = vrot.lane.b32.xlu1 %v1830_v9, %s4704_s5  ;;  %v5229_v53 = vrot.slane %v3688_v50, %v72_v51 }
0x199d   :  { %v1834_v11 = vpop.permute.xlu0 %1833 }
0x199e   :  { %4158 = vmatmul.mubr.msk.bf16.vlgmr.msra.gmra.mrb[52].mxu0 %vm146_vm6, %v1834_v11 }
0x199f   :  { %4162 = vmatpush3.bf16.msra.mxu0 %v5172_v10  ;;  %4165 = vmatprep.mubr.msk.bf16.mxu0 %vm4701_vm0, %v4700_v0 }
0x19a0   :  { %4163 = vmatprep.subr.bf16.mxu0 %v4700_v0 }
0x19a3   :  { %4164 = vmatpush3.bf16.msra.mxu0 %v5176_v12 }
0x19a4   :  { %4169 = vmatprep.subr.bf16.mxu0 %v4700_v0 }
0x19a8   :  { %v1892_v13 = vpop.permute.xlu1 %1891 }
0x19a9   :  { %4166 = vmatmul.mubr.msk.bf16.vlgmr.msra.gmra.mrb[56].mxu0 %vm146_vm6, %v1892_v13 }
0x19aa   :  { %4170 = vmatpush3.bf16.msra.mxu0 %v5123_v18  ;;  %4173 = vmatprep.mubr.msk.bf16.mxu0 %vm4701_vm0, %v4700_v0 }
0x19ab   :  { %4171 = vmatprep.subr.bf16.mxu0 %v4700_v0 }
0x19ae   :  { %4172 = vmatpush3.bf16.msra.mxu0 %v5130_v29 }
0x19af   :  { %4185 = vmatprep.subr.bf16.mxu0 %v4700_v0 }
0x19b1   :  { %4174 = vmatmul.mubr.msk.bf16.vlgmr.msra.gmra.mrb[60].mxu0 %vm146_vm6, %v1892_v13 }
0x19b2   :  { %4186 = vmatpush3.bf16.msra.mxu0 %v5172_v10  ;;  %4189 = vmatprep.mubr.msk.bf16.mxu0 %vm4701_vm0, %v4700_v0 }
0x19b3   :  { %4187 = vmatprep.subr.bf16.mxu0 %v4700_v0 }
0x19b6   :  { %4188 = vmatpush3.bf16.msra.mxu0 %v5176_v12 }
0x19b7   :  { %4193 = vmatprep.subr.bf16.mxu0 %v4700_v0 }
0x1a71   :  { %v1884_v15 = vpop.f32.mrb[52].mxu0 }
0x1a72   :  { %v4159_v17 = vpop.f32.mrb[53].mxu0 }
0x1a73   :  { %v1887_v16 = vpop.f32.mrb[54].mxu0 }
0x1a74   :  { %v4160_v22 = vpop.f32.mrb[55].mxu0 }
0x1a7c   :  { %v1942_v21 = vpop.f32.mrb[56].mxu0 }
0x1a7d   :  { %v1943_v30 = vadd.f32 %v1942_v21, %v1884_v15  ;;  %v4167_v25 = vpop.f32.mrb[57].mxu0 }
0x1a7e   :  { %v1945_v28 = vpop.f32.mrb[58].mxu0 }
0x1a7f   :  { %v1948_v24 = vadd.f32 %v1943_v30, %v5200_v19  ;;  %v4168_v20 = vpop.f32.mrb[59].mxu0 }
0x1a81   :  { %v3745_v35 = vmul.f32 -1.442695, %v1948_v24 }
0x1a83   :  { %4510 = vpow2.f32 %v3745_v35 }
0x1a84   :  { %v2076_v31 = vpop.f32.mrb[60].mxu0  ;;  %4512 = vtanh.f32 %v1948_v24 }
0x1a85   :  { %v4175_v32 = vpop.f32.mrb[61].mxu0 }
0x1a86   :  { %v2079_v36 = vpop.f32.mrb[62].mxu0 }
0x1a87   :  { %v4176_v3 = vpop.f32.mrb[63].mxu0 }
0x1a8d   :  { %v4511_v7 = vpop.eup %4510 }
0x1a8e   :  { %v1953_v27 = vadd.f32 1.0, %v4511_v7  ;;  %v4513_v33 = vpop.eup %4512 }
0x1a90   :  { %4514 = vrcp.f32 %v1953_v27 }
0x1a9a   :  { %v4515_v34 = vpop.eup %4514 }
0x1a9b   :  { %v1956_v39 = vsel %vm4781_vm5, %v4513_v33, %v4515_v34 }
0x1a9c   :  { %1959 = vrot.lane.b32.xlu0 %v1956_v39, %s4703_s4  ;;  %v1957_v37 = vmul.f32 %v1956_v39, %v5153_v55  ;;  %v5245_v55 = vrot.slane %v3688_v50, %v68_v23 }
0x1b0e   :  { %v1960_v40 = vpop.permute.xlu0 %1959 }
0x1b0f   :  { %v1962_v41 = vmul.f32 %v1960_v40, %v1956_v39 }
0x1b11   :  { %1964 = vrot.lane.b32.xlu1 %v1962_v41, %s4704_s5 }
0x1b83   :  { %v1965_v42 = vpop.permute.xlu1 %1964 }
0x1b84   :  { %v5208_v38 = vadd.f32 %v1965_v42, %v1957_v37 }
0x1b86   :  { %4516 = vtanh.f32 %v5208_v38 }
0x1b90   :  { %v4517_v46 = vpop.eup %4516 }
0x1b91   :  { %1970 = vrot.lane.b32.xlu0 %v4517_v46, %s4703_s4 }
0x1c03   :  { %v1971_v47 = vpop.permute.xlu0 %1970 }
0x1c04   :  { %v1973_v14 = vmul.f32 %v1971_v47, %v1956_v39 }
0x1c06   :  { %v1974_v52 = vpack.c.bf16 %v1973_v14, %v1973_v14 }
0x1c08   :  { %1976 = vrot.lane.b32.xlu1 %v1974_v52, %s4704_s5 }
0x1c7a   :  { %v1977_v54 = vpop.permute.xlu1 %1976 }
0x1c7b   :  { %3750 = vmatmul.mubr.msk.bf16.vlgmr.msra.gmra.mrb[52].mxu1 %vm146_vm6, %v1977_v54 }
0x1c7c   :  { %4178 = vmatpush3.bf16.msra.mxu1 %v5161_v63  ;;  %4181 = vmatprep.mubr.msk.bf16.mxu1 %vm4701_vm0, %v4700_v0 }
0x1c7d   :  { %4179 = vmatprep.subr.bf16.mxu1 %v4700_v0 }
0x1c80   :  { %4180 = vmatpush3.bf16.msra.mxu1 %v5164_v57 }
0x1c81   :  { %2228 = vmatprep.subr.bf16.mxu1 %v5211_v43 }
0x1c83   :  { %4182 = vmatmul.mubr.msk.bf16.vlgmr.msra.gmra.mrb[56].mxu1 %vm146_vm6, %v1977_v54 }
0x1c84   :  { %2229 = vmatpush1.bf16.msra.mxu1 %v5213_v44  ;;  %2260 = vmatprep.mubr.bf16.mxu1 %v4702_v8 }
0x1c85   :  { %2230 = vmatprep.subr.bf16.mxu1 %v5215_v45 }
0x1c88   :  { %2231 = vmatpush1.bf16.msra.mxu1 %v5219_v48 }
0x1c89   :  { %4201 = vmatprep.subr.bf16.mxu1 %v4700_v0 }
0x1d4e   :  { %v2035_v56 = vpop.f32.mrb[52].mxu1 }
0x1d4f   :  { %v2036_v58 = vadd.f32 %v2035_v56, %v5245_v55  ;;  %v5248_v59 = vpop.f32.mrb[53].mxu1 }
0x1d50   :  { %v2039_v62 = vpop.f32.mrb[54].mxu1 }
0x1d51   :  { %v2082_v61 = vadd.f32 %v2076_v31, %v2036_v58  ;;  %v2040_v1 = vpop.f32.mrb[55].mxu1 }
0x1d53   :  { %v3752_v2 = vmul.f32 -1.442695, %v2082_v61 }
0x1d55   :  { %4518 = vpow2.f32 %v3752_v2 }
0x1d56   :  { %v2143_v4 = vpop.f32.mrb[56].mxu1  ;;  %4520 = vtanh.f32 %v2082_v61 }
0x1d57   :  { %v4183_v6 = vpop.f32.mrb[57].mxu1 }
0x1d58   :  { %v2146_v5 = vpop.f32.mrb[58].mxu1 }
0x1d59   :  { %v4184_v9 = vpop.f32.mrb[59].mxu1 }
0x1d5f   :  { %v4519_v11 = vpop.eup %4518 }
0x1d60   :  { %v2087_v13 = vadd.f32 1.0, %v4519_v11  ;;  %v4521_v15 = vpop.eup %4520 }
0x1d62   :  { %4522 = vrcp.f32 %v2087_v13 }
0x1d6c   :  { %v4523_v17 = vpop.eup %4522 }
0x1d6d   :  { %v2090_v16 = vsel %vm4781_vm5, %v4521_v15, %v4523_v17 }
0x1d6e   :  { %2093 = vrot.lane.b32.xlu0 %v2090_v16, %s4703_s4  ;;  %v2091_v30 = vmul.f32 %v2090_v16, %v5157_v60 }
0x1de0   :  { %v2094_v22 = vpop.permute.xlu0 %2093 }
0x1de1   :  { %v2096_v21 = vmul.f32 %v2094_v22, %v2090_v16 }
0x1de3   :  { %2098 = vrot.lane.b32.xlu1 %v2096_v21, %s4704_s5 }
0x1e55   :  { %v2099_v25 = vpop.permute.xlu1 %2098 }
0x1e56   :  { %v5255_v28 = vadd.f32 %v2099_v25, %v2091_v30 }
0x1e58   :  { %4524 = vtanh.f32 %v5255_v28 }
0x1e62   :  { %v4525_v24 = vpop.eup %4524 }
0x1e63   :  { %2104 = vrot.lane.b32.xlu0 %v4525_v24, %s4703_s4 }
0x1ed5   :  { %v2105_v20 = vpop.permute.xlu0 %2104 }
0x1ed6   :  { %v2107_v35 = vmul.f32 %v2105_v20, %v2090_v16 }
0x1ed8   :  { %v2108_v31 = vpack.c.bf16 %v2107_v35, %v2107_v35 }
0x1eda   :  { %2150 = vrot.lane.b32.xlu1 %v2108_v31, %s4704_s5 }
0x1f4c   :  { %v2151_v32 = vpop.permute.xlu1 %2150 }
0x1f4d   :  { %4190 = vmatmul.mubr.msk.bf16.vlgmr.msra.gmra.mrb[64].mxu0 %vm146_vm6, %v2151_v32 }
0x1f4e   :  { %4194 = vmatpush3.bf16.msra.mxu0 %v5123_v18  ;;  %4197 = vmatprep.mubr.msk.bf16.mxu0 %vm4701_vm0, %v4700_v0 }
0x1f4f   :  { %4195 = vmatprep.subr.bf16.mxu0 %v4700_v0 }
0x1f52   :  { %4196 = vmatpush3.bf16.msra.mxu0 %v5130_v29 }
0x1f53   :  { %4209 = vmatprep.subr.bf16.mxu0 %v4700_v0 }
0x1f55   :  { %4198 = vmatmul.mubr.msk.bf16.vlgmr.msra.gmra.mrb[68].mxu0 %vm146_vm6, %v2151_v32 }
0x1f56   :  { %4210 = vmatpush3.bf16.msra.mxu0 %v5172_v10  ;;  %4213 = vmatprep.mubr.msk.bf16.mxu0 %vm4701_vm0, %v4700_v0 }
0x1f57   :  { %4211 = vmatprep.subr.bf16.mxu0 %v4700_v0 }
0x1f5a   :  { %4212 = vmatpush3.bf16.msra.mxu0 %v5176_v12 }
0x1f5b   :  { %4217 = vmatprep.subr.bf16.mxu0 %v4700_v0 }
0x2020   :  { %v2189_v60 = vpop.f32.mrb[64].mxu0 }
0x2021   :  { %v2190_v36 = vadd.f32 %v2189_v60, %v2143_v4  ;;  %v4191_v3 = vpop.f32.mrb[65].mxu0 }
0x2022   :  { %v2192_v7 = vpop.f32.mrb[66].mxu0 }
0x2023   :  { %v2195_v27 = vadd.f32 %v2190_v36, %v5200_v19  ;;  %v4192_v33 = vpop.f32.mrb[67].mxu0 }
0x2025   :  { %v3755_v34 = vmul.f32 -1.442695, %v2195_v27 }
0x2027   :  { %4526 = vpow2.f32 %v3755_v34 }
0x2028   :  { %v2303_v39 = vpop.f32.mrb[68].mxu0  ;;  %4528 = vtanh.f32 %v2195_v27 }
0x2029   :  { %v4199_v40 = vpop.f32.mrb[69].mxu0 }
0x202a   :  { %v2306_v41 = vpop.f32.mrb[70].mxu0 }
0x202b   :  { %v4200_v37 = vpop.f32.mrb[71].mxu0 }
0x2031   :  { %v4527_v42 = vpop.eup %4526 }
0x2032   :  { %v2200_v46 = vadd.f32 1.0, %v4527_v42  ;;  %v4529_v47 = vpop.eup %4528 }
0x2034   :  { %4530 = vrcp.f32 %v2200_v46 }
0x203e   :  { %v4531_v49 = vpop.eup %4530 }
0x203f   :  { %v2203_v14 = vsel %vm4781_vm5, %v4529_v47, %v4531_v49 }
0x2040   :  { %2206 = vrot.lane.b32.xlu0 %v2203_v14, %s4703_s4  ;;  %v2204_v52 = vmul.f32 %v2203_v14, %v5208_v38 }
0x20b2   :  { %v2207_v50 = vpop.permute.xlu0 %2206 }
0x20b3   :  { %v2209_v51 = vmul.f32 %v2207_v50, %v2203_v14 }
0x20b5   :  { %2211 = vrot.lane.b32.xlu1 %v2209_v51, %s4704_s5 }
0x2127   :  { %v2212_v54 = vpop.permute.xlu1 %2211 }
0x2128   :  { %v5280_v23 = vadd.f32 %v2212_v54, %v2204_v52 }
0x212a   :  { %4532 = vtanh.f32 %v5280_v23 }
0x2134   :  { %v4533_v56 = vpop.eup %4532 }
0x2135   :  { %2217 = vrot.lane.b32.xlu0 %v4533_v56, %s4703_s4 }
0x21a7   :  { %v2218_v58 = vpop.permute.xlu0 %2217 }
0x21a8   :  { %v2220_v62 = vmul.f32 %v2218_v58, %v2203_v14 }
0x21aa   :  { %v2221_v61 = vpack.c.bf16 %v2220_v62, %v2220_v62 }
0x21ac   :  { %2223 = vrot.lane.b32.xlu1 %v2221_v61, %s4704_s5 }
0x221e   :  { %v2224_v1 = vpop.permute.xlu1 %2223 }
0x221f   :  { %3756 = vmatmul.mubr.msk.bf16.vlgmr.msra.gmra.mrb[60].mxu1 %vm146_vm6, %v2224_v1 }
0x2220   :  { %4202 = vmatpush3.bf16.msra.mxu1 %v5161_v63  ;;  %4205 = vmatprep.mubr.msk.bf16.mxu1 %vm4701_vm0, %v4700_v0 }
0x2221   :  { %4203 = vmatprep.subr.bf16.mxu1 %v4700_v0 }
0x2224   :  { %4204 = vmatpush3.bf16.msra.mxu1 %v5164_v57 }
0x2225   :  { %2455 = vmatprep.subr.bf16.mxu1 %v5211_v43 }
0x2227   :  { %4206 = vmatmul.mubr.msk.bf16.vlgmr.msra.gmra.mrb[64].mxu1 %vm146_vm6, %v2224_v1 }
0x2228   :  { %2456 = vmatpush1.bf16.msra.mxu1 %v5213_v44  ;;  %2487 = vmatprep.mubr.bf16.mxu1 %v4702_v8 }
0x2229   :  { %2457 = vmatprep.subr.bf16.mxu1 %v5215_v45 }
0x222c   :  { %2458 = vmatpush1.bf16.msra.mxu1 %v5219_v48 }
0x222d   :  { %4225 = vmatprep.subr.bf16.mxu1 %v4700_v0 }
0x22f2   :  { %v2262_v38 = vpop.f32.mrb[60].mxu1 }
0x22f3   :  { %v2263_v2 = vadd.f32 %v2262_v38, %v5245_v55  ;;  %v5299_v4 = vpop.f32.mrb[61].mxu1 }
0x22f4   :  { %v2266_v6 = vpop.f32.mrb[62].mxu1 }
0x22f5   :  { %v2309_v5 = vadd.f32 %v2303_v39, %v2263_v2  ;;  %v2267_v9 = vpop.f32.mrb[63].mxu1 }
0x22f7   :  { %v3758_v11 = vmul.f32 -1.442695, %v2309_v5 }
0x22f9   :  { %4534 = vpow2.f32 %v3758_v11 }
0x22fa   :  { %v2370_v13 = vpop.f32.mrb[64].mxu1  ;;  %4536 = vtanh.f32 %v2309_v5 }
0x22fb   :  { %v4207_v15 = vpop.f32.mrb[65].mxu1 }
0x22fc   :  { %v2373_v17 = vpop.f32.mrb[66].mxu1 }
0x22fd   :  { %v4208_v16 = vpop.f32.mrb[67].mxu1 }
0x2303   :  { %v4535_v22 = vpop.eup %4534 }
0x2304   :  { %v2314_v21 = vadd.f32 1.0, %v4535_v22  ;;  %v4537_v30 = vpop.eup %4536 }
0x2306   :  { %4538 = vrcp.f32 %v2314_v21 }
0x2310   :  { %v4539_v25 = vpop.eup %4538 }
0x2311   :  { %v2317_v24 = vsel %vm4781_vm5, %v4537_v30, %v4539_v25 }
0x2312   :  { %2320 = vrot.lane.b32.xlu0 %v2317_v24, %s4703_s4  ;;  %v2318_v31 = vmul.f32 %v2317_v24, %v5255_v28 }
0x2384   :  { %v2321_v20 = vpop.permute.xlu0 %2320 }
0x2385   :  { %v2323_v35 = vmul.f32 %v2321_v20, %v2317_v24 }
0x2387   :  { %2325 = vrot.lane.b32.xlu1 %v2323_v35, %s4704_s5 }
0x23f9   :  { %v2326_v32 = vpop.permute.xlu1 %2325 }
0x23fa   :  { %v5306_v60 = vadd.f32 %v2326_v32, %v2318_v31 }
0x23fc   :  { %4540 = vtanh.f32 %v5306_v60 }
0x2406   :  { %v4541_v36 = vpop.eup %4540 }
0x2407   :  { %2331 = vrot.lane.b32.xlu0 %v4541_v36, %s4703_s4 }
0x2479   :  { %v2332_v3 = vpop.permute.xlu0 %2331 }
0x247a   :  { %v2334_v7 = vmul.f32 %v2332_v3, %v2317_v24 }
0x247c   :  { %v2335_v27 = vpack.c.bf16 %v2334_v7, %v2334_v7 }
0x247e   :  { %2377 = vrot.lane.b32.xlu1 %v2335_v27, %s4704_s5 }
0x24f0   :  { %v2378_v33 = vpop.permute.xlu1 %2377 }
0x24f1   :  { %4214 = vmatmul.mubr.msk.bf16.vlgmr.msra.gmra.mrb[72].mxu0 %vm146_vm6, %v2378_v33 }
0x24f2   :  { %4218 = vmatpush3.bf16.msra.mxu0 %v5123_v18  ;;  %4221 = vmatprep.mubr.msk.bf16.mxu0 %vm4701_vm0, %v4700_v0 }
0x24f3   :  { %4219 = vmatprep.subr.bf16.mxu0 %v4700_v0 }
0x24f6   :  { %4220 = vmatpush3.bf16.msra.mxu0 %v5130_v29 }
0x24f7   :  { %4233 = vmatprep.subr.bf16.mxu0 %v4700_v0 }
0x24f9   :  { %4222 = vmatmul.mubr.msk.bf16.vlgmr.msra.gmra.mrb[76].mxu0 %vm146_vm6, %v2378_v33 }
0x24fa   :  { %4234 = vmatpush3.bf16.msra.mxu0 %v5172_v10  ;;  %4237 = vmatprep.mubr.msk.bf16.mxu0 %vm4701_vm0, %v4700_v0 }
0x24fb   :  { %4235 = vmatprep.subr.bf16.mxu0 %v4700_v0 }
0x24fe   :  { %4236 = vmatpush3.bf16.msra.mxu0 %v5176_v12 }
0x24ff   :  { %4241 = vmatprep.subr.bf16.mxu0 %v4700_v0 }
0x25c4   :  { %v2416_v28 = vpop.f32.mrb[72].mxu0 }
0x25c5   :  { %v2417_v34 = vadd.f32 %v2416_v28, %v2370_v13  ;;  %v4215_v39 = vpop.f32.mrb[73].mxu0 }
0x25c6   :  { %v2419_v40 = vpop.f32.mrb[74].mxu0 }
0x25c7   :  { %v2422_v41 = vadd.f32 %v2417_v34, %v5200_v19  ;;  %v4216_v37 = vpop.f32.mrb[75].mxu0 }
0x25c9   :  { %v3761_v42 = vmul.f32 -1.442695, %v2422_v41 }
0x25cb   :  { %4542 = vpow2.f32 %v3761_v42 }
0x25cc   :  { %v2530_v46 = vpop.f32.mrb[76].mxu0  ;;  %4544 = vtanh.f32 %v2422_v41 }
0x25cd   :  { %v4223_v47 = vpop.f32.mrb[77].mxu0 }
0x25ce   :  { %v2533_v49 = vpop.f32.mrb[78].mxu0 }
0x25cf   :  { %v4224_v14 = vpop.f32.mrb[79].mxu0 }
0x25d5   :  { %v4543_v50 = vpop.eup %4542 }
0x25d6   :  { %v2427_v51 = vadd.f32 1.0, %v4543_v50  ;;  %v4545_v52 = vpop.eup %4544 }
0x25d8   :  { %4546 = vrcp.f32 %v2427_v51 }
0x25e2   :  { %v4547_v54 = vpop.eup %4546 }
0x25e3   :  { %v2430_v56 = vsel %vm4781_vm5, %v4545_v52, %v4547_v54 }
0x25e4   :  { %2433 = vrot.lane.b32.xlu0 %v2430_v56, %s4703_s4  ;;  %v2431_v61 = vmul.f32 %v2430_v56, %v5280_v23 }
0x2656   :  { %v2434_v58 = vpop.permute.xlu0 %2433 }
0x2657   :  { %v2436_v62 = vmul.f32 %v2434_v58, %v2430_v56 }
0x2659   :  { %2438 = vrot.lane.b32.xlu1 %v2436_v62, %s4704_s5 }
0x26cb   :  { %v2439_v1 = vpop.permute.xlu1 %2438 }
0x26cc   :  { %v5331_v38 = vadd.f32 %v2439_v1, %v2431_v61 }
0x26ce   :  { %4548 = vtanh.f32 %v5331_v38 }
0x26d8   :  { %v4549_v2 = vpop.eup %4548 }
0x26d9   :  { %2444 = vrot.lane.b32.xlu0 %v4549_v2, %s4703_s4 }
0x274b   :  { %v2445_v6 = vpop.permute.xlu0 %2444 }
0x274c   :  { %v2447_v5 = vmul.f32 %v2445_v6, %v2430_v56 }
0x274e   :  { %v2448_v9 = vpack.c.bf16 %v2447_v5, %v2447_v5 }
0x2750   :  { %2450 = vrot.lane.b32.xlu1 %v2448_v9, %s4704_s5 }
0x27c2   :  { %v2451_v11 = vpop.permute.xlu1 %2450 }
0x27c3   :  { %3762 = vmatmul.mubr.msk.bf16.vlgmr.msra.gmra.mrb[68].mxu1 %vm146_vm6, %v2451_v11 }
0x27c4   :  { %4226 = vmatpush3.bf16.msra.mxu1 %v5161_v63  ;;  %4229 = vmatprep.mubr.msk.bf16.mxu1 %vm4701_vm0, %v4700_v0 }
0x27c5   :  { %4227 = vmatprep.subr.bf16.mxu1 %v4700_v0 }
0x27c8   :  { %4228 = vmatpush3.bf16.msra.mxu1 %v5164_v57 }
0x27c9   :  { %2682 = vmatprep.subr.bf16.mxu1 %v5211_v43 }
0x27cb   :  { %4230 = vmatmul.mubr.msk.bf16.vlgmr.msra.gmra.mrb[72].mxu1 %vm146_vm6, %v2451_v11 }
0x27cc   :  { %2683 = vmatpush1.bf16.msra.mxu1 %v5213_v44  ;;  %2714 = vmatprep.mubr.bf16.mxu1 %v4702_v8 }
0x27cd   :  { %2684 = vmatprep.subr.bf16.mxu1 %v5215_v45 }
0x27d0   :  { %2685 = vmatpush1.bf16.msra.mxu1 %v5219_v48 }
0x27d1   :  { %4249 = vmatprep.subr.bf16.mxu1 %v4700_v0 }
0x2896   :  { %v2489_v23 = vpop.f32.mrb[68].mxu1 }
0x2897   :  { %v2490_v13 = vadd.f32 %v2489_v23, %v5245_v55  ;;  %v5350_v15 = vpop.f32.mrb[69].mxu1 }
0x2898   :  { %v2493_v17 = vpop.f32.mrb[70].mxu1 }
0x2899   :  { %v2536_v16 = vadd.f32 %v2530_v46, %v2490_v13  ;;  %v2494_v22 = vpop.f32.mrb[71].mxu1 }
0x289b   :  { %v3764_v21 = vmul.f32 -1.442695, %v2536_v16 }
0x289d   :  { %4550 = vpow2.f32 %v3764_v21 }
0x289e   :  { %v2597_v30 = vpop.f32.mrb[72].mxu1  ;;  %4552 = vtanh.f32 %v2536_v16 }
0x289f   :  { %v4231_v25 = vpop.f32.mrb[73].mxu1 }
0x28a0   :  { %v2600_v24 = vpop.f32.mrb[74].mxu1 }
0x28a1   :  { %v4232_v20 = vpop.f32.mrb[75].mxu1 }
0x28a7   :  { %v4551_v35 = vpop.eup %4550 }
0x28a8   :  { %v2541_v31 = vadd.f32 1.0, %v4551_v35  ;;  %v4553_v32 = vpop.eup %4552 }
0x28aa   :  { %4554 = vrcp.f32 %v2541_v31 }
0x28b4   :  { %v4555_v36 = vpop.eup %4554 }
0x28b5   :  { %v2544_v3 = vsel %vm4781_vm5, %v4553_v32, %v4555_v36 }
0x28b6   :  { %2547 = vrot.lane.b32.xlu0 %v2544_v3, %s4703_s4  ;;  %v2545_v33 = vmul.f32 %v2544_v3, %v5306_v60 }
0x2928   :  { %v2548_v7 = vpop.permute.xlu0 %2547 }
0x2929   :  { %v2550_v27 = vmul.f32 %v2548_v7, %v2544_v3 }
0x292b   :  { %2552 = vrot.lane.b32.xlu1 %v2550_v27, %s4704_s5 }
0x299d   :  { %v2553_v28 = vpop.permute.xlu1 %2552 }
0x299e   :  { %v5357_v34 = vadd.f32 %v2553_v28, %v2545_v33 }
0x29a0   :  { %4556 = vtanh.f32 %v5357_v34 }
0x29aa   :  { %v4557_v39 = vpop.eup %4556 }
0x29ab   :  { %2558 = vrot.lane.b32.xlu0 %v4557_v39, %s4703_s4 }
0x2a1d   :  { %v2559_v40 = vpop.permute.xlu0 %2558 }
0x2a1e   :  { %v2561_v41 = vmul.f32 %v2559_v40, %v2544_v3 }
0x2a20   :  { %v2562_v37 = vpack.c.bf16 %v2561_v41, %v2561_v41 }
0x2a22   :  { %2604 = vrot.lane.b32.xlu1 %v2562_v37, %s4704_s5 }
0x2a94   :  { %v2605_v42 = vpop.permute.xlu1 %2604 }
0x2a95   :  { %4238 = vmatmul.mubr.msk.bf16.vlgmr.msra.gmra.mrb[80].mxu0 %vm146_vm6, %v2605_v42 }
0x2a96   :  { %4242 = vmatpush3.bf16.msra.mxu0 %v5123_v18  ;;  %4245 = vmatprep.mubr.msk.bf16.mxu0 %vm4701_vm0, %v4700_v0 }
0x2a97   :  { %4243 = vmatprep.subr.bf16.mxu0 %v4700_v0 }
0x2a9a   :  { %4244 = vmatpush3.bf16.msra.mxu0 %v5130_v29 }
0x2a9b   :  { %4257 = vmatprep.subr.bf16.mxu0 %v4700_v0 }
0x2a9d   :  { %4246 = vmatmul.mubr.msk.bf16.vlgmr.msra.gmra.mrb[84].mxu0 %vm146_vm6, %v2605_v42 }
0x2a9e   :  { %4258 = vmatpush3.bf16.msra.mxu0 %v5172_v10  ;;  %4261 = vmatprep.mubr.msk.bf16.mxu0 %vm4701_vm0, %v4700_v0 }
0x2a9f   :  { %4259 = vmatprep.subr.bf16.mxu0 %v4700_v0 }
0x2aa2   :  { %4260 = vmatpush3.bf16.msra.mxu0 %v5176_v12 }
0x2aa3   :  { %4265 = vmatprep.subr.bf16.mxu0 %v4700_v0 }
0x2b68   :  { %v2643_v60 = vpop.f32.mrb[80].mxu0 }
0x2b69   :  { %v2644_v46 = vadd.f32 %v2643_v60, %v2597_v30  ;;  %v4239_v47 = vpop.f32.mrb[81].mxu0 }
0x2b6a   :  { %v2646_v49 = vpop.f32.mrb[82].mxu0 }
0x2b6b   :  { %v2649_v14 = vadd.f32 %v2644_v46, %v5200_v19  ;;  %v4240_v50 = vpop.f32.mrb[83].mxu0 }
0x2b6d   :  { %v3767_v51 = vmul.f32 -1.442695, %v2649_v14 }
0x2b6f   :  { %4558 = vpow2.f32 %v3767_v51 }
0x2b70   :  { %v2757_v52 = vpop.f32.mrb[84].mxu0  ;;  %4560 = vtanh.f32 %v2649_v14 }
0x2b71   :  { %v4247_v54 = vpop.f32.mrb[85].mxu0 }
0x2b72   :  { %v2760_v56 = vpop.f32.mrb[86].mxu0 }
0x2b73   :  { %v4248_v58 = vpop.f32.mrb[87].mxu0 }
0x2b79   :  { %v4559_v62 = vpop.eup %4558 }
0x2b7a   :  { %v2654_v61 = vadd.f32 1.0, %v4559_v62  ;;  %v4561_v1 = vpop.eup %4560 }
0x2b7c   :  { %4562 = vrcp.f32 %v2654_v61 }
0x2b86   :  { %v4563_v2 = vpop.eup %4562 }
0x2b87   :  { %v2657_v6 = vsel %vm4781_vm5, %v4561_v1, %v4563_v2 }
0x2b88   :  { %2660 = vrot.lane.b32.xlu0 %v2657_v6, %s4703_s4  ;;  %v2658_v11 = vmul.f32 %v2657_v6, %v5331_v38 }
0x2bfa   :  { %v2661_v5 = vpop.permute.xlu0 %2660 }
0x2bfb   :  { %v2663_v9 = vmul.f32 %v2661_v5, %v2657_v6 }
0x2bfd   :  { %2665 = vrot.lane.b32.xlu1 %v2663_v9, %s4704_s5 }
0x2c6f   :  { %v2666_v23 = vpop.permute.xlu1 %2665 }
0x2c70   :  { %v5382_v13 = vadd.f32 %v2666_v23, %v2658_v11 }
0x2c72   :  { %4564 = vtanh.f32 %v5382_v13 }
0x2c7c   :  { %v4565_v17 = vpop.eup %4564 }
0x2c7d   :  { %2671 = vrot.lane.b32.xlu0 %v4565_v17, %s4703_s4 }
0x2cef   :  { %v2672_v16 = vpop.permute.xlu0 %2671 }
0x2cf0   :  { %v2674_v22 = vmul.f32 %v2672_v16, %v2657_v6 }
0x2cf2   :  { %v2675_v21 = vpack.c.bf16 %v2674_v22, %v2674_v22 }
0x2cf4   :  { %2677 = vrot.lane.b32.xlu1 %v2675_v21, %s4704_s5 }
0x2d66   :  { %v2678_v30 = vpop.permute.xlu1 %2677 }
0x2d67   :  { %3768 = vmatmul.mubr.msk.bf16.vlgmr.msra.gmra.mrb[76].mxu1 %vm146_vm6, %v2678_v30 }
0x2d68   :  { %4250 = vmatpush3.bf16.msra.mxu1 %v5161_v63  ;;  %4253 = vmatprep.mubr.msk.bf16.mxu1 %vm4701_vm0, %v4700_v0 }
0x2d69   :  { %4251 = vmatprep.subr.bf16.mxu1 %v4700_v0 }
0x2d6c   :  { %4252 = vmatpush3.bf16.msra.mxu1 %v5164_v57 }
0x2d6d   :  { %2909 = vmatprep.subr.bf16.mxu1 %v5211_v43 }
0x2d6f   :  { %4254 = vmatmul.mubr.msk.bf16.vlgmr.msra.gmra.mrb[80].mxu1 %vm146_vm6, %v2678_v30 }
0x2d70   :  { %2910 = vmatpush1.bf16.msra.mxu1 %v5213_v44  ;;  %2941 = vmatprep.mubr.bf16.mxu1 %v4702_v8 }
0x2d71   :  { %2911 = vmatprep.subr.bf16.mxu1 %v5215_v45 }
0x2d74   :  { %2912 = vmatpush1.bf16.msra.mxu1 %v5219_v48 }
0x2d75   :  { %4273 = vmatprep.subr.bf16.mxu1 %v4700_v0 }
0x2e3a   :  { %v2716_v38 = vpop.f32.mrb[76].mxu1 }
0x2e3b   :  { %v2717_v25 = vadd.f32 %v2716_v38, %v5245_v55  ;;  %v5401_v24 = vpop.f32.mrb[77].mxu1 }
0x2e3c   :  { %v2720_v20 = vpop.f32.mrb[78].mxu1  ;;  %v2719_v26 = vadd.f32 %v5401_v24, %v5229_v53 }
0x2e3d   :  { %v2763_v35 = vadd.f32 %v2757_v52, %v2717_v25  ;;  %v2721_v31 = vpop.f32.mrb[79].mxu1 }
0x2e3f   :  { %v3770_v32 = vmul.f32 -1.442695, %v2763_v35 }
0x2e41   :  { %4566 = vpow2.f32 %v3770_v32 }
0x2e42   :  { %v2824_v36 = vpop.f32.mrb[80].mxu1  ;;  %4568 = vtanh.f32 %v2763_v35 }
0x2e43   :  { %v4255_v3 = vpop.f32.mrb[81].mxu1 }
0x2e44   :  { %v2827_v7 = vpop.f32.mrb[82].mxu1 }
0x2e45   :  { %v4256_v27 = vpop.f32.mrb[83].mxu1 }
0x2e4b   :  { %v4567_v33 = vpop.eup %4566 }
0x2e4c   :  { %v2768_v28 = vadd.f32 1.0, %v4567_v33  ;;  %v4569_v39 = vpop.eup %4568 }
0x2e4e   :  { %4570 = vrcp.f32 %v2768_v28 }
0x2e58   :  { %v4571_v40 = vpop.eup %4570 }
0x2e59   :  { %v2771_v41 = vsel %vm4781_vm5, %v4569_v39, %v4571_v40 }
0x2e5a   :  { %2774 = vrot.lane.b32.xlu0 %v2771_v41, %s4703_s4  ;;  %v2772_v60 = vmul.f32 %v2771_v41, %v5357_v34 }
0x2ecc   :  { %v2775_v37 = vpop.permute.xlu0 %2774 }
0x2ecd   :  { %v2777_v42 = vmul.f32 %v2775_v37, %v2771_v41 }
0x2ecf   :  { %2779 = vrot.lane.b32.xlu1 %v2777_v42, %s4704_s5 }
0x2f41   :  { %v2780_v46 = vpop.permute.xlu1 %2779 }
0x2f42   :  { %v5408_v47 = vadd.f32 %v2780_v46, %v2772_v60 }
0x2f44   :  { %4572 = vtanh.f32 %v5408_v47 }
0x2f4e   :  { %v4573_v49 = vpop.eup %4572 }
0x2f4f   :  { %2785 = vrot.lane.b32.xlu0 %v4573_v49, %s4703_s4 }
0x2fc1   :  { %v2786_v14 = vpop.permute.xlu0 %2785 }
0x2fc2   :  { %v2788_v50 = vmul.f32 %v2786_v14, %v2771_v41 }
0x2fc4   :  { %v2789_v51 = vpack.c.bf16 %v2788_v50, %v2788_v50 }
0x2fc6   :  { %2831 = vrot.lane.b32.xlu1 %v2789_v51, %s4704_s5 }
0x3038   :  { %v2832_v52 = vpop.permute.xlu1 %2831 }
0x3039   :  { %4262 = vmatmul.mubr.msk.bf16.vlgmr.msra.gmra.mrb[88].mxu0 %vm146_vm6, %v2832_v52 }
0x303a   :  { %4266 = vmatpush3.bf16.msra.mxu0 %v5123_v18  ;;  %4269 = vmatprep.mubr.msk.bf16.mxu0 %vm4701_vm0, %v4700_v0 }
0x303b   :  { %4267 = vmatprep.subr.bf16.mxu0 %v4700_v0 }
0x303e   :  { %4268 = vmatpush3.bf16.msra.mxu0 %v5130_v29 }
0x303f   :  { %4281 = vmatprep.subr.bf16.mxu0 %v4700_v0 }
0x3041   :  { %4270 = vmatmul.mubr.msk.bf16.vlgmr.msra.gmra.mrb[92].mxu0 %vm146_vm6, %v2832_v52 }
0x3042   :  { %4282 = vmatpush3.bf16.msra.mxu0 %v5172_v10  ;;  %4285 = vmatprep.mubr.msk.bf16.mxu0 %vm4701_vm0, %v4700_v0 }
0x3043   :  { %4283 = vmatprep.subr.bf16.mxu0 %v4700_v0 }
0x3046   :  { %4284 = vmatpush3.bf16.msra.mxu0 %v5176_v12 }
0x3047   :  { %4289 = vmatprep.subr.bf16.mxu0 %v4700_v0 }
0x310c   :  { %v2870_v18 = vpop.f32.mrb[88].mxu0 }
0x310d   :  { %v2871_v34 = vadd.f32 %v2870_v18, %v2824_v36  ;;  %v4263_v54 = vpop.f32.mrb[89].mxu0 }
0x310e   :  { %v2873_v56 = vpop.f32.mrb[90].mxu0 }
0x310f   :  { %v2876_v29 = vadd.f32 %v2871_v34, %v5200_v19  ;;  %v4264_v58 = vpop.f32.mrb[91].mxu0 }
0x3110   :  { %v5465_v58 = vld [vmem:[#allocation2 + $0x70] ss:$8 sps:$4 sm:$0xff]  }
0x3111   :  { %v3773_v62 = vmul.f32 -1.442695, %v2876_v29 }
0x3113   :  { %4574 = vpow2.f32 %v3773_v62 }
0x3114   :  { %v2984_v61 = vpop.f32.mrb[92].mxu0  ;;  %4576 = vtanh.f32 %v2876_v29 }
0x3115   :  { %v4271_v1 = vpop.f32.mrb[93].mxu0 }
0x3116   :  { %v2987_v2 = vpop.f32.mrb[94].mxu0 }
0x3117   :  { %v4272_v6 = vpop.f32.mrb[95].mxu0 }
0x311d   :  { %v4575_v5 = vpop.eup %4574 }
0x311e   :  { %v2881_v9 = vadd.f32 1.0, %v4575_v5  ;;  %v4577_v11 = vpop.eup %4576 }
0x3120   :  { %4578 = vrcp.f32 %v2881_v9 }
0x312a   :  { %v4579_v23 = vpop.eup %4578 }
0x312b   :  { %v2884_v17 = vsel %vm4781_vm5, %v4577_v11, %v4579_v23 }
0x312c   :  { %2887 = vrot.lane.b32.xlu0 %v2884_v17, %s4703_s4  ;;  %v2885_v21 = vmul.f32 %v2884_v17, %v5382_v13 }
0x319e   :  { %v2888_v16 = vpop.permute.xlu0 %2887 }
0x319f   :  { %v2890_v22 = vmul.f32 %v2888_v16, %v2884_v17 }
0x31a1   :  { %2892 = vrot.lane.b32.xlu1 %v2890_v22, %s4704_s5 }
0x3213   :  { %v2893_v30 = vpop.permute.xlu1 %2892 }
0x3214   :  { %v5433_v38 = vadd.f32 %v2893_v30, %v2885_v21 }
0x3216   :  { %4580 = vtanh.f32 %v5433_v38 }
0x3220   :  { %v4581_v25 = vpop.eup %4580 }
0x3221   :  { %2898 = vrot.lane.b32.xlu0 %v4581_v25, %s4703_s4 }
0x3293   :  { %v2899_v20 = vpop.permute.xlu0 %2898 }
0x3294   :  { %v2901_v35 = vmul.f32 %v2899_v20, %v2884_v17 }
0x3296   :  { %v2902_v31 = vpack.c.bf16 %v2901_v35, %v2901_v35 }
0x3298   :  { %2904 = vrot.lane.b32.xlu1 %v2902_v31, %s4704_s5 }
0x330a   :  { %v2905_v32 = vpop.permute.xlu1 %2904 }
0x330b   :  { %3774 = vmatmul.mubr.msk.bf16.vlgmr.msra.gmra.mrb[84].mxu1 %vm146_vm6, %v2905_v32 }
0x330c   :  { %4274 = vmatpush3.bf16.msra.mxu1 %v5161_v63  ;;  %4277 = vmatprep.mubr.msk.bf16.mxu1 %vm4701_vm0, %v4700_v0 }
0x330d   :  { %4275 = vmatprep.subr.bf16.mxu1 %v4700_v0 }
0x3310   :  { %4276 = vmatpush3.bf16.msra.mxu1 %v5164_v57 }
0x3311   :  { %3136 = vmatprep.subr.bf16.mxu1 %v5211_v43 }
0x3313   :  { %4278 = vmatmul.mubr.msk.bf16.vlgmr.msra.gmra.mrb[88].mxu1 %vm146_vm6, %v2905_v32 }
0x3314   :  { %3137 = vmatpush1.bf16.msra.mxu1 %v5213_v44  ;;  %3168 = vmatprep.mubr.bf16.mxu1 %v4702_v8 }
0x3315   :  { %3138 = vmatprep.subr.bf16.mxu1 %v5215_v45 }
0x3318   :  { %3139 = vmatpush1.bf16.msra.mxu1 %v5219_v48 }
0x3319   :  { %4297 = vmatprep.subr.bf16.mxu1 %v4700_v0 }
0x33de   :  { %v2943_v63 = vpop.f32.mrb[84].mxu1 }
0x33df   :  { %v2944_v13 = vadd.f32 %v2943_v63, %v5245_v55  ;;  %v5452_v36 = vpop.f32.mrb[85].mxu1 }
0x33e0   :  { %v2947_v57 = vpop.f32.mrb[86].mxu1  ;;  %v2946_v24 = vadd.f32 %v5452_v36, %v5229_v53 }
0x33e1   :  { %v2990_v3 = vadd.f32 %v2984_v61, %v2944_v13  ;;  %v2948_v7 = vpop.f32.mrb[87].mxu1 }
0x33e2   :  { %v5494_v7 = vld [vmem:[#allocation2 + $0x90] ss:$8 sps:$4 sm:$0xff]  }
0x33e3   :  { %v3776_v27 = vmul.f32 -1.442695, %v2990_v3 }
0x33e5   :  { %4582 = vpow2.f32 %v3776_v27 }
0x33e6   :  { %v3051_v33 = vpop.f32.mrb[88].mxu1  ;;  %4584 = vtanh.f32 %v2990_v3 }
0x33e7   :  { %v4279_v28 = vpop.f32.mrb[89].mxu1 }
0x33e8   :  { %v3054_v39 = vpop.f32.mrb[90].mxu1 }
0x33e9   :  { %v4280_v40 = vpop.f32.mrb[91].mxu1 }
0x33ef   :  { %v4583_v41 = vpop.eup %4582 }
0x33f0   :  { %v2995_v37 = vadd.f32 1.0, %v4583_v41  ;;  %v4585_v42 = vpop.eup %4584 }
0x33f2   :  { %4586 = vrcp.f32 %v2995_v37 }
0x33fc   :  { %v4587_v60 = vpop.eup %4586 }
0x33fd   :  { %v2998_v46 = vsel %vm4781_vm5, %v4585_v42, %v4587_v60 }
0x33fe   :  { %3001 = vrot.lane.b32.xlu0 %v2998_v46, %s4703_s4  ;;  %v2999_v50 = vmul.f32 %v2998_v46, %v5408_v47  ;;  %v5471_v47 = vld [vmem:[#allocation2 + $0x80] ss:$8 sps:$4 sm:$0xff]  }
0x3470   :  { %v3002_v49 = vpop.permute.xlu0 %3001 }
0x3471   :  { %v3004_v14 = vmul.f32 %v3002_v49, %v2998_v46 }
0x3473   :  { %3006 = vrot.lane.b32.xlu1 %v3004_v14, %s4704_s5 }
0x34e5   :  { %v3007_v51 = vpop.permute.xlu1 %3006 }
0x34e6   :  { %v5459_v52 = vadd.f32 %v3007_v51, %v2999_v50 }
0x34e8   :  { %4588 = vtanh.f32 %v5459_v52 }
0x34f2   :  { %v4589_v18 = vpop.eup %4588 }
0x34f3   :  { %3012 = vrot.lane.b32.xlu0 %v4589_v18, %s4703_s4 }
0x3565   :  { %v3013_v34 = vpop.permute.xlu0 %3012 }
0x3566   :  { %v3015_v54 = vmul.f32 %v3013_v34, %v2998_v46 }
0x3568   :  { %v3016_v56 = vpack.c.bf16 %v3015_v54, %v3015_v54 }
0x356a   :  { %3058 = vrot.lane.b32.xlu1 %v3016_v56, %s4704_s5 }
0x35dc   :  { %v3059_v29 = vpop.permute.xlu1 %3058 }
0x35dd   :  { %4286 = vmatmul.mubr.msk.bf16.vlgmr.msra.gmra.mrb[96].mxu0 %vm146_vm6, %v3059_v29 }
0x35de   :  { %4290 = vmatpush3.bf16.msra.mxu0 %v5465_v58  ;;  %4293 = vmatprep.mubr.msk.bf16.mxu0 %vm4701_vm0, %v4700_v0 }
0x35df   :  { %4291 = vmatprep.subr.bf16.mxu0 %v4700_v0 }
0x35e2   :  { %4292 = vmatpush3.bf16.msra.mxu0 %v5471_v47 }
0x35e3   :  { %4305 = vmatprep.subr.bf16.mxu0 %v4700_v0 }
0x35e5   :  { %4294 = vmatmul.mubr.msk.bf16.vlgmr.msra.gmra.mrb[100].mxu0 %vm146_vm6, %v3059_v29 }
0x35e6   :  { %4306 = vmatpush3.bf16.msra.mxu0 %v5172_v10  ;;  %4309 = vmatprep.mubr.msk.bf16.mxu0 %vm4701_vm0, %v4700_v0 }
0x35e7   :  { %4307 = vmatprep.subr.bf16.mxu0 %v4700_v0 }
0x35ea   :  { %4308 = vmatpush3.bf16.msra.mxu0 %v5176_v12 }
0x35eb   :  { %4313 = vmatprep.subr.bf16.mxu0 %v4700_v0 }
0x36b0   :  { %v3097_v62 = vpop.f32.mrb[96].mxu0 }
0x36b1   :  { %v3098_v61 = vadd.f32 %v3097_v62, %v3051_v33  ;;  %v4287_v1 = vpop.f32.mrb[97].mxu0 }
0x36b2   :  { %v3100_v2 = vpop.f32.mrb[98].mxu0 }
0x36b3   :  { %v3103_v6 = vadd.f32 %v3098_v61, %v5200_v19  ;;  %v4288_v5 = vpop.f32.mrb[99].mxu0  ;;  %v4643_v2 = vld [vmem:[#allocation2 + $0xc0] ss:$8 sps:$4 sm:$0xff]  }
0x36b5   :  { %v3779_v9 = vmul.f32 -1.442695, %v3103_v6 }
0x36b7   :  { %4590 = vpow2.f32 %v3779_v9 }
0x36b8   :  { %v3211_v11 = vpop.f32.mrb[100].mxu0  ;;  %4592 = vtanh.f32 %v3103_v6 }
0x36b9   :  { %v4295_v10 = vpop.f32.mrb[101].mxu0 }
0x36ba   :  { %v3214_v23 = vpop.f32.mrb[102].mxu0 }
0x36bb   :  { %v4296_v17 = vpop.f32.mrb[103].mxu0 }
0x36c1   :  { %v4591_v16 = vpop.eup %4590 }
0x36c2   :  { %v3108_v22 = vadd.f32 1.0, %v4591_v16  ;;  %v4593_v12 = vpop.eup %4592 }
0x36c4   :  { %4594 = vrcp.f32 %v3108_v22 }
0x36ce   :  { %v4595_v21 = vpop.eup %4594 }
0x36cf   :  { %v3111_v30 = vsel %vm4781_vm5, %v4593_v12, %v4595_v21 }
0x36d0   :  { %3114 = vrot.lane.b32.xlu0 %v3111_v30, %s4703_s4  ;;  %v3112_v20 = vmul.f32 %v3111_v30, %v5433_v38  ;;  %v5500_v38 = vld [vmem:[#allocation2 + $0xa0] ss:$8 sps:$4 sm:$0xff]  }
0x3742   :  { %v3115_v25 = vpop.permute.xlu0 %3114 }
0x3743   :  { %v3117_v19 = vmul.f32 %v3115_v25, %v3111_v30 }
0x3745   :  { %3119 = vrot.lane.b32.xlu1 %v3117_v19, %s4704_s5 }
0x37b7   :  { %v3120_v35 = vpop.permute.xlu1 %3119 }
0x37b8   :  { %v5488_v31 = vadd.f32 %v3120_v35, %v3112_v20 }
0x37ba   :  { %4596 = vtanh.f32 %v5488_v31 }
0x37c4   :  { %v4597_v32 = vpop.eup %4596 }
0x37c5   :  { %3125 = vrot.lane.b32.xlu0 %v4597_v32, %s4703_s4 }
0x3837   :  { %v3126_v63 = vpop.permute.xlu0 %3125 }
0x3838   :  { %v3128_v13 = vmul.f32 %v3126_v63, %v3111_v30 }
0x383a   :  { %v3129_v57 = vpack.c.bf16 %v3128_v13, %v3128_v13 }
0x383c   :  { %3131 = vrot.lane.b32.xlu1 %v3129_v57, %s4704_s5 }
0x38ae   :  { %v3132_v3 = vpop.permute.xlu1 %3131 }
0x38af   :  { %3780 = vmatmul.mubr.msk.bf16.vlgmr.msra.gmra.mrb[92].mxu1 %vm146_vm6, %v3132_v3 }
0x38b0   :  { %4298 = vmatpush3.bf16.msra.mxu1 %v5494_v7  ;;  %4301 = vmatprep.mubr.msk.bf16.mxu1 %vm4701_vm0, %v4700_v0 }
0x38b1   :  { %4299 = vmatprep.subr.bf16.mxu1 %v4700_v0 }
0x38b4   :  { %4300 = vmatpush3.bf16.msra.mxu1 %v5500_v38 }
0x38b5   :  { %3363 = vmatprep.subr.bf16.mxu1 %v5211_v43 }
0x38b7   :  { %4302 = vmatmul.mubr.msk.bf16.vlgmr.msra.gmra.mrb[96].mxu1 %vm146_vm6, %v3132_v3 }
0x38b8   :  { %3364 = vmatpush1.bf16.msra.mxu1 %v5213_v44  ;;  %3395 = vmatprep.mubr.bf16.mxu1 %v4702_v8 }
0x38b9   :  { %3365 = vmatprep.subr.bf16.mxu1 %v5215_v45 }
0x38bc   :  { %3366 = vmatpush1.bf16.msra.mxu1 %v5219_v48 }
0x38bd   :  { %4321 = vmatprep.subr.bf16.mxu1 %v4700_v0 }
0x3982   :  { %v3170_v27 = vpop.f32.mrb[92].mxu1 }
0x3983   :  { %v3171_v33 = vadd.f32 %v3170_v27, %v5245_v55  ;;  %v5511_v28 = vpop.f32.mrb[93].mxu1 }
0x3984   :  { %v3174_v39 = vpop.f32.mrb[94].mxu1 }
0x3985   :  { %v3217_v40 = vadd.f32 %v3211_v11, %v3171_v33  ;;  %v3175_v43 = vpop.f32.mrb[95].mxu1 }
0x3986   :  { %v4646_v43 = vld [vmem:[#allocation2 + $0xd0] ss:$8 sps:$4 sm:$0xff]  }
0x3987   :  { %v3782_v41 = vmul.f32 -1.442695, %v3217_v40 }
0x3989   :  { %4598 = vpow2.f32 %v3782_v41  ;;  %v4647_v41 = vld [vmem:[#allocation2 + $0xe4] ss:$8 sps:$4 sm:$0xff]  }
0x398a   :  { %v3278_v37 = vpop.f32.mrb[96].mxu1  ;;  %4600 = vtanh.f32 %v3217_v40 }
0x398b   :  { %v4303_v44 = vpop.f32.mrb[97].mxu1 }
0x398c   :  { %v3281_v42 = vpop.f32.mrb[98].mxu1 }
0x398d   :  { %v4304_v60 = vpop.f32.mrb[99].mxu1 }
0x3993   :  { %v4599_v46 = vpop.eup %4598 }
0x3994   :  { %v3222_v45 = vadd.f32 1.0, %v4599_v46  ;;  %v4601_v48 = vpop.eup %4600 }
0x3996   :  { %4602 = vrcp.f32 %v3222_v45 }
0x39a0   :  { %v4603_v49 = vpop.eup %4602 }
0x39a1   :  { %v3225_v14 = vsel %vm4781_vm5, %v4601_v48, %v4603_v49 }
0x39a2   :  { %3228 = vrot.lane.b32.xlu0 %v3225_v14, %s4703_s4  ;;  %v3226_v18 = vmul.f32 %v3225_v14, %v5459_v52  ;;  %v4642_v52 = vld [vmem:[#allocation2 + $0xb0] ss:$8 sps:$4 sm:$0xff]  }
0x3a14   :  { %v3229_v50 = vpop.permute.xlu0 %3228 }
0x3a15   :  { %v3231_v51 = vmul.f32 %v3229_v50, %v3225_v14 }
0x3a17   :  { %3233 = vrot.lane.b32.xlu1 %v3231_v51, %s4704_s5 }
0x3a89   :  { %v3234_v34 = vpop.permute.xlu1 %3233 }
0x3a8a   :  { %v5518_v54 = vadd.f32 %v3234_v34, %v3226_v18 }
0x3a8c   :  { %4604 = vtanh.f32 %v5518_v54 }
0x3a96   :  { %v4605_v56 = vpop.eup %4604 }
0x3a97   :  { %3239 = vrot.lane.b32.xlu0 %v4605_v56, %s4703_s4 }
0x3b09   :  { %v3240_v29 = vpop.permute.xlu0 %3239 }
0x3b0a   :  { %v3242_v62 = vmul.f32 %v3240_v29, %v3225_v14 }
0x3b0c   :  { %v3243_v61 = vpack.c.bf16 %v3242_v62, %v3242_v62 }
0x3b0e   :  { %3285 = vrot.lane.b32.xlu1 %v3243_v61, %s4704_s5 }
0x3b80   :  { %v3286_v1 = vpop.permute.xlu1 %3285 }
0x3b81   :  { %4310 = vmatmul.mubr.msk.bf16.vlgmr.msra.gmra.mrb[104].mxu0 %vm146_vm6, %v3286_v1 }
0x3b82   :  { %4314 = vmatpush3.bf16.msra.mxu0 %v5465_v58  ;;  %4317 = vmatprep.mubr.msk.bf16.mxu0 %vm4701_vm0, %v4700_v0 }
0x3b83   :  { %4315 = vmatprep.subr.bf16.mxu0 %v4700_v0 }
0x3b86   :  { %4316 = vmatpush3.bf16.msra.mxu0 %v5471_v47  ;;  %v5537_v47 = vld [vmem:[%s5611_s2 + $0x3] ss:$0 sm:$0xff]  ;;  %s4705_s2 = smov 24  }
0x3b87   :  { %4329 = vmatprep.subr.bf16.mxu0 %v4700_v0 }
0x3b89   :  { %4318 = vmatmul.mubr.msk.bf16.vlgmr.msra.gmra.mrb[108].mxu0 %vm146_vm6, %v3286_v1 }
0x3b8a   :  { %4330 = vmatpush3.bf16.msra.mxu0 %v4642_v52  ;;  %4333 = vmatprep.mubr.msk.bf16.mxu0 %vm4701_vm0, %v4700_v0 }
0x3b8b   :  { %4331 = vmatprep.subr.bf16.mxu0 %v4700_v0 }
0x3b8e   :  { %4332 = vmatpush3.bf16.msra.mxu0 %v4643_v2 }
0x3c54   :  { %v3324_v58 = vpop.f32.mrb[104].mxu0 }
0x3c55   :  { %v3325_v6 = vadd.f32 %v3324_v58, %v3278_v37  ;;  %v4311_v5 = vpop.f32.mrb[105].mxu0  ;;  %v4648_v37 = vld [vmem:[#allocation2 + $0xe0] ss:$8 sps:$4 sm:$0xff]  }
0x3c56   :  { %v3327_v9 = vpop.f32.mrb[106].mxu0 }
0x3c57   :  { %v3330_v11 = vadd.f32 %v5537_v47, %v3325_v6  ;;  %v4312_v10 = vpop.f32.mrb[107].mxu0 }
0x3c59   :  { %v3785_v23 = vmul.f32 -1.442695, %v3330_v11 }
0x3c5b   :  { %4606 = vpow2.f32 %v3785_v23 }
0x3c5c   :  { %v3438_v17 = vpop.f32.mrb[108].mxu0  ;;  %4608 = vtanh.f32 %v3330_v11 }
0x3c5d   :  { %v4319_v16 = vpop.f32.mrb[109].mxu0 }
0x3c5e   :  { %v3441_v22 = vpop.f32.mrb[110].mxu0 }
0x3c5f   :  { %v4320_v12 = vpop.f32.mrb[111].mxu0 }
0x3c65   :  { %v4607_v21 = vpop.eup %4606 }
0x3c66   :  { %v3335_v30 = vadd.f32 1.0, %v4607_v21  ;;  %v4609_v25 = vpop.eup %4608 }
0x3c68   :  { %4610 = vrcp.f32 %v3335_v30 }
0x3c72   :  { %v4611_v19 = vpop.eup %4610 }
0x3c73   :  { %v3338_v20 = vsel %vm4781_vm5, %v4609_v25, %v4611_v19 }
0x3c74   :  { %3341 = vrot.lane.b32.xlu0 %v3338_v20, %s4703_s4  ;;  %v3339_v63 = vmul.f32 %v3338_v20, %v5488_v31  ;;  %v4645_v31 = vld [vmem:[#allocation2 + $0xd4] ss:$8 sps:$4 sm:$0xff]  }
0x3ce6   :  { %v3342_v35 = vpop.permute.xlu0 %3341 }
0x3ce7   :  { %v3344_v32 = vmul.f32 %v3342_v35, %v3338_v20 }
0x3ce9   :  { %3346 = vrot.lane.b32.xlu1 %v3344_v32, %s4704_s5 }
0x3d5b   :  { %v3347_v13 = vpop.permute.xlu1 %3346 }
0x3d5c   :  { %v5545_v57 = vadd.f32 %v3347_v13, %v3339_v63  ;;  %v2265_v63 = vadd.f32 %v5299_v4, %v5229_v53  ;;  %v3173_v13 = vadd.f32 %v5511_v28, %v5229_v53  ;;  %v2492_v4 = vadd.f32 %v5350_v15, %v5229_v53 }
0x3d5e   :  { %4612 = vtanh.f32 %v5545_v57 }
0x3d68   :  { %v4613_v3 = vpop.eup %4612 }
0x3d69   :  { %3352 = vrot.lane.b32.xlu0 %v4613_v3, %s4703_s4 }
0x3ddb   :  { %v3353_v27 = vpop.permute.xlu0 %3352 }
0x3ddc   :  { %v3355_v33 = vmul.f32 %v3353_v27, %v3338_v20 }
0x3dde   :  { %v3356_v39 = vpack.c.bf16 %v3355_v33, %v3355_v33 }
0x3de0   :  { %3358 = vrot.lane.b32.xlu1 %v3356_v39, %s4704_s5 }
0x3e52   :  { %v3359_v40 = vpop.permute.xlu1 %3358 }
0x3e53   :  { %3786 = vmatmul.mubr.msk.bf16.vlgmr.msra.gmra.mrb[100].mxu1 %vm146_vm6, %v3359_v40 }
0x3e54   :  { %4322 = vmatpush3.bf16.msra.mxu1 %v5494_v7  ;;  %4325 = vmatprep.mubr.msk.bf16.mxu1 %vm4701_vm0, %v4700_v0 }
0x3e55   :  { %4323 = vmatprep.subr.bf16.mxu1 %v4700_v0 }
0x3e58   :  { %4324 = vmatpush3.bf16.msra.mxu1 %v5500_v38 }
0x3e59   :  { %3590 = vmatprep.subr.bf16.mxu1 %v4645_v31 }
0x3e5b   :  { %4326 = vmatmul.mubr.msk.bf16.vlgmr.msra.gmra.mrb[104].mxu1 %vm146_vm6, %v3359_v40 }
0x3e5c   :  { %3591 = vmatpush1.bf16.msra.mxu1 %v4646_v43  ;;  %3622 = vmatprep.mubr.bf16.mxu1 %v4702_v8 }
0x3e5d   :  { %3592 = vmatprep.subr.bf16.mxu1 %v4647_v41 }
0x3e60   :  { %3593 = vmatpush1.bf16.msra.mxu1 %v4648_v37  ;;  %v2038_v37 = vadd.f32 %v5248_v59, %v5229_v53 }
0x3f26   :  { %v3397_v7 = vpop.f32.mrb[100].mxu1 }
0x3f27   :  { %v3398_v44 = vadd.f32 %v3397_v7, %v5245_v55  ;;  %v5559_v42 = vpop.f32.mrb[101].mxu1 }
0x3f28   :  { %v3401_v0 = vpop.f32.mrb[102].mxu1  ;;  %v3400_v28 = vadd.f32 %v5559_v42, %v5229_v53 }
0x3f29   :  { %v3444_v60 = vadd.f32 %v3438_v17, %v3398_v44  ;;  %v3402_v38 = vpop.f32.mrb[103].mxu1 }
0x3f2b   :  { %v3788_v46 = vmul.f32 -1.442695, %v3444_v60 }
0x3f2d   :  { %4614 = vpow2.f32 %v3788_v46 }
0x3f2e   :  { %v3505_v45 = vpop.f32.mrb[104].mxu1  ;;  %4616 = vtanh.f32 %v3444_v60 }
0x3f2f   :  { %v4327_v48 = vpop.f32.mrb[105].mxu1 }
0x3f30   :  { %v3508_v49 = vpop.f32.mrb[106].mxu1 }
0x3f31   :  { %v4328_v14 = vpop.f32.mrb[107].mxu1 }
0x3f37   :  { %v4615_v50 = vpop.eup %4614 }
0x3f38   :  { %v3449_v8 = vadd.f32 1.0, %v4615_v50  ;;  %v4617_v51 = vpop.eup %4616 }
0x3f3a   :  { %4618 = vrcp.f32 %v3449_v8 }
0x3f44   :  { %v4619_v18 = vpop.eup %4618 }
0x3f45   :  { %v3452_v55 = vsel %vm4781_vm5, %v4617_v51, %v4619_v18 }
0x3f46   :  { %3455 = vrot.lane.b32.xlu0 %v3452_v55, %s4703_s4  ;;  %v3453_v29 = vmul.f32 %v3452_v55, %v5518_v54 }
0x3fb8   :  { %v3456_v34 = vpop.permute.xlu0 %3455 }
0x3fb9   :  { %v3458_v56 = vmul.f32 %v3456_v34, %v3452_v55 }
0x3fbb   :  { %3460 = vrot.lane.b32.xlu1 %v3458_v56, %s4704_s5 }
0x402d   :  { %v3461_v62 = vpop.permute.xlu1 %3460 }
0x402e   :  { %v3463_v61 = vadd.f32 %v3461_v62, %v3453_v29 }
0x4030   :  { %4620 = vtanh.f32 %v3463_v61 }
0x403a   :  { %v4621_v1 = vpop.eup %4620 }
0x403b   :  { %3466 = vrot.lane.b32.xlu0 %v4621_v1, %s4703_s4 }
0x40ad   :  { %v3467_v52 = vpop.permute.xlu0 %3466 }
0x40ae   :  { %v3469_v2 = vmul.f32 %v3467_v52, %v3452_v55 }
0x40b0   :  { %v3470_v58 = vpack.c.bf16 %v3469_v2, %v3469_v2 }
0x40b2   :  { %3512 = vrot.lane.b32.xlu1 %v3470_v58, %s4704_s5 }
0x4124   :  { %v3513_v6 = vpop.permute.xlu1 %3512 }
0x4125   :  { %4334 = vmatmul.mubr.msk.bf16.vlgmr.msra.gmra.mrb[112].mxu0 %vm146_vm6, %v3513_v6 }
0x41f8   :  { %v3551_v5 = vpop.f32.mrb[112].mxu0 }
0x41f9   :  { %v3552_v9 = vadd.f32 %v3551_v5, %v3505_v45  ;;  %v4335_v11 = vpop.f32.mrb[113].mxu0 }
0x41fa   :  { %v3554_v10 = vpop.f32.mrb[114].mxu0 }
0x41fb   :  { %v3557_v54 = vadd.f32 %v5537_v47, %v3552_v9  ;;  %v4336_v23 = vpop.f32.mrb[115].mxu0 }
0x41fd   :  { %v3791_v17 = vmul.f32 -1.442695, %v3557_v54 }
0x41ff   :  { %4622 = vpow2.f32 %v3791_v17 }
0x4200   :  { %4624 = vtanh.f32 %v3557_v54 }
0x4209   :  { %v4623_v16 = vpop.eup %4622 }
0x420a   :  { %v3562_v22 = vadd.f32 1.0, %v4623_v16  ;;  %v4625_v12 = vpop.eup %4624 }
0x420c   :  { %4626 = vrcp.f32 %v3562_v22 }
0x4216   :  { %v4627_v21 = vpop.eup %4626 }
0x4217   :  { %v3565_v30 = vsel %vm4781_vm5, %v4625_v12, %v4627_v21 }
0x4218   :  { %3568 = vrot.lane.b32.xlu0 %v3565_v30, %s4703_s4  ;;  %v3566_v47 = vmul.f32 %v3565_v30, %v5545_v57 }
0x428a   :  { %v3569_v25 = vpop.permute.xlu0 %3568 }
0x428b   :  { %v3571_v19 = vmul.f32 %v3569_v25, %v3565_v30 }
0x428d   :  { %3573 = vrot.lane.b32.xlu1 %v3571_v19, %s4704_s5 }
0x42ff   :  { %v3574_v20 = vpop.permute.xlu1 %3573 }
0x4300   :  { %v3576_v35 = vadd.f32 %v3574_v20, %v3566_v47 }
0x4302   :  { %4628 = vtanh.f32 %v3576_v35 }
0x430c   :  { %v4629_v32 = vpop.eup %4628 }
0x430d   :  { %3579 = vrot.lane.b32.xlu0 %v4629_v32, %s4703_s4 }
0x4311   :  { %3631 = vrot.lane.b32.xlu0 %v2265_v63, %s4699_s23  ;;  %s4710_s23 = smov [#allocation5]  }
0x4312   :  { %s3679_s24 = sshll.u32 %s4710_s23, 4  ;;  %s3680_s24 = int_to_ptr.vmem [resolvable:$true] %s3679_s24 }
0x4313   :  { %s4671_s25 = scalar_lea.vmem %s3680_s24, 32  ;;  %p4676_p9 = scmp.lt.s32.totalorder %s3680_s24, %s3680_s24 }
0x4314   :  { %p4672_p8 = scmp.ne.s32.totalorder %s3680_s24, %s4671_s25  ;;  %p4677_p10 = scmp.lt.s32.totalorder %s4671_s25, %s4671_s25 }
0x4315   :  { %3639 = vrot.lane.b32.xlu0 %v2719_v26, %s4705_s2 }
0x4316   :  { %p4678_p11 = por %p4677_p10, %p4676_p9 }
0x4318   :  { %p4679_p12 = pnand %p4678_p11, %p4672_p8 }
0x4319   :  { %3647 = vrot.lane.b32.xlu0 %v3173_v13, %s4706_s19 }
0x437f   :  { %v3580_v57 = vpop.permute.xlu0 %3579 }
0x4380   :  { %v3582_v3 = vmul.f32 %v3580_v57, %v3565_v30 }
0x4382   :  { %v3583_v27 = vpack.c.bf16 %v3582_v3, %v3582_v3 }
0x4383   :  { %v3632_v41 = vpop.permute.xlu0 %3631 }
0x4384   :  { %3585 = vrot.lane.b32.xlu1 %v3583_v27, %s4704_s5  ;;  %v3658_v44 = vsel %vm85_vm2, %v2038_v37, %v3632_v41 }
0x4387   :  { %v3640_v7 = vpop.permute.xlu0 %3639 }
0x4388   :  { %3635 = vrot.lane.b32.xlu1 %v2492_v4, %s4707_s20 }
0x438b   :  { %v3648_v38 = vpop.permute.xlu0 %3647 }
0x438c   :  { %3643 = vrot.lane.b32.xlu1 %v2946_v24, %s4704_s5 }
0x4390   :  { %3651 = vrot.lane.b32.xlu1 %v3400_v28, %s4708_s21 }
0x43f6   :  { %v3586_v33 = vpop.permute.xlu1 %3585 }
0x43f7   :  { %3792 = vmatmul.mubr.msk.bf16.vlgmr.msra.gmra.mrb[108].mxu1 %vm146_vm6, %v3586_v33 }
0x43fa   :  { %v3636_v36 = vpop.permute.xlu1 %3635 }
0x43fb   :  { %v3660_v0 = vsel %vm3659_vm7, %v3658_v44, %v3636_v36 }
0x43fc   :  { %v3662_v60 = vsel %vm3661_vm8, %v3660_v0, %v3640_v7 }
0x43fe   :  { %v3644_v42 = vpop.permute.xlu1 %3643 }
0x43ff   :  { %v3663_v46 = vsel %vm146_vm6, %v3662_v60, %v3644_v42 }
0x4400   :  { %v3665_v48 = vsel %vm3664_vm9, %v3663_v46, %v3648_v38 }
0x4402   :  { %v3652_v45 = vpop.permute.xlu1 %3651 }
0x44ca   :  { %v3624_v39 = vpop.f32.mrb[108].mxu1 }
0x44cb   :  { %v3625_v40 = vpop.f32.mrb[109].mxu1 }
0x44cc   :  { %v3626_v31 = vadd.f32 %v3625_v40, %v5229_v53  ;;  %v3627_v15 = vpop.f32.mrb[110].mxu1  ;;  %v3667_v53 = vsel %vm3666_vm10, %v3665_v48, %v3652_v45 }
0x44cd   :  { %v3628_v43 = vpop.f32.mrb[111].mxu1 }
0x44ce   :  { %3655 = vrot.lane.b32.xlu0 %v3626_v31, %s4709_s22 }
0x4540   :  { %v3656_v59 = vpop.permute.xlu0 %3655 }
0x4541   :  { %v3669_v49 = vsel %vm3668_vm11, %v3667_v53, %v3656_v59 }
0x4542   :  { %v3671_v14 = vsel %vm3670_vm12, %v3669_v49, 0.0 }
0x4543   :  { %3672 = vst [vmem:[#allocation5] sm:$0x3] %v3671_v14 }
0x4544   :  { %4682 = shalt.err (!%p4679_p12)
}
0x4545   :  { %s4683_s27 = scalar_lea.hbm %s5612_s3, 32 }
0x4546   :  { %p4684_p13 = scmp.ne.s32.totalorder %s5612_s3, %s4683_s27  ;;  %p4687_p0 = scmp.lt.u32.totalorder %s4683_s27, %s5612_s3 }
0x4548   :  { %p4689_p1 = pnand %p4687_p0, %p4684_p13 }
0x454a   :  { %4692 = shalt.err (!%p4689_p1)
}
0x454b   :  { %3682 = dma.vmem_to_hbm [thread:$0]  %s3680_s24, 32, %s5612_s3, [#allocation4]  }
0x454c   :  { %4695 = dma.done.wait [#allocation4], 32  }
0x454d   :  { %4696 = vsyncadd [#allocation4], 4294967264 }
0x454e   :  { %3686 = vsyncpa [#allocation3], 1 }
0x454f   :  { %3687 = vsyncpa [#allocation4], 1 }

</bundles_post_ra>
